<compile_context>
chip_gen: v5e
topology: v5e:2x2
jax: 0.10.0
libtpu: 0.0.40
codegen_flags: <defaults>
</compile_context>

<pallas_src>
import numpy as np

import jax
import jax.numpy as jnp
from jax import lax
from jax.experimental import pallas as pl
from jax.experimental.pallas import tpu as pltpu


HEAD_ORDER = ('yaw', 'pitch', 'roll', 't', 'exp')


def _round_up(v, m):
    return ((v + m - 1) // m) * m


# ----------------------------------------------------------------------------
# Kernel
# ----------------------------------------------------------------------------
def make_mapping_kernel(*, layer, l_in, l_pad, k_first=7, k_enc=3, dilation=3,
                        neg_slope=0.1):
    crop = ((k_enc - 1) * dilation) // 2            # == 3  (residual [:, :, 3:-3])

    def kernel(x_ref, w1_ref, b1_ref, we_ref, be_ref, wh_ref, bh_ref, out_ref):
        # x_ref : (b_tile*l_pad, C_pad)   bf16  (per-sample stride = l_pad rows)
        # w1_ref: (k_first, C_pad, D)     bf16  per-tap first-conv weights
        # b1_ref: (1, D)                  f32
        # we_ref: (layer, k_enc, D, D)    bf16  per-tap encoder-conv weights
        # be_ref: (layer, 1, D)           f32
        # wh_ref: (D, total_pad)          bf16  fused head weights (lane padded)
        # bh_ref: (1, total_pad)          f32
        # out_ref:(b_tile, 1, total_pad)  f32
        rows = x_ref.shape[0]
        bt = rows // l_pad
        mxu = w1_ref.dtype

        x = x_ref[...]                                           # (rows, C_pad)

        # ---- first: Conv1d(coeff_nc -> D, k=7, valid) as shifted-tap matmuls
        r1 = rows - (k_first - 1)
        acc = jnp.dot(x[0:r1, :], w1_ref[0],
                      preferred_element_type=jnp.float32)
        for k in range(1, k_first):
            acc = acc + jnp.dot(x[k:k + r1, :], w1_ref[k],
                                preferred_element_type=jnp.float32)
        h = acc + b1_ref[...]                                    # (r1, D) f32

        # ---- encoders: LeakyReLU(0.1) -> dilated conv (k=3, d=3) + residual
        for i in range(layer):
            cur = h.shape[0]
            r2 = cur - (k_enc - 1) * dilation
            a = jnp.where(h >= 0.0, h, neg_slope * h).astype(mxu)
            acc = h[crop:crop + r2, :] + be_ref[i]               # residual + bias
            for k in range(k_enc):
                acc = acc + jnp.dot(a[k * dilation:k * dilation + r2, :],
                                    we_ref[i, k],
                                    preferred_element_type=jnp.float32)
            h = acc                                              # (r2, D) f32

        # ---- AdaptiveAvgPool1d(1): per-sample mean over valid rows (masked)
        vf = l_in - (k_first - 1) - (k_enc - 1) * dilation * layer
        r_final = h.shape[0]
        row = lax.broadcasted_iota(jnp.int32, (bt, r_final), 1)
        base = lax.broadcasted_iota(jnp.int32, (bt, r_final), 0) * l_pad
        pool = ((row >= base) & (row < base + vf)).astype(jnp.float32) * (1.0 / vf)
        pooled = jnp.dot(pool, h, preferred_element_type=jnp.float32)  # (bt, D)

        # ---- fused linear heads (yaw|pitch|roll|t|exp), lane-dense output
        out = jnp.dot(pooled.astype(mxu), wh_ref[...],
                      preferred_element_type=jnp.float32) + bh_ref[...]
        out_ref[...] = out[:, None, :]

    return kernel


# ----------------------------------------------------------------------------
# One-time weight packing (outside the per-inference path)
# ----------------------------------------------------------------------------
def pack_mapping_params(params, *, layer, num_bins, num_kp,
                        compute_dtype=jnp.bfloat16):
    d, c_in, k_first = params['w1'].shape
    c_pad = _round_up(c_in, 128)
    head_dims = (num_bins, num_bins, num_bins, 3, 3 * num_kp)
    total = int(sum(head_dims))
    total_pad = _round_up(total, 128)

    packed = {}
    # first conv (D, C_in, 7) -> per-tap (7, C_pad, D), zero-padded channels
    w1_taps = jnp.transpose(params['w1'], (2, 1, 0))             # (7, C_in, D)
    packed['w1'] = jnp.pad(
        w1_taps, ((0, 0), (0, c_pad - c_in), (0, 0))).astype(compute_dtype)
    packed['b1'] = params['b1'].reshape(1, d).astype(jnp.float32)
    # encoder convs (D, D, 3) -> per-tap (layer, 3, D, D)
    packed['we'] = jnp.stack(
        [jnp.transpose(params[f'we{i}'], (2, 1, 0)) for i in range(layer)],
        axis=0).astype(compute_dtype)
    packed['be'] = jnp.stack(
        [params[f'be{i}'].reshape(1, d) for i in range(layer)],
        axis=0).astype(jnp.float32)
    # fused heads, lane-padded to a multiple of 128
    wh = jnp.concatenate([params[f'w_{n}'].T for n in HEAD_ORDER], axis=1)
    packed['wh'] = jnp.pad(
        wh, ((0, 0), (0, total_pad - total))).astype(compute_dtype)
    bh = jnp.concatenate([params[f'b_{n}'] for n in HEAD_ORDER]).reshape(1, total)
    packed['bh'] = jnp.pad(
        bh, ((0, 0), (0, total_pad - total))).astype(jnp.float32)

    packed['meta'] = dict(layer=layer, c_in=c_in, c_pad=c_pad, d=d,
                          k_first=k_first, head_dims=head_dims,
                          total=total, total_pad=total_pad)
    return packed


# ----------------------------------------------------------------------------
# Forward wrapper
# ----------------------------------------------------------------------------
def _pick_b_tile(batch):
    # largest divisor of batch not exceeding min(16, batch//2):
    # keeps >= 2 programs (v7x has 2 TCs) while amortising per-step overhead.
    cap = min(16, max(1, batch // 2))
    for cand in range(cap, 0, -1):
        if batch % cand == 0:
            return cand
    return 1


def _const_index_map(ndim):
    def index_map(i):
        return (0,) * ndim
    return index_map


def _weight_spec(arr, single_buffer):
    if single_buffer:
        return pl.BlockSpec(arr.shape, _const_index_map(arr.ndim),
                            pipeline_mode=pl.Buffered(1))
    return pl.BlockSpec(arr.shape, _const_index_map(arr.ndim))


def mapping_net_pallas(x, packed, *, b_tile=None):
    meta = packed['meta']
    layer, c_in, c_pad = meta['layer'], meta['c_in'], meta['c_pad']
    k_first = meta['k_first']
    total, total_pad = meta['total'], meta['total_pad']
    head_dims = meta['head_dims']

    B, cx, l_in = x.shape
    assert cx == c_in
    assert l_in - (k_first - 1) - 6 * layer >= 1, \
        "sequence too short for the valid convolutions"

    bt = b_tile if b_tile is not None else _pick_b_tile(B)
    assert B % bt == 0, "pad batch to a multiple of b_tile"

    l_pad = _round_up(l_in, 16)          # per-sample stride, bf16 sublane aligned
    compute_dtype = packed['w1'].dtype

    # activation layout: flat (B*l_pad, C_pad) slab, time on sublanes,
    # channels on (zero-padded) lanes.
    x_t = jnp.transpose(x, (0, 2, 1))                            # (B, L, C_in)
    x_t = jnp.pad(x_t, ((0, 0), (0, l_pad - l_in), (0, c_pad - c_in)))
    x_flat = x_t.reshape(B * l_pad, c_pad).astype(compute_dtype)

    weights = (packed['w1'], packed['b1'], packed['we'], packed['be'],
               packed['wh'], packed['bh'])
    kernel = make_mapping_kernel(layer=layer, l_in=l_in, l_pad=l_pad,
                                 k_first=k_first)

    def run(single_buffer_weights):
        in_specs = [pl.BlockSpec((bt * l_pad, c_pad), lambda i: (i, 0))]
        in_specs += [_weight_spec(w, single_buffer_weights) for w in weights]
        out = pl.pallas_call(
            kernel,
            grid=(B // bt,),
            in_specs=in_specs,
            out_specs=pl.BlockSpec((bt, 1, total_pad), lambda i: (i, 0, 0)),
            out_shape=jax.ShapeDtypeStruct((B, 1, total_pad), jnp.float32),
            compiler_params=pltpu.CompilerParams(
                dimension_semantics=("parallel",),
                # below v7x's 64 MiB physical VMEM; plenty on v5e/v6e (128 MiB)
                vmem_limit_bytes=48 * 1024 * 1024),
        )(x_flat, *weights)
        return jax.block_until_ready(out)

    try:
        # single-buffer the grid-invariant weights (halves their VMEM footprint)
        out = run(True)
    except Exception:
        # pl.Buffered(1) / pipeline_mode unavailable -> default double buffering
        out = run(False)

    out = out.reshape(B, total_pad)[:, :total]
    offs = np.cumsum((0,) + tuple(head_dims))
    return {name: out[:, int(offs[i]):int(offs[i + 1])]
            for i, name in enumerate(HEAD_ORDER)}


# ----------------------------------------------------------------------------
# Pure-JAX reference (f32, original weight layout) — correctness check only
# ----------------------------------------------------------------------------
def ref_forward(x, params, layer):
    out = lax.conv_general_dilated(
        x, params['w1'], window_strides=(1,), padding='VALID',
        dimension_numbers=('NCH', 'OIH', 'NCH'))
    out = out + params['b1'][None, :, None]
    for i in range(layer):
        a = jnp.where(out >= 0, out, 0.1 * out)
        c = lax.conv_general_dilated(
            a, params[f'we{i}'], window_strides=(1,), padding='VALID',
            rhs_dilation=(3,), dimension_numbers=('NCH', 'OIH', 'NCH'))
        out = c + params[f'be{i}'][None, :, None] + out[:, :, 3:-3]
    pooled = jnp.mean(out, axis=2)

    def lin(name):
        return pooled @ params[f'w_{name}'].T + params[f'b_{name}']

    return {'yaw': lin('yaw'), 'pitch': lin('pitch'), 'roll': lin('roll'),
            't': lin('t'), 'exp': lin('exp')}


def init_params(key, coeff_nc, descriptor_nc, layer, num_kp, num_bins,
                scale=0.05):
    n_keys = 2 + 2 * layer + 10
    keys = iter(jax.random.split(key, n_keys))

    def nrm(shape):
        return scale * jax.random.normal(next(keys), shape, dtype=jnp.float32)

    p = {'w1': nrm((descriptor_nc, coeff_nc, 7)), 'b1': nrm((descriptor_nc,))}
    for i in range(layer):
        p[f'we{i}'] = nrm((descriptor_nc, descriptor_nc, 3))
        p[f'be{i}'] = nrm((descriptor_nc,))
    for name, odim in (('yaw', num_bins), ('pitch', num_bins),
                       ('roll', num_bins), ('t', 3), ('exp', 3 * num_kp)):
        p[f'w_{name}'] = nrm((odim, descriptor_nc))
        p[f'b_{name}'] = nrm((odim,))
    return p


if __name__ == "__main__":
    # small shapes consistent with MappingNet(coeff_nc=8, descriptor_nc=32,
    # layer=2, num_kp=4, num_bins=8); input (B=4, coeff_nc=8, T=27)
    coeff_nc, descriptor_nc, layer, num_kp, num_bins = 8, 32, 2, 4, 8
    B, seq = 4, 27

    key = jax.random.PRNGKey(0)
    k_x, k_p = jax.random.split(key)
    x = jax.random.normal(k_x, (B, coeff_nc, seq), dtype=jnp.float32)
    params = init_params(k_p, coeff_nc, descriptor_nc, layer, num_kp, num_bins)

    # pack weights once (outside the per-inference path)
    packed = pack_mapping_params(params, layer=layer, num_bins=num_bins,
                                 num_kp=num_kp, compute_dtype=jnp.bfloat16)

    out = mapping_net_pallas(x, packed)           # auto b_tile=2 -> grid of 2
    out = jax.block_until_ready(out)

    ref = ref_forward(x, params, layer)
    for name in HEAD_ORDER:
        np.testing.assert_allclose(np.asarray(out[name]),
                                   np.asarray(ref[name]),
                                   rtol=2e-2, atol=2e-2)   # bf16 MXU inputs
    print("KERNEL_OK")
</pallas_src>

<mosaic_0001>
module attributes {stable_mosaic.version = 11 : i64} {
  func.func @kernel(%arg0: i32, %arg1: memref<64x128xbf16, #tpu.memory_space<vmem>>, %arg2: memref<7x128x32xbf16, #tpu.memory_space<vmem>>, %arg3: memref<1x32xf32, #tpu.memory_space<vmem>>, %arg4: memref<2x3x32x32xbf16, #tpu.memory_space<vmem>>, %arg5: memref<2x1x32xf32, #tpu.memory_space<vmem>>, %arg6: memref<32x128xbf16, #tpu.memory_space<vmem>>, %arg7: memref<1x128xf32, #tpu.memory_space<vmem>>, %arg8: memref<2x1x128xf32, #tpu.memory_space<vmem>>) attributes {dimension_semantics = [#tpu.dimension_semantics<parallel>], iteration_bounds = array<i64: 2>, scalar_prefetch = 0 : i64, scratch_operands = 0 : i64, tpu.core_type = #tpu.core_type<tc>, window_params = [{transform_indices = @transform_0, window_bounds = array<i64: 64, 128>}, {pipeline_mode = #tpu.pipeline_mode<synchronous>, transform_indices = @transform_1, window_bounds = array<i64: 7, 128, 32>}, {pipeline_mode = #tpu.pipeline_mode<synchronous>, transform_indices = @transform_2, window_bounds = array<i64: 1, 32>}, {pipeline_mode = #tpu.pipeline_mode<synchronous>, transform_indices = @transform_3, window_bounds = array<i64: 2, 3, 32, 32>}, {pipeline_mode = #tpu.pipeline_mode<synchronous>, transform_indices = @transform_4, window_bounds = array<i64: 2, 1, 32>}, {pipeline_mode = #tpu.pipeline_mode<synchronous>, transform_indices = @transform_5, window_bounds = array<i64: 32, 128>}, {pipeline_mode = #tpu.pipeline_mode<synchronous>, transform_indices = @transform_6, window_bounds = array<i64: 1, 128>}, {transform_indices = @transform_7, window_bounds = array<i64: 2, 1, 128>}]} {
    %c0 = arith.constant 0 : index
    %c0_0 = arith.constant 0 : index
    %0 = vector.load %arg1[%c0, %c0_0] : memref<64x128xbf16, #tpu.memory_space<vmem>>, vector<64x128xbf16>
    %1 = vector.extract_strided_slice %0 {offsets = [0, 0], sizes = [58, 128], strides = [1, 1]} : vector<64x128xbf16> to vector<58x128xbf16>
    %c0_1 = arith.constant 0 : index
    %c0_2 = arith.constant 0 : index
    %c0_3 = arith.constant 0 : index
    %2 = vector.load %arg2[%c0_1, %c0_2, %c0_3] : memref<7x128x32xbf16, #tpu.memory_space<vmem>>, vector<1x128x32xbf16>
    %3 = vector.shape_cast %2 : vector<1x128x32xbf16> to vector<128x32xbf16>
    %cst = arith.constant dense<0.000000e+00> : vector<58x32xf32>
    %4 = tpu.matmul %1, %3, %cst {dimension_numbers = #tpu.dot_dimension_numbers<[1], [0], [0], [1], [0, 0, 1, 1], [], []>} : vector<58x128xbf16>, vector<128x32xbf16>, vector<58x32xf32> -> vector<58x32xf32>
    %5 = vector.extract_strided_slice %0 {offsets = [1, 0], sizes = [58, 128], strides = [1, 1]} : vector<64x128xbf16> to vector<58x128xbf16>
    %c1 = arith.constant 1 : index
    %c0_4 = arith.constant 0 : index
    %c0_5 = arith.constant 0 : index
    %6 = vector.load %arg2[%c1, %c0_4, %c0_5] : memref<7x128x32xbf16, #tpu.memory_space<vmem>>, vector<1x128x32xbf16>
    %7 = vector.shape_cast %6 : vector<1x128x32xbf16> to vector<128x32xbf16>
    %cst_6 = arith.constant dense<0.000000e+00> : vector<58x32xf32>
    %8 = tpu.matmul %5, %7, %cst_6 {dimension_numbers = #tpu.dot_dimension_numbers<[1], [0], [0], [1], [0, 0, 1, 1], [], []>} : vector<58x128xbf16>, vector<128x32xbf16>, vector<58x32xf32> -> vector<58x32xf32>
    %9 = arith.addf %4, %8 : vector<58x32xf32>
    %10 = vector.extract_strided_slice %0 {offsets = [2, 0], sizes = [58, 128], strides = [1, 1]} : vector<64x128xbf16> to vector<58x128xbf16>
    %c2 = arith.constant 2 : index
    %c0_7 = arith.constant 0 : index
    %c0_8 = arith.constant 0 : index
    %11 = vector.load %arg2[%c2, %c0_7, %c0_8] : memref<7x128x32xbf16, #tpu.memory_space<vmem>>, vector<1x128x32xbf16>
    %12 = vector.shape_cast %11 : vector<1x128x32xbf16> to vector<128x32xbf16>
    %cst_9 = arith.constant dense<0.000000e+00> : vector<58x32xf32>
    %13 = tpu.matmul %10, %12, %cst_9 {dimension_numbers = #tpu.dot_dimension_numbers<[1], [0], [0], [1], [0, 0, 1, 1], [], []>} : vector<58x128xbf16>, vector<128x32xbf16>, vector<58x32xf32> -> vector<58x32xf32>
    %14 = arith.addf %9, %13 : vector<58x32xf32>
    %15 = vector.extract_strided_slice %0 {offsets = [3, 0], sizes = [58, 128], strides = [1, 1]} : vector<64x128xbf16> to vector<58x128xbf16>
    %c3 = arith.constant 3 : index
    %c0_10 = arith.constant 0 : index
    %c0_11 = arith.constant 0 : index
    %16 = vector.load %arg2[%c3, %c0_10, %c0_11] : memref<7x128x32xbf16, #tpu.memory_space<vmem>>, vector<1x128x32xbf16>
    %17 = vector.shape_cast %16 : vector<1x128x32xbf16> to vector<128x32xbf16>
    %cst_12 = arith.constant dense<0.000000e+00> : vector<58x32xf32>
    %18 = tpu.matmul %15, %17, %cst_12 {dimension_numbers = #tpu.dot_dimension_numbers<[1], [0], [0], [1], [0, 0, 1, 1], [], []>} : vector<58x128xbf16>, vector<128x32xbf16>, vector<58x32xf32> -> vector<58x32xf32>
    %19 = arith.addf %14, %18 : vector<58x32xf32>
    %20 = vector.extract_strided_slice %0 {offsets = [4, 0], sizes = [58, 128], strides = [1, 1]} : vector<64x128xbf16> to vector<58x128xbf16>
    %c4 = arith.constant 4 : index
    %c0_13 = arith.constant 0 : index
    %c0_14 = arith.constant 0 : index
    %21 = vector.load %arg2[%c4, %c0_13, %c0_14] : memref<7x128x32xbf16, #tpu.memory_space<vmem>>, vector<1x128x32xbf16>
    %22 = vector.shape_cast %21 : vector<1x128x32xbf16> to vector<128x32xbf16>
    %cst_15 = arith.constant dense<0.000000e+00> : vector<58x32xf32>
    %23 = tpu.matmul %20, %22, %cst_15 {dimension_numbers = #tpu.dot_dimension_numbers<[1], [0], [0], [1], [0, 0, 1, 1], [], []>} : vector<58x128xbf16>, vector<128x32xbf16>, vector<58x32xf32> -> vector<58x32xf32>
    %24 = arith.addf %19, %23 : vector<58x32xf32>
    %25 = vector.extract_strided_slice %0 {offsets = [5, 0], sizes = [58, 128], strides = [1, 1]} : vector<64x128xbf16> to vector<58x128xbf16>
    %c5 = arith.constant 5 : index
    %c0_16 = arith.constant 0 : index
    %c0_17 = arith.constant 0 : index
    %26 = vector.load %arg2[%c5, %c0_16, %c0_17] : memref<7x128x32xbf16, #tpu.memory_space<vmem>>, vector<1x128x32xbf16>
    %27 = vector.shape_cast %26 : vector<1x128x32xbf16> to vector<128x32xbf16>
    %cst_18 = arith.constant dense<0.000000e+00> : vector<58x32xf32>
    %28 = tpu.matmul %25, %27, %cst_18 {dimension_numbers = #tpu.dot_dimension_numbers<[1], [0], [0], [1], [0, 0, 1, 1], [], []>} : vector<58x128xbf16>, vector<128x32xbf16>, vector<58x32xf32> -> vector<58x32xf32>
    %29 = arith.addf %24, %28 : vector<58x32xf32>
    %30 = vector.extract_strided_slice %0 {offsets = [6, 0], sizes = [58, 128], strides = [1, 1]} : vector<64x128xbf16> to vector<58x128xbf16>
    %c6 = arith.constant 6 : index
    %c0_19 = arith.constant 0 : index
    %c0_20 = arith.constant 0 : index
    %31 = vector.load %arg2[%c6, %c0_19, %c0_20] : memref<7x128x32xbf16, #tpu.memory_space<vmem>>, vector<1x128x32xbf16>
    %32 = vector.shape_cast %31 : vector<1x128x32xbf16> to vector<128x32xbf16>
    %cst_21 = arith.constant dense<0.000000e+00> : vector<58x32xf32>
    %33 = tpu.matmul %30, %32, %cst_21 {dimension_numbers = #tpu.dot_dimension_numbers<[1], [0], [0], [1], [0, 0, 1, 1], [], []>} : vector<58x128xbf16>, vector<128x32xbf16>, vector<58x32xf32> -> vector<58x32xf32>
    %34 = arith.addf %29, %33 : vector<58x32xf32>
    %c0_22 = arith.constant 0 : index
    %c0_23 = arith.constant 0 : index
    %35 = vector.load %arg3[%c0_22, %c0_23] : memref<1x32xf32, #tpu.memory_space<vmem>>, vector<1x32xf32>
    %36 = vector.broadcast %35 : vector<1x32xf32> to vector<58x32xf32>
    %37 = arith.addf %34, %36 : vector<58x32xf32>
    %cst_24 = arith.constant 0.000000e+00 : f32
    %38 = vector.broadcast %cst_24 : f32 to vector<58x32xf32>
    %39 = arith.cmpf oge, %37, %38 : vector<58x32xf32>
    %cst_25 = arith.constant 1.000000e-01 : f32
    %40 = vector.broadcast %cst_25 : f32 to vector<58x32xf32>
    %41 = arith.mulf %40, %37 : vector<58x32xf32>
    %42 = arith.select %39, %37, %41 : vector<58x32xi1>, vector<58x32xf32>
    %43 = arith.truncf %42 : vector<58x32xf32> to vector<58x32xbf16>
    %44 = vector.extract_strided_slice %37 {offsets = [3, 0], sizes = [52, 32], strides = [1, 1]} : vector<58x32xf32> to vector<52x32xf32>
    %c0_26 = arith.constant 0 : index
    %c0_27 = arith.constant 0 : index
    %c0_28 = arith.constant 0 : index
    %45 = vector.load %arg5[%c0_26, %c0_27, %c0_28] : memref<2x1x32xf32, #tpu.memory_space<vmem>>, vector<1x1x32xf32>
    %46 = vector.shape_cast %45 : vector<1x1x32xf32> to vector<1x32xf32>
    %47 = vector.broadcast %46 : vector<1x32xf32> to vector<52x32xf32>
    %48 = arith.addf %44, %47 : vector<52x32xf32>
    %49 = vector.extract_strided_slice %43 {offsets = [0, 0], sizes = [52, 32], strides = [1, 1]} : vector<58x32xbf16> to vector<52x32xbf16>
    %c0_29 = arith.constant 0 : index
    %c0_30 = arith.constant 0 : index
    %c0_31 = arith.constant 0 : index
    %c0_32 = arith.constant 0 : index
    %50 = vector.load %arg4[%c0_29, %c0_30, %c0_31, %c0_32] : memref<2x3x32x32xbf16, #tpu.memory_space<vmem>>, vector<1x1x32x32xbf16>
    %51 = vector.shape_cast %50 : vector<1x1x32x32xbf16> to vector<32x32xbf16>
    %cst_33 = arith.constant dense<0.000000e+00> : vector<52x32xf32>
    %52 = tpu.matmul %49, %51, %cst_33 {dimension_numbers = #tpu.dot_dimension_numbers<[1], [0], [0], [1], [0, 0, 1, 1], [], []>} : vector<52x32xbf16>, vector<32x32xbf16>, vector<52x32xf32> -> vector<52x32xf32>
    %53 = arith.addf %48, %52 : vector<52x32xf32>
    %54 = vector.extract_strided_slice %43 {offsets = [3, 0], sizes = [52, 32], strides = [1, 1]} : vector<58x32xbf16> to vector<52x32xbf16>
    %c0_34 = arith.constant 0 : index
    %c1_35 = arith.constant 1 : index
    %c0_36 = arith.constant 0 : index
    %c0_37 = arith.constant 0 : index
    %55 = vector.load %arg4[%c0_34, %c1_35, %c0_36, %c0_37] : memref<2x3x32x32xbf16, #tpu.memory_space<vmem>>, vector<1x1x32x32xbf16>
    %56 = vector.shape_cast %55 : vector<1x1x32x32xbf16> to vector<32x32xbf16>
    %cst_38 = arith.constant dense<0.000000e+00> : vector<52x32xf32>
    %57 = tpu.matmul %54, %56, %cst_38 {dimension_numbers = #tpu.dot_dimension_numbers<[1], [0], [0], [1], [0, 0, 1, 1], [], []>} : vector<52x32xbf16>, vector<32x32xbf16>, vector<52x32xf32> -> vector<52x32xf32>
    %58 = arith.addf %53, %57 : vector<52x32xf32>
    %59 = vector.extract_strided_slice %43 {offsets = [6, 0], sizes = [52, 32], strides = [1, 1]} : vector<58x32xbf16> to vector<52x32xbf16>
    %c0_39 = arith.constant 0 : index
    %c2_40 = arith.constant 2 : index
    %c0_41 = arith.constant 0 : index
    %c0_42 = arith.constant 0 : index
    %60 = vector.load %arg4[%c0_39, %c2_40, %c0_41, %c0_42] : memref<2x3x32x32xbf16, #tpu.memory_space<vmem>>, vector<1x1x32x32xbf16>
    %61 = vector.shape_cast %60 : vector<1x1x32x32xbf16> to vector<32x32xbf16>
    %cst_43 = arith.constant dense<0.000000e+00> : vector<52x32xf32>
    %62 = tpu.matmul %59, %61, %cst_43 {dimension_numbers = #tpu.dot_dimension_numbers<[1], [0], [0], [1], [0, 0, 1, 1], [], []>} : vector<52x32xbf16>, vector<32x32xbf16>, vector<52x32xf32> -> vector<52x32xf32>
    %63 = arith.addf %58, %62 : vector<52x32xf32>
    %cst_44 = arith.constant 0.000000e+00 : f32
    %64 = vector.broadcast %cst_44 : f32 to vector<52x32xf32>
    %65 = arith.cmpf oge, %63, %64 : vector<52x32xf32>
    %cst_45 = arith.constant 1.000000e-01 : f32
    %66 = vector.broadcast %cst_45 : f32 to vector<52x32xf32>
    %67 = arith.mulf %66, %63 : vector<52x32xf32>
    %68 = arith.select %65, %63, %67 : vector<52x32xi1>, vector<52x32xf32>
    %69 = arith.truncf %68 : vector<52x32xf32> to vector<52x32xbf16>
    %70 = vector.extract_strided_slice %63 {offsets = [3, 0], sizes = [46, 32], strides = [1, 1]} : vector<52x32xf32> to vector<46x32xf32>
    %c1_46 = arith.constant 1 : index
    %c0_47 = arith.constant 0 : index
    %c0_48 = arith.constant 0 : index
    %71 = vector.load %arg5[%c1_46, %c0_47, %c0_48] : memref<2x1x32xf32, #tpu.memory_space<vmem>>, vector<1x1x32xf32>
    %72 = vector.shape_cast %71 : vector<1x1x32xf32> to vector<1x32xf32>
    %73 = vector.broadcast %72 : vector<1x32xf32> to vector<46x32xf32>
    %74 = arith.addf %70, %73 : vector<46x32xf32>
    %75 = vector.extract_strided_slice %69 {offsets = [0, 0], sizes = [46, 32], strides = [1, 1]} : vector<52x32xbf16> to vector<46x32xbf16>
    %c1_49 = arith.constant 1 : index
    %c0_50 = arith.constant 0 : index
    %c0_51 = arith.constant 0 : index
    %c0_52 = arith.constant 0 : index
    %76 = vector.load %arg4[%c1_49, %c0_50, %c0_51, %c0_52] : memref<2x3x32x32xbf16, #tpu.memory_space<vmem>>, vector<1x1x32x32xbf16>
    %77 = vector.shape_cast %76 : vector<1x1x32x32xbf16> to vector<32x32xbf16>
    %cst_53 = arith.constant dense<0.000000e+00> : vector<46x32xf32>
    %78 = tpu.matmul %75, %77, %cst_53 {dimension_numbers = #tpu.dot_dimension_numbers<[1], [0], [0], [1], [0, 0, 1, 1], [], []>} : vector<46x32xbf16>, vector<32x32xbf16>, vector<46x32xf32> -> vector<46x32xf32>
    %79 = arith.addf %74, %78 : vector<46x32xf32>
    %80 = vector.extract_strided_slice %69 {offsets = [3, 0], sizes = [46, 32], strides = [1, 1]} : vector<52x32xbf16> to vector<46x32xbf16>
    %c1_54 = arith.constant 1 : index
    %c1_55 = arith.constant 1 : index
    %c0_56 = arith.constant 0 : index
    %c0_57 = arith.constant 0 : index
    %81 = vector.load %arg4[%c1_54, %c1_55, %c0_56, %c0_57] : memref<2x3x32x32xbf16, #tpu.memory_space<vmem>>, vector<1x1x32x32xbf16>
    %82 = vector.shape_cast %81 : vector<1x1x32x32xbf16> to vector<32x32xbf16>
    %cst_58 = arith.constant dense<0.000000e+00> : vector<46x32xf32>
    %83 = tpu.matmul %80, %82, %cst_58 {dimension_numbers = #tpu.dot_dimension_numbers<[1], [0], [0], [1], [0, 0, 1, 1], [], []>} : vector<46x32xbf16>, vector<32x32xbf16>, vector<46x32xf32> -> vector<46x32xf32>
    %84 = arith.addf %79, %83 : vector<46x32xf32>
    %85 = vector.extract_strided_slice %69 {offsets = [6, 0], sizes = [46, 32], strides = [1, 1]} : vector<52x32xbf16> to vector<46x32xbf16>
    %c1_59 = arith.constant 1 : index
    %c2_60 = arith.constant 2 : index
    %c0_61 = arith.constant 0 : index
    %c0_62 = arith.constant 0 : index
    %86 = vector.load %arg4[%c1_59, %c2_60, %c0_61, %c0_62] : memref<2x3x32x32xbf16, #tpu.memory_space<vmem>>, vector<1x1x32x32xbf16>
    %87 = vector.shape_cast %86 : vector<1x1x32x32xbf16> to vector<32x32xbf16>
    %cst_63 = arith.constant dense<0.000000e+00> : vector<46x32xf32>
    %88 = tpu.matmul %85, %87, %cst_63 {dimension_numbers = #tpu.dot_dimension_numbers<[1], [0], [0], [1], [0, 0, 1, 1], [], []>} : vector<46x32xbf16>, vector<32x32xbf16>, vector<46x32xf32> -> vector<46x32xf32>
    %89 = arith.addf %84, %88 : vector<46x32xf32>
    %90 = tpu.iota {dimensions = array<i32: 1>} : vector<2x46xi32>
    %91 = tpu.iota {dimensions = array<i32: 0>} : vector<2x46xi32>
    %c32_i32 = arith.constant 32 : i32
    %92 = vector.broadcast %c32_i32 : i32 to vector<2x46xi32>
    %93 = arith.muli %91, %92 : vector<2x46xi32>
    %94 = arith.cmpi sge, %90, %93 : vector<2x46xi32>
    %c9_i32 = arith.constant 9 : i32
    %95 = vector.broadcast %c9_i32 : i32 to vector<2x46xi32>
    %96 = arith.addi %93, %95 : vector<2x46xi32>
    %97 = arith.cmpi slt, %90, %96 : vector<2x46xi32>
    %98 = arith.andi %94, %97 : vector<2x46xi1>
    %99 = arith.extui %98 : vector<2x46xi1> to vector<2x46xi32>
    %100 = arith.sitofp %99 : vector<2x46xi32> to vector<2x46xf32>
    %cst_64 = arith.constant 0.111111112 : f32
    %101 = vector.broadcast %cst_64 : f32 to vector<2x46xf32>
    %102 = arith.mulf %100, %101 : vector<2x46xf32>
    %cst_65 = arith.constant dense<0.000000e+00> : vector<2x32xf32>
    %103 = tpu.matmul %102, %89, %cst_65 {dimension_numbers = #tpu.dot_dimension_numbers<[1], [0], [0], [1], [0, 0, 1, 1], [], []>} : vector<2x46xf32>, vector<46x32xf32>, vector<2x32xf32> -> vector<2x32xf32>
    %104 = arith.truncf %103 : vector<2x32xf32> to vector<2x32xbf16>
    %c0_66 = arith.constant 0 : index
    %c0_67 = arith.constant 0 : index
    %105 = vector.load %arg6[%c0_66, %c0_67] : memref<32x128xbf16, #tpu.memory_space<vmem>>, vector<32x128xbf16>
    %cst_68 = arith.constant dense<0.000000e+00> : vector<2x128xf32>
    %106 = tpu.matmul %104, %105, %cst_68 {dimension_numbers = #tpu.dot_dimension_numbers<[1], [0], [0], [1], [0, 0, 1, 1], [], []>} : vector<2x32xbf16>, vector<32x128xbf16>, vector<2x128xf32> -> vector<2x128xf32>
    %c0_69 = arith.constant 0 : index
    %c0_70 = arith.constant 0 : index
    %107 = vector.load %arg7[%c0_69, %c0_70] : memref<1x128xf32, #tpu.memory_space<vmem>>, vector<1x128xf32>
    %108 = vector.broadcast %107 : vector<1x128xf32> to vector<2x128xf32>
    %109 = arith.addf %106, %108 : vector<2x128xf32>
    %110 = vector.shape_cast %109 : vector<2x128xf32> to vector<2x1x128xf32>
    %c0_71 = arith.constant 0 : index
    %c0_72 = arith.constant 0 : index
    %c0_73 = arith.constant 0 : index
    %111 = vector.load %arg8[%c0_71, %c0_72, %c0_73] : memref<2x1x128xf32, #tpu.memory_space<vmem>>, vector<2x1x128xf32>
    tpu.vector_store %arg8[%c0_71, %c0_72, %c0_73], %110 {strides = array<i32>} : memref<2x1x128xf32, #tpu.memory_space<vmem>>, vector<2x1x128xf32>,
    return
  }
  func.func @transform_0(%arg0: i32) -> (i32, i32) {
    %c0_i32 = arith.constant 0 : i32
    %c0_i32_0 = arith.constant 0 : i32
    return %arg0, %c0_i32 : i32, i32
  }
  func.func @transform_1(%arg0: i32) -> (i32, i32, i32) {
    %c0_i32 = arith.constant 0 : i32
    %c0_i32_0 = arith.constant 0 : i32
    %c0_i32_1 = arith.constant 0 : i32
    %c0_i32_2 = arith.constant 0 : i32
    return %c0_i32, %c0_i32_0, %c0_i32_1 : i32, i32, i32
  }
  func.func @transform_2(%arg0: i32) -> (i32, i32) {
    %c0_i32 = arith.constant 0 : i32
    %c0_i32_0 = arith.constant 0 : i32
    %c0_i32_1 = arith.constant 0 : i32
    return %c0_i32, %c0_i32_0 : i32, i32
  }
  func.func @transform_3(%arg0: i32) -> (i32, i32, i32, i32) {
    %c0_i32 = arith.constant 0 : i32
    %c0_i32_0 = arith.constant 0 : i32
    %c0_i32_1 = arith.constant 0 : i32
    %c0_i32_2 = arith.constant 0 : i32
    %c0_i32_3 = arith.constant 0 : i32
    return %c0_i32, %c0_i32_0, %c0_i32_1, %c0_i32_2 : i32, i32, i32, i32
  }
  func.func @transform_4(%arg0: i32) -> (i32, i32, i32) {
    %c0_i32 = arith.constant 0 : i32
    %c0_i32_0 = arith.constant 0 : i32
    %c0_i32_1 = arith.constant 0 : i32
    %c0_i32_2 = arith.constant 0 : i32
    return %c0_i32, %c0_i32_0, %c0_i32_1 : i32, i32, i32
  }
  func.func @transform_5(%arg0: i32) -> (i32, i32) {
    %c0_i32 = arith.constant 0 : i32
    %c0_i32_0 = arith.constant 0 : i32
    %c0_i32_1 = arith.constant 0 : i32
    return %c0_i32, %c0_i32_0 : i32, i32
  }
  func.func @transform_6(%arg0: i32) -> (i32, i32) {
    %c0_i32 = arith.constant 0 : i32
    %c0_i32_0 = arith.constant 0 : i32
    %c0_i32_1 = arith.constant 0 : i32
    return %c0_i32, %c0_i32_0 : i32, i32
  }
  func.func @transform_7(%arg0: i32) -> (i32, i32, i32) {
    %c0_i32 = arith.constant 0 : i32
    %c0_i32_0 = arith.constant 0 : i32
    %c0_i32_1 = arith.constant 0 : i32
    return %arg0, %c0_i32, %c0_i32_0 : i32, i32, i32
  }
}

module attributes {stable_mosaic.version = 11 : i64} {
  func.func @kernel(%arg0: i32, %arg1: memref<64x128xbf16, #tpu.memory_space<vmem>>, %arg2: memref<7x128x32xbf16, #tpu.memory_space<vmem>>, %arg3: memref<1x32xf32, #tpu.memory_space<vmem>>, %arg4: memref<2x3x32x32xbf16, #tpu.memory_space<vmem>>, %arg5: memref<2x1x32xf32, #tpu.memory_space<vmem>>, %arg6: memref<32x128xbf16, #tpu.memory_space<vmem>>, %arg7: memref<1x128xf32, #tpu.memory_space<vmem>>, %arg8: memref<2x1x128xf32, #tpu.memory_space<vmem>>) attributes {dimension_semantics = [#tpu.dimension_semantics<parallel>], iteration_bounds = array<i64: 2>, scalar_prefetch = 0 : i64, scratch_operands = 0 : i64, tpu.core_type = #tpu.core_type<tc>, window_params = [{transform_indices = @transform_0, window_bounds = array<i64: 64, 128>}, {pipeline_mode = #tpu.pipeline_mode<synchronous>, transform_indices = @transform_1, window_bounds = array<i64: 7, 128, 32>}, {pipeline_mode = #tpu.pipeline_mode<synchronous>, transform_indices = @transform_2, window_bounds = array<i64: 1, 32>}, {pipeline_mode = #tpu.pipeline_mode<synchronous>, transform_indices = @transform_3, window_bounds = array<i64: 2, 3, 32, 32>}, {pipeline_mode = #tpu.pipeline_mode<synchronous>, transform_indices = @transform_4, window_bounds = array<i64: 2, 1, 32>}, {pipeline_mode = #tpu.pipeline_mode<synchronous>, transform_indices = @transform_5, window_bounds = array<i64: 32, 128>}, {pipeline_mode = #tpu.pipeline_mode<synchronous>, transform_indices = @transform_6, window_bounds = array<i64: 1, 128>}, {transform_indices = @transform_7, window_bounds = array<i64: 2, 1, 128>}]} {
    %c0 = arith.constant 0 : index
    %c0_0 = arith.constant 0 : index
    %0 = vector.load %arg1[%c0, %c0_0] : memref<64x128xbf16, #tpu.memory_space<vmem>>, vector<64x128xbf16>
    %1 = vector.extract_strided_slice %0 {offsets = [0, 0], sizes = [58, 128], strides = [1, 1]} : vector<64x128xbf16> to vector<58x128xbf16>
    %c0_1 = arith.constant 0 : index
    %c0_2 = arith.constant 0 : index
    %c0_3 = arith.constant 0 : index
    %2 = vector.load %arg2[%c0_1, %c0_2, %c0_3] : memref<7x128x32xbf16, #tpu.memory_space<vmem>>, vector<1x128x32xbf16>
    %3 = vector.shape_cast %2 : vector<1x128x32xbf16> to vector<128x32xbf16>
    %cst = arith.constant dense<0.000000e+00> : vector<58x32xf32>
    %4 = tpu.matmul %1, %3, %cst {dimension_numbers = #tpu.dot_dimension_numbers<[1], [0], [0], [1], [0, 0, 1, 1], [], []>} : vector<58x128xbf16>, vector<128x32xbf16>, vector<58x32xf32> -> vector<58x32xf32>
    %5 = vector.extract_strided_slice %0 {offsets = [1, 0], sizes = [58, 128], strides = [1, 1]} : vector<64x128xbf16> to vector<58x128xbf16>
    %c1 = arith.constant 1 : index
    %c0_4 = arith.constant 0 : index
    %c0_5 = arith.constant 0 : index
    %6 = vector.load %arg2[%c1, %c0_4, %c0_5] : memref<7x128x32xbf16, #tpu.memory_space<vmem>>, vector<1x128x32xbf16>
    %7 = vector.shape_cast %6 : vector<1x128x32xbf16> to vector<128x32xbf16>
    %cst_6 = arith.constant dense<0.000000e+00> : vector<58x32xf32>
    %8 = tpu.matmul %5, %7, %cst_6 {dimension_numbers = #tpu.dot_dimension_numbers<[1], [0], [0], [1], [0, 0, 1, 1], [], []>} : vector<58x128xbf16>, vector<128x32xbf16>, vector<58x32xf32> -> vector<58x32xf32>
    %9 = arith.addf %4, %8 : vector<58x32xf32>
    %10 = vector.extract_strided_slice %0 {offsets = [2, 0], sizes = [58, 128], strides = [1, 1]} : vector<64x128xbf16> to vector<58x128xbf16>
    %c2 = arith.constant 2 : index
    %c0_7 = arith.constant 0 : index
    %c0_8 = arith.constant 0 : index
    %11 = vector.load %arg2[%c2, %c0_7, %c0_8] : memref<7x128x32xbf16, #tpu.memory_space<vmem>>, vector<1x128x32xbf16>
    %12 = vector.shape_cast %11 : vector<1x128x32xbf16> to vector<128x32xbf16>
    %cst_9 = arith.constant dense<0.000000e+00> : vector<58x32xf32>
    %13 = tpu.matmul %10, %12, %cst_9 {dimension_numbers = #tpu.dot_dimension_numbers<[1], [0], [0], [1], [0, 0, 1, 1], [], []>} : vector<58x128xbf16>, vector<128x32xbf16>, vector<58x32xf32> -> vector<58x32xf32>
    %14 = arith.addf %9, %13 : vector<58x32xf32>
    %15 = vector.extract_strided_slice %0 {offsets = [3, 0], sizes = [58, 128], strides = [1, 1]} : vector<64x128xbf16> to vector<58x128xbf16>
    %c3 = arith.constant 3 : index
    %c0_10 = arith.constant 0 : index
    %c0_11 = arith.constant 0 : index
    %16 = vector.load %arg2[%c3, %c0_10, %c0_11] : memref<7x128x32xbf16, #tpu.memory_space<vmem>>, vector<1x128x32xbf16>
    %17 = vector.shape_cast %16 : vector<1x128x32xbf16> to vector<128x32xbf16>
    %cst_12 = arith.constant dense<0.000000e+00> : vector<58x32xf32>
    %18 = tpu.matmul %15, %17, %cst_12 {dimension_numbers = #tpu.dot_dimension_numbers<[1], [0], [0], [1], [0, 0, 1, 1], [], []>} : vector<58x128xbf16>, vector<128x32xbf16>, vector<58x32xf32> -> vector<58x32xf32>
    %19 = arith.addf %14, %18 : vector<58x32xf32>
    %20 = vector.extract_strided_slice %0 {offsets = [4, 0], sizes = [58, 128], strides = [1, 1]} : vector<64x128xbf16> to vector<58x128xbf16>
    %c4 = arith.constant 4 : index
    %c0_13 = arith.constant 0 : index
    %c0_14 = arith.constant 0 : index
    %21 = vector.load %arg2[%c4, %c0_13, %c0_14] : memref<7x128x32xbf16, #tpu.memory_space<vmem>>, vector<1x128x32xbf16>
    %22 = vector.shape_cast %21 : vector<1x128x32xbf16> to vector<128x32xbf16>
    %cst_15 = arith.constant dense<0.000000e+00> : vector<58x32xf32>
    %23 = tpu.matmul %20, %22, %cst_15 {dimension_numbers = #tpu.dot_dimension_numbers<[1], [0], [0], [1], [0, 0, 1, 1], [], []>} : vector<58x128xbf16>, vector<128x32xbf16>, vector<58x32xf32> -> vector<58x32xf32>
    %24 = arith.addf %19, %23 : vector<58x32xf32>
    %25 = vector.extract_strided_slice %0 {offsets = [5, 0], sizes = [58, 128], strides = [1, 1]} : vector<64x128xbf16> to vector<58x128xbf16>
    %c5 = arith.constant 5 : index
    %c0_16 = arith.constant 0 : index
    %c0_17 = arith.constant 0 : index
    %26 = vector.load %arg2[%c5, %c0_16, %c0_17] : memref<7x128x32xbf16, #tpu.memory_space<vmem>>, vector<1x128x32xbf16>
    %27 = vector.shape_cast %26 : vector<1x128x32xbf16> to vector<128x32xbf16>
    %cst_18 = arith.constant dense<0.000000e+00> : vector<58x32xf32>
    %28 = tpu.matmul %25, %27, %cst_18 {dimension_numbers = #tpu.dot_dimension_numbers<[1], [0], [0], [1], [0, 0, 1, 1], [], []>} : vector<58x128xbf16>, vector<128x32xbf16>, vector<58x32xf32> -> vector<58x32xf32>
    %29 = arith.addf %24, %28 : vector<58x32xf32>
    %30 = vector.extract_strided_slice %0 {offsets = [6, 0], sizes = [58, 128], strides = [1, 1]} : vector<64x128xbf16> to vector<58x128xbf16>
    %c6 = arith.constant 6 : index
    %c0_19 = arith.constant 0 : index
    %c0_20 = arith.constant 0 : index
    %31 = vector.load %arg2[%c6, %c0_19, %c0_20] : memref<7x128x32xbf16, #tpu.memory_space<vmem>>, vector<1x128x32xbf16>
    %32 = vector.shape_cast %31 : vector<1x128x32xbf16> to vector<128x32xbf16>
    %cst_21 = arith.constant dense<0.000000e+00> : vector<58x32xf32>
    %33 = tpu.matmul %30, %32, %cst_21 {dimension_numbers = #tpu.dot_dimension_numbers<[1], [0], [0], [1], [0, 0, 1, 1], [], []>} : vector<58x128xbf16>, vector<128x32xbf16>, vector<58x32xf32> -> vector<58x32xf32>
    %34 = arith.addf %29, %33 : vector<58x32xf32>
    %c0_22 = arith.constant 0 : index
    %c0_23 = arith.constant 0 : index
    %35 = vector.load %arg3[%c0_22, %c0_23] : memref<1x32xf32, #tpu.memory_space<vmem>>, vector<1x32xf32>
    %36 = vector.broadcast %35 : vector<1x32xf32> to vector<58x32xf32>
    %37 = arith.addf %34, %36 : vector<58x32xf32>
    %cst_24 = arith.constant 0.000000e+00 : f32
    %38 = vector.broadcast %cst_24 : f32 to vector<58x32xf32>
    %39 = arith.cmpf oge, %37, %38 : vector<58x32xf32>
    %cst_25 = arith.constant 1.000000e-01 : f32
    %40 = vector.broadcast %cst_25 : f32 to vector<58x32xf32>
    %41 = arith.mulf %40, %37 : vector<58x32xf32>
    %42 = arith.select %39, %37, %41 : vector<58x32xi1>, vector<58x32xf32>
    %43 = arith.truncf %42 : vector<58x32xf32> to vector<58x32xbf16>
    %44 = vector.extract_strided_slice %37 {offsets = [3, 0], sizes = [52, 32], strides = [1, 1]} : vector<58x32xf32> to vector<52x32xf32>
    %c0_26 = arith.constant 0 : index
    %c0_27 = arith.constant 0 : index
    %c0_28 = arith.constant 0 : index
    %45 = vector.load %arg5[%c0_26, %c0_27, %c0_28] : memref<2x1x32xf32, #tpu.memory_space<vmem>>, vector<1x1x32xf32>
    %46 = vector.shape_cast %45 : vector<1x1x32xf32> to vector<1x32xf32>
    %47 = vector.broadcast %46 : vector<1x32xf32> to vector<52x32xf32>
    %48 = arith.addf %44, %47 : vector<52x32xf32>
    %49 = vector.extract_strided_slice %43 {offsets = [0, 0], sizes = [52, 32], strides = [1, 1]} : vector<58x32xbf16> to vector<52x32xbf16>
    %c0_29 = arith.constant 0 : index
    %c0_30 = arith.constant 0 : index
    %c0_31 = arith.constant 0 : index
    %c0_32 = arith.constant 0 : index
    %50 = vector.load %arg4[%c0_29, %c0_30, %c0_31, %c0_32] : memref<2x3x32x32xbf16, #tpu.memory_space<vmem>>, vector<1x1x32x32xbf16>
    %51 = vector.shape_cast %50 : vector<1x1x32x32xbf16> to vector<32x32xbf16>
    %cst_33 = arith.constant dense<0.000000e+00> : vector<52x32xf32>
    %52 = tpu.matmul %49, %51, %cst_33 {dimension_numbers = #tpu.dot_dimension_numbers<[1], [0], [0], [1], [0, 0, 1, 1], [], []>} : vector<52x32xbf16>, vector<32x32xbf16>, vector<52x32xf32> -> vector<52x32xf32>
    %53 = arith.addf %48, %52 : vector<52x32xf32>
    %54 = vector.extract_strided_slice %43 {offsets = [3, 0], sizes = [52, 32], strides = [1, 1]} : vector<58x32xbf16> to vector<52x32xbf16>
    %c0_34 = arith.constant 0 : index
    %c1_35 = arith.constant 1 : index
    %c0_36 = arith.constant 0 : index
    %c0_37 = arith.constant 0 : index
    %55 = vector.load %arg4[%c0_34, %c1_35, %c0_36, %c0_37] : memref<2x3x32x32xbf16, #tpu.memory_space<vmem>>, vector<1x1x32x32xbf16>
    %56 = vector.shape_cast %55 : vector<1x1x32x32xbf16> to vector<32x32xbf16>
    %cst_38 = arith.constant dense<0.000000e+00> : vector<52x32xf32>
    %57 = tpu.matmul %54, %56, %cst_38 {dimension_numbers = #tpu.dot_dimension_numbers<[1], [0], [0], [1], [0, 0, 1, 1], [], []>} : vector<52x32xbf16>, vector<32x32xbf16>, vector<52x32xf32> -> vector<52x32xf32>
    %58 = arith.addf %53, %57 : vector<52x32xf32>
    %59 = vector.extract_strided_slice %43 {offsets = [6, 0], sizes = [52, 32], strides = [1, 1]} : vector<58x32xbf16> to vector<52x32xbf16>
    %c0_39 = arith.constant 0 : index
    %c2_40 = arith.constant 2 : index
    %c0_41 = arith.constant 0 : index
    %c0_42 = arith.constant 0 : index
    %60 = vector.load %arg4[%c0_39, %c2_40, %c0_41, %c0_42] : memref<2x3x32x32xbf16, #tpu.memory_space<vmem>>, vector<1x1x32x32xbf16>
    %61 = vector.shape_cast %60 : vector<1x1x32x32xbf16> to vector<32x32xbf16>
    %cst_43 = arith.constant dense<0.000000e+00> : vector<52x32xf32>
    %62 = tpu.matmul %59, %61, %cst_43 {dimension_numbers = #tpu.dot_dimension_numbers<[1], [0], [0], [1], [0, 0, 1, 1], [], []>} : vector<52x32xbf16>, vector<32x32xbf16>, vector<52x32xf32> -> vector<52x32xf32>
    %63 = arith.addf %58, %62 : vector<52x32xf32>
    %cst_44 = arith.constant 0.000000e+00 : f32
    %64 = vector.broadcast %cst_44 : f32 to vector<52x32xf32>
    %65 = arith.cmpf oge, %63, %64 : vector<52x32xf32>
    %cst_45 = arith.constant 1.000000e-01 : f32
    %66 = vector.broadcast %cst_45 : f32 to vector<52x32xf32>
    %67 = arith.mulf %66, %63 : vector<52x32xf32>
    %68 = arith.select %65, %63, %67 : vector<52x32xi1>, vector<52x32xf32>
    %69 = arith.truncf %68 : vector<52x32xf32> to vector<52x32xbf16>
    %70 = vector.extract_strided_slice %63 {offsets = [3, 0], sizes = [46, 32], strides = [1, 1]} : vector<52x32xf32> to vector<46x32xf32>
    %c1_46 = arith.constant 1 : index
    %c0_47 = arith.constant 0 : index
    %c0_48 = arith.constant 0 : index
    %71 = vector.load %arg5[%c1_46, %c0_47, %c0_48] : memref<2x1x32xf32, #tpu.memory_space<vmem>>, vector<1x1x32xf32>
    %72 = vector.shape_cast %71 : vector<1x1x32xf32> to vector<1x32xf32>
    %73 = vector.broadcast %72 : vector<1x32xf32> to vector<46x32xf32>
    %74 = arith.addf %70, %73 : vector<46x32xf32>
    %75 = vector.extract_strided_slice %69 {offsets = [0, 0], sizes = [46, 32], strides = [1, 1]} : vector<52x32xbf16> to vector<46x32xbf16>
    %c1_49 = arith.constant 1 : index
    %c0_50 = arith.constant 0 : index
    %c0_51 = arith.constant 0 : index
    %c0_52 = arith.constant 0 : index
    %76 = vector.load %arg4[%c1_49, %c0_50, %c0_51, %c0_52] : memref<2x3x32x32xbf16, #tpu.memory_space<vmem>>, vector<1x1x32x32xbf16>
    %77 = vector.shape_cast %76 : vector<1x1x32x32xbf16> to vector<32x32xbf16>
    %cst_53 = arith.constant dense<0.000000e+00> : vector<46x32xf32>
    %78 = tpu.matmul %75, %77, %cst_53 {dimension_numbers = #tpu.dot_dimension_numbers<[1], [0], [0], [1], [0, 0, 1, 1], [], []>} : vector<46x32xbf16>, vector<32x32xbf16>, vector<46x32xf32> -> vector<46x32xf32>
    %79 = arith.addf %74, %78 : vector<46x32xf32>
    %80 = vector.extract_strided_slice %69 {offsets = [3, 0], sizes = [46, 32], strides = [1, 1]} : vector<52x32xbf16> to vector<46x32xbf16>
    %c1_54 = arith.constant 1 : index
    %c1_55 = arith.constant 1 : index
    %c0_56 = arith.constant 0 : index
    %c0_57 = arith.constant 0 : index
    %81 = vector.load %arg4[%c1_54, %c1_55, %c0_56, %c0_57] : memref<2x3x32x32xbf16, #tpu.memory_space<vmem>>, vector<1x1x32x32xbf16>
    %82 = vector.shape_cast %81 : vector<1x1x32x32xbf16> to vector<32x32xbf16>
    %cst_58 = arith.constant dense<0.000000e+00> : vector<46x32xf32>
    %83 = tpu.matmul %80, %82, %cst_58 {dimension_numbers = #tpu.dot_dimension_numbers<[1], [0], [0], [1], [0, 0, 1, 1], [], []>} : vector<46x32xbf16>, vector<32x32xbf16>, vector<46x32xf32> -> vector<46x32xf32>
    %84 = arith.addf %79, %83 : vector<46x32xf32>
    %85 = vector.extract_strided_slice %69 {offsets = [6, 0], sizes = [46, 32], strides = [1, 1]} : vector<52x32xbf16> to vector<46x32xbf16>
    %c1_59 = arith.constant 1 : index
    %c2_60 = arith.constant 2 : index
    %c0_61 = arith.constant 0 : index
    %c0_62 = arith.constant 0 : index
    %86 = vector.load %arg4[%c1_59, %c2_60, %c0_61, %c0_62] : memref<2x3x32x32xbf16, #tpu.memory_space<vmem>>, vector<1x1x32x32xbf16>
    %87 = vector.shape_cast %86 : vector<1x1x32x32xbf16> to vector<32x32xbf16>
    %cst_63 = arith.constant dense<0.000000e+00> : vector<46x32xf32>
    %88 = tpu.matmul %85, %87, %cst_63 {dimension_numbers = #tpu.dot_dimension_numbers<[1], [0], [0], [1], [0, 0, 1, 1], [], []>} : vector<46x32xbf16>, vector<32x32xbf16>, vector<46x32xf32> -> vector<46x32xf32>
    %89 = arith.addf %84, %88 : vector<46x32xf32>
    %90 = tpu.iota {dimensions = array<i32: 1>} : vector<2x46xi32>
    %91 = tpu.iota {dimensions = array<i32: 0>} : vector<2x46xi32>
    %c32_i32 = arith.constant 32 : i32
    %92 = vector.broadcast %c32_i32 : i32 to vector<2x46xi32>
    %93 = arith.muli %91, %92 : vector<2x46xi32>
    %94 = arith.cmpi sge, %90, %93 : vector<2x46xi32>
    %c9_i32 = arith.constant 9 : i32
    %95 = vector.broadcast %c9_i32 : i32 to vector<2x46xi32>
    %96 = arith.addi %93, %95 : vector<2x46xi32>
    %97 = arith.cmpi slt, %90, %96 : vector<2x46xi32>
    %98 = arith.andi %94, %97 : vector<2x46xi1>
    %99 = arith.extui %98 : vector<2x46xi1> to vector<2x46xi32>
    %100 = arith.sitofp %99 : vector<2x46xi32> to vector<2x46xf32>
    %cst_64 = arith.constant 0.111111112 : f32
    %101 = vector.broadcast %cst_64 : f32 to vector<2x46xf32>
    %102 = arith.mulf %100, %101 : vector<2x46xf32>
    %cst_65 = arith.constant dense<0.000000e+00> : vector<2x32xf32>
    %103 = tpu.matmul %102, %89, %cst_65 {dimension_numbers = #tpu.dot_dimension_numbers<[1], [0], [0], [1], [0, 0, 1, 1], [], []>} : vector<2x46xf32>, vector<46x32xf32>, vector<2x32xf32> -> vector<2x32xf32>
    %104 = arith.truncf %103 : vector<2x32xf32> to vector<2x32xbf16>
    %c0_66 = arith.constant 0 : index
    %c0_67 = arith.constant 0 : index
    %105 = vector.load %arg6[%c0_66, %c0_67] : memref<32x128xbf16, #tpu.memory_space<vmem>>, vector<32x128xbf16>
    %cst_68 = arith.constant dense<0.000000e+00> : vector<2x128xf32>
    %106 = tpu.matmul %104, %105, %cst_68 {dimension_numbers = #tpu.dot_dimension_numbers<[1], [0], [0], [1], [0, 0, 1, 1], [], []>} : vector<2x32xbf16>, vector<32x128xbf16>, vector<2x128xf32> -> vector<2x128xf32>
    %c0_69 = arith.constant 0 : index
    %c0_70 = arith.constant 0 : index
    %107 = vector.load %arg7[%c0_69, %c0_70] : memref<1x128xf32, #tpu.memory_space<vmem>>, vector<1x128xf32>
    %108 = vector.broadcast %107 : vector<1x128xf32> to vector<2x128xf32>
    %109 = arith.addf %106, %108 : vector<2x128xf32>
    %110 = vector.shape_cast %109 : vector<2x128xf32> to vector<2x1x128xf32>
    %c0_71 = arith.constant 0 : index
    %c0_72 = arith.constant 0 : index
    %c0_73 = arith.constant 0 : index
    %111 = vector.load %arg8[%c0_71, %c0_72, %c0_73] : memref<2x1x128xf32, #tpu.memory_space<vmem>>, vector<2x1x128xf32>
    tpu.vector_store %arg8[%c0_71, %c0_72, %c0_73], %110 {strides = array<i32>} : memref<2x1x128xf32, #tpu.memory_space<vmem>>, vector<2x1x128xf32>,
    return
  }
  func.func @transform_0(%arg0: i32) -> (i32, i32) {
    %c0_i32 = arith.constant 0 : i32
    %c0_i32_0 = arith.constant 0 : i32
    return %arg0, %c0_i32 : i32, i32
  }
  func.func @transform_1(%arg0: i32) -> (i32, i32, i32) {
    %c0_i32 = arith.constant 0 : i32
    %c0_i32_0 = arith.constant 0 : i32
    %c0_i32_1 = arith.constant 0 : i32
    %c0_i32_2 = arith.constant 0 : i32
    return %c0_i32, %c0_i32_0, %c0_i32_1 : i32, i32, i32
  }
  func.func @transform_2(%arg0: i32) -> (i32, i32) {
    %c0_i32 = arith.constant 0 : i32
    %c0_i32_0 = arith.constant 0 : i32
    %c0_i32_1 = arith.constant 0 : i32
    return %c0_i32, %c0_i32_0 : i32, i32
  }
  func.func @transform_3(%arg0: i32) -> (i32, i32, i32, i32) {
    %c0_i32 = arith.constant 0 : i32
    %c0_i32_0 = arith.constant 0 : i32
    %c0_i32_1 = arith.constant 0 : i32
    %c0_i32_2 = arith.constant 0 : i32
    %c0_i32_3 = arith.constant 0 : i32
    return %c0_i32, %c0_i32_0, %c0_i32_1, %c0_i32_2 : i32, i32, i32, i32
  }
  func.func @transform_4(%arg0: i32) -> (i32, i32, i32) {
    %c0_i32 = arith.constant 0 : i32
    %c0_i32_0 = arith.constant 0 : i32
    %c0_i32_1 = arith.constant 0 : i32
    %c0_i32_2 = arith.constant 0 : i32
    return %c0_i32, %c0_i32_0, %c0_i32_1 : i32, i32, i32
  }
  func.func @transform_5(%arg0: i32) -> (i32, i32) {
    %c0_i32 = arith.constant 0 : i32
    %c0_i32_0 = arith.constant 0 : i32
    %c0_i32_1 = arith.constant 0 : i32
    return %c0_i32, %c0_i32_0 : i32, i32
  }
  func.func @transform_6(%arg0: i32) -> (i32, i32) {
    %c0_i32 = arith.constant 0 : i32
    %c0_i32_0 = arith.constant 0 : i32
    %c0_i32_1 = arith.constant 0 : i32
    return %c0_i32, %c0_i32_0 : i32, i32
  }
  func.func @transform_7(%arg0: i32) -> (i32, i32, i32) {
    %c0_i32 = arith.constant 0 : i32
    %c0_i32_0 = arith.constant 0 : i32
    %c0_i32_1 = arith.constant 0 : i32
    return %arg0, %c0_i32, %c0_i32_0 : i32, i32, i32
  }
}

</mosaic_0001>

<bundles_post_ra>
// kernel: tpu_custom_call.1
= control target key start
LH: loop header
LB: loop body
LE: loop exit
PB: predicated region body
PF: predicated region fallthrough
CT: control target
= control target key end

     0   :  { %12 = vsyncpa [#allocation3], 0  ;;  %s3395_s0 = inlined_call_operand.vmem [shape: bf16[128,128], index: 0, kind: input, shape index: {}]   ;;  %s3396_s1 = inlined_call_operand.vmem [shape: bf16[7,128,32], index: 1, kind: input, shape index: {}]   ;;  %s3397_s2 = inlined_call_operand.vmem [shape: f32[1,32], index: 2, kind: input, shape index: {}]   ;;  %s3398_s3 = inlined_call_operand.vmem [shape: bf16[2,3,32,32], index: 3, kind: input, shape index: {}]   ;;  %s3399_s4 = inlined_call_operand.vmem [shape: f32[2,1,32], index: 4, kind: input, shape index: {}]   ;;  %s3400_s5 = inlined_call_operand.vmem [shape: bf16[32,128], index: 5, kind: input, shape index: {}]   ;;  %s3401_s6 = inlined_call_operand.vmem [shape: f32[1,128], index: 6, kind: input, shape index: {}]   ;;  %s3402_s7 = inlined_call_operand.hbm [shape: f32[4,1,128], index: 7, kind: output, shape index: {}]  }
   0x1   :  { %14 = vsyncpa [#allocation3 + $0x1], 0  ;;  %s2743_s24 = smov 0   ;;  %s2745_s25 = smov 0  }
   0x2   :  { %s2747_s26 = smov 0   ;;  %s2749_s27 = smov 0  }
   0x3 LB: > { %s2764_s28 = sadd.s32 4294967295, %s2698_s27   ;;  %s2059_s29 = sadd.s32 4294967294, %s2698_s27   ;;  %s2698_s27 = sphi %s2749_s27, %s3408_s27   ;;  %s2694_s26 = sphi %s2747_s26, %s3407_s26   ;;  %s2690_s25 = sphi %s2745_s25, %s3406_s25   ;;  %s2686_s24 = sphi %s2743_s24, %s3405_s24  }
   0x4   : > { %s2768_s30 = sadd.s32 1, %s2698_s27   ;;  %s179_s8 = sadd.s32 1, %s2694_s26 }
   0x5   : > { %s176_s9 = ssub.s32 %s2698_s27, %s2768_s30  ;;  %p189_p0 = scmp.ne.s32.totalorder %s2694_s26, %s2690_s25 }
   0x6   : > { %p177_p1 = scmp.eq.s32.totalorder %s176_s9, 0  ;;  %p190_p2 = scmp.eq.s32.totalorder %s2764_s28, 1 }
   0x7   : > { %p195_p3 = scmp.ne.s32.totalorder %s2690_s25, %s2686_s24  ;;  %p196_p4 = scmp.eq.s32.totalorder %s2059_s29, 1 }
   0x8   : > { %s2779_s10 = scalar_select %p177_p1, %s2694_s26, %s179_s8  }
   0x9   : > { %p2781_p5 = por %p190_p2, %p189_p0  ;;  %p2785_p6 = por %p196_p4, %p195_p3 }
   0xa   : > { %p2062_p7 = scmp.ge.s32.totalorder %s2698_s27, 1  ;;  %p241_p8 = scmp.lt.s32.totalorder %s2698_s27, 3 }
   0xc   : > { %p242_p9 = pnand %p2062_p7, %p241_p8 }
   0xd   : > { %s2064_s19 = sshll.u32 (!%p242_p9), %s2764_s28, 3  ;;  %s270_s15 = sand.u32 (!%p242_p9), 1, %s2690_s25  }
   0xe   : > { %245 = sbr.rel (%p242_p9) target bundleno = 1020 (0x3fc), region = 48  ;;  %p274_p10 = scmp.lt.s32.totalorder (!%p242_p9), %s2064_s19, 15 }
   0xf   : > { %s2063_s16 = sshll.u32 (!%p242_p9), %s270_s15, 1 }
  0x13   : > { %v2527_v0 = vld [vmem:[%s3396_s1 + $0x78] sm:$0xff]  ;;  %v2526_v4 = vld [vmem:[%s3396_s1 + $0x70] sm:$0xff]  ;;  %s3410_s19 = smov (!%p274_p10, %s2064_s19), 15  ;;  %v2525_v8 = vld [vmem:[%s3396_s1 + $0x68] sm:$0xff]  ;;  %vm342_vm0 = vsmask.f32 7424 }
  0x14   : > { %v2519_v1 = vld [vmem:[%s3396_s1 + $0x38] sm:$0xff]  ;;  %426 = vmatpush.bf16.msra.mxu0 %v2527_v0  ;;  %v2518_v5 = vld [vmem:[%s3396_s1 + $0x30] sm:$0xff]  ;;  %v2517_v9 = vld [vmem:[%s3396_s1 + $0x28] sm:$0xff]  ;;  %s2065_s8 = sshll.u32 %s3410_s19, 2  ;;  %vm553_vm1 = vcmask 1046528   ;;  %vm789_vm4 = vcmask 1045504  }
  0x15   : > { %v2535_v2 = vld [vmem:[%s3396_s1 + $0xb8] sm:$0xff]  ;;  %507 = vmatpush.bf16.msra.mxu1 %v2519_v1  ;;  %v2534_v6 = vld [vmem:[%s3396_s1 + $0xb0] sm:$0xff]  ;;  %v2533_v10 = vld [vmem:[%s3396_s1 + $0xa8] sm:$0xff]  ;;  %s2843_s22 = scalar_lea.vmem %s3395_s0, %s2065_s8  ;;  %vm667_vm2 = vsmask.f32 6400  ;;  %vm1025_vm5 = vcmask 1044480  }
  0x16   : > { %v2543_v3 = vld [vmem:[%s3396_s1 + $0xf8] sm:$0xff]  ;;  %613 = vmatpush.bf16.msra.mxu2 %v2535_v2  ;;  %v2542_v7 = vld [vmem:[%s3396_s1 + $0xf0] sm:$0xff]  ;;  %v2541_v11 = vld [vmem:[%s3396_s1 + $0xe8] sm:$0xff]  ;;  %vm903_vm3 = vsmask.f32 5376  ;;  %vm1211_vm14 = vcmask 261120  }
  0x17   : > { %735 = vmatpush.bf16.msra.mxu3 %v2543_v3  ;;  %v2524_v12 = vld [vmem:[%s3396_s1 + $0x60] sm:$0xff]  ;;  %v2523_v16 = vld [vmem:[%s3396_s1 + $0x58] sm:$0xff]  ;;  %v2861_v21 = vld [vmem:[%s2843_s22 + $0x8] sm:$0xff]  ;;  %vm1259_vm15 = vcmask 1042432   ;;  %s2505_s8 = sshll.u32 %s2764_s28, 1  ;;  %s1983_s28 = scalar_lea.sflag [#allocation3], %s270_s15 }
  0x18   : > { %427 = vmatpush.bf16.msra.mxu0 %v2526_v4  ;;  %v2516_v13 = vld [vmem:[%s3396_s1 + $0x20] sm:$0xff]  ;;  %v2515_v17 = vld [vmem:[%s3396_s1 + $0x18] sm:$0xff]  ;;  %v2522_v22 = vld [vmem:[%s3396_s1 + $0x50] sm:$0xff]  ;;  %v2882_v28 = vshll.u32 %v2861_v21, 16  ;;  %v2885_v29 = vshrl.u32 %v2861_v21, 16  ;;  %v555_v46 = vrot.slane %v2861_v21, 1  ;;  %s1993_s21 = scalar_lea.hbm %s3402_s7, %s2505_s8 }
  0x19   : > { %508 = vmatpush.bf16.msra.mxu1 %v2518_v5  ;;  %v2532_v14 = vld [vmem:[%s3396_s1 + $0xa0] sm:$0xff]  ;;  %v2531_v19 = vld [vmem:[%s3396_s1 + $0x98] sm:$0xff]  ;;  %v2514_v23 = vld [vmem:[%s3396_s1 + $0x10] sm:$0xff]  ;;  %s1996_s29 = sshll.u32 %s1993_s21, 4  ;;  %s1997_s29 = int_to_ptr.hbm [resolvable:$true] %s1996_s29 }
  0x1a   : > { %614 = vmatpush.bf16.msra.mxu2 %v2534_v6  ;;  %v2540_v15 = vld [vmem:[%s3396_s1 + $0xe0] sm:$0xff]  ;;  %v2539_v20 = vld [vmem:[%s3396_s1 + $0xd8] sm:$0xff]  ;;  %v2530_v25 = vld [vmem:[%s3396_s1 + $0x90] sm:$0xff]  ;;  %v671_v37 = vrot.slane %v2885_v29, 1  ;;  %v672_v38 = vrot.slane %v2882_v28, 2  ;;  %v353_v42 = vrot.slane %v2882_v28, 1 }
  0x1b   : > { %736 = vmatpush.bf16.msra.mxu3 %v2542_v7  ;;  %v2852_v18 = vld [vmem:[%s2843_s22] sm:$0xff]  ;;  %v2538_v26 = vld [vmem:[%s3396_s1 + $0xd0] sm:$0xff]  ;;  %v2521_v30 = vld [vmem:[%s3396_s1 + $0x48] sm:$0xff]  ;;  %s2650_s9 = sshra.s32 %s1997_s29, 4  ;;  %s2651_s9 = int_to_ptr.hbm [resolvable:$true] %s2650_s9 }
  0x1c   : > { %428 = vmatpush.bf16.msra.mxu0 %v2525_v8  ;;  %v2870_v24 = vshll.u32 %v2852_v18, 16  ;;  %v2879_v27 = vshrl.u32 %v2852_v18, 16  ;;  %v2513_v31 = vld [vmem:[%s3396_s1 + $0x8] sm:$0xff]  ;;  %v2520_v39 = vld [vmem:[%s3396_s1 + $0x40] sm:$0xff]  ;;  %v554_v45 = vrot.slane %v2852_v18, 1  ;;  %v673_v48 = vor.u32 %v672_v38, %v671_v37  ;;  %v2924_v52 = vld [vmem:[%s2843_s22 + $0x10] sm:$0xff]  ;;  %p2657_p0 = scmp.lt.s32.totalorder %s2651_s9, %s3402_s7 }
  0x1d   : > { %509 = vmatpush.bf16.msra.mxu1 %v2517_v9  ;;  %v2529_v33 = vld [vmem:[%s3396_s1 + $0x88] sm:$0xff]  ;;  %v2512_v40 = vld [vmem:[%s3396_s1] sm:$0xff]  ;;  %v2551_v53 = vld [vmem:[%s3396_s1 + $0x138] sm:$0xff]  ;;  %v2934_v55 = vshll.u32 %v2924_v52, 16  ;;  %v2937_v56 = vshrl.u32 %v2924_v52, 16  ;;  %v357_v0 = vor.u32 %v2885_v29, %v353_v42  ;;  %v557_v2 = vrot.slane %v2924_v52, 1 }
  0x1e   : > { %615 = vmatpush.bf16.msra.mxu2 %v2533_v10  ;;  %v348_v32 = vrot.slane %v2870_v24, 1  ;;  %v2537_v34 = vld [vmem:[%s3396_s1 + $0xc8] sm:$0xff]  ;;  %v668_v35 = vrot.slane %v2879_v27, 1  ;;  %v669_v36 = vrot.slane %v2870_v24, 2  ;;  %v2528_v43 = vld [vmem:[%s3396_s1 + $0x80] sm:$0xff]  ;;  %v556_v50 = vsel %vm553_vm1, %v554_v45, %v555_v46  ;;  %v2559_v54 = vld [vmem:[%s3396_s1 + $0x178] sm:$0xff] }
  0x1f   : > { %737 = vmatpush.bf16.msra.mxu3 %v2541_v11  ;;  %v2536_v44 = vld [vmem:[%s3396_s1 + $0xc0] sm:$0xff]  ;;  %v2550_v57 = vld [vmem:[%s3396_s1 + $0x130] sm:$0xff]  ;;  %v2948_v59 = vld [vmem:[%s3396_s1 + $0x1b8] sm:$0xff]  ;;  %v675_v60 = vrot.slane %v2937_v56, 1  ;;  %v676_v61 = vrot.slane %v2934_v55, 2  ;;  %v361_v1 = vrot.slane %v2934_v55, 1  ;;  %v558_v8 = vsel %vm553_vm1, %v555_v46, %v557_v2 }
  0x20   : > { %429 = vmatpush.bf16.msra.mxu0 %v2524_v12  ;;  %v349_v41 = vor.u32 %v348_v32, %v2879_v27  ;;  %v670_v47 = vor.u32 %v669_v36, %v668_v35  ;;  %v2558_v58 = vld [vmem:[%s3396_s1 + $0x170] sm:$0xff]  ;;  %v2549_v62 = vld [vmem:[%s3396_s1 + $0x128] sm:$0xff]  ;;  %v2548_v4 = vld [vmem:[%s3396_s1 + $0x120] sm:$0xff]  ;;  %s2652_s13 = scalar_lea.hbm %s2651_s9, 2 }
  0x21   : > { %510 = vmatpush.bf16.msra.mxu1 %v2516_v13  ;;  %v2557_v63 = vld [vmem:[%s3396_s1 + $0x168] sm:$0xff]  ;;  %v677_v3 = vor.u32 %v676_v61, %v675_v60  ;;  %v2556_v5 = vld [vmem:[%s3396_s1 + $0x160] sm:$0xff]  ;;  %v362_v6 = vsel %vm342_vm0, %v357_v0, %v361_v1  ;;  %v2970_v7 = vld [vmem:[%s2843_s22 + $0x18] sm:$0xff]  ;;  %s272_s22 = scalar_lea.vmem [#allocation2], %s2063_s16  ;;  %p2653_p11 = scmp.ne.s32.totalorder %s2651_s9, %s2652_s13 }
  0x22   : > { %616 = vmatpush.bf16.msra.mxu2 %v2532_v14  ;;  %v354_v49 = vsel %vm342_vm0, %v349_v41, %v353_v42  ;;  %v674_v51 = vsel %vm667_vm2, %v670_v47, %v673_v48  ;;  %v2547_v10 = vld [vmem:[%s3396_s1 + $0x118] sm:$0xff]  ;;  %v2979_v11 = vshll.u32 %v2970_v7, 16  ;;  %v2982_v12 = vshrl.u32 %v2970_v7, 16  ;;  %v2566_v14 = vld [vmem:[%s3396_s1 + $0x1b0] sm:$0xff]  ;;  %v2560_v47 = vld [vmem:[%s3396_s1 + $0x180] sm:$0xff]  ;;  %s1994_s23 = sshll.u32 %s272_s22, 4  ;;  %s1995_s23 = int_to_ptr.vmem [resolvable:$true] %s1994_s23 }
  0x23   : > { %738 = vmatpush.bf16.msra.mxu3 %v2540_v15  ;;  %v678_v9 = vsel %vm667_vm2, %v673_v48, %v677_v3  ;;  %v2555_v13 = vld [vmem:[%s3396_s1 + $0x158] sm:$0xff]  ;;  %v2546_v15 = vld [vmem:[%s3396_s1 + $0x110] sm:$0xff]  ;;  %v907_v41 = vrot.slane %v2885_v29, 2  ;;  %v908_v42 = vrot.slane %v2882_v28, 3  ;;  %v2561_v29 = vld [vmem:[%s3396_s1 + $0x188] sm:$0xff]  ;;  %p2654_p12 = pnand %p2653_p11, %p2781_p5  ;;  %s2656_s16 = scalar_lea.hbm %s3402_s7, 4 }
  0x24   : > { %430 = vmatpush.bf16.msra.mxu0 %v2523_v16  ;;  %v2554_v16 = vld [vmem:[%s3396_s1 + $0x150] sm:$0xff]  ;;  %v2563_v35 = vld [vmem:[%s3396_s1 + $0x198] sm:$0xff]  ;;  %v915_v61 = vrot.slane %v2982_v12, 2  ;;  %p2658_p1 = scmp.lt.s32.totalorder %s2656_s16, %s2652_s13 }
  0x25   : > { %511 = vmatpush.bf16.msra.mxu1 %v2515_v17  ;;  %v2565_v17 = vld [vmem:[%s3396_s1 + $0x1a8] sm:$0xff]  ;;  %v2562_v45 = vld [vmem:[%s3396_s1 + $0x190] sm:$0xff]  ;;  %p2655_p13 = pneg %p2654_p12 }
  0x26   : > { %617 = vmatpush.bf16.msra.mxu2 %v2531_v19  ;;  %v679_v19 = vrot.slane %v2982_v12, 1  ;;  %p2659_p2 = por %p2658_p1, %p2657_p0 }
  0x27   : > { %739 = vmatpush.bf16.msra.mxu3 %v2539_v20  ;;  %v680_v20 = vrot.slane %v2979_v11, 2 }
  0x28   : > { %431 = vmatpush.bf16.msra.mxu0 %v2522_v22  ;;  %v2545_v22 = vld [vmem:[%s3396_s1 + $0x108] sm:$0xff]  ;;  %p2660_p3 = pnand %p2659_p2, %p2655_p13 }
  0x29   : > { %512 = vmatpush.bf16.msra.mxu1 %v2514_v23  ;;  %v2553_v23 = vld [vmem:[%s3396_s1 + $0x148] sm:$0xff]  ;;  %v681_v32 = vor.u32 %v680_v20, %v679_v19 }
  0x2a   : > { %618 = vmatpush.bf16.msra.mxu2 %v2530_v25  ;;  %v2564_v25 = vld [vmem:[%s3396_s1 + $0x1a0] sm:$0xff] }
  0x2b   : > { %740 = vmatpush.bf16.msra.mxu3 %v2538_v26  ;;  %v365_v26 = vor.u32 %v2937_v56, %v361_v1  ;;  %v682_v38 = vsel %vm667_vm2, %v677_v3, %v681_v32  ;;  %v1026_v1 = vrot.slane %v2852_v18, 3 }
  0x2c   : > { %432 = vmatpush.bf16.msra.mxu0 %v2521_v30  ;;  %v369_v30 = vrot.slane %v2979_v11, 1 }
  0x2d   : > { %513 = vmatpush.bf16.msra.mxu1 %v2513_v31  ;;  %v559_v31 = vrot.slane %v2970_v7, 1 }
  0x2e   : > { %619 = vmatpush.bf16.msra.mxu2 %v2529_v33  ;;  %v2544_v33 = vld [vmem:[%s3396_s1 + $0x100] sm:$0xff]  ;;  %v370_v36 = vsel %vm342_vm0, %v365_v26, %v369_v30  ;;  %v373_v48 = vor.u32 %v2982_v12, %v369_v30 }
  0x2f   : > { %741 = vmatpush.bf16.msra.mxu3 %v2537_v34  ;;  %v2552_v34 = vld [vmem:[%s3396_s1 + $0x140] sm:$0xff]  ;;  %v560_v37 = vsel %vm553_vm1, %v557_v2, %v559_v31 }
  0x30   : > { %433 = vmatpush.bf16.msra.mxu0 %v2520_v39  ;;  %v904_v39 = vrot.slane %v2879_v27, 2  ;;  %v793_v27 = vrot.slane %v2924_v52, 2 }
  0x31   : > { %514 = vmatpush.bf16.msra.mxu1 %v2512_v40  ;;  %v905_v40 = vrot.slane %v2870_v24, 3  ;;  %v791_v24 = vrot.slane %v2861_v21, 2 }
  0x32   : > { %620 = vmatpush.bf16.msra.mxu2 %v2528_v43 }
  0x33   : > { %742 = vmatpush.bf16.msra.mxu3 %v2536_v44  ;;  %434 = vmatmul.bf16.vlgmr.msra.gmra.mxu0 %v354_v49  ;;  %v906_v43 = vor.u32 %v905_v40, %v904_v39  ;;  %v909_v44 = vor.u32 %v908_v42, %v907_v41  ;;  %v794_v46 = vsel %vm789_vm4, %v791_v24, %v793_v27  ;;  %v911_v49 = vrot.slane %v2937_v56, 2 }
  0x34   : > { %515 = vmatmul.bf16.vlgmr.msra.gmra.mxu1 %v2852_v18  ;;  %849 = vmatpush.bf16.msrb.mxu0 %v2551_v53  ;;  %v795_v53 = vrot.slane %v2970_v7, 2  ;;  %v1027_v56 = vrot.slane %v2861_v21, 3 }
  0x35   : > { %621 = vmatmul.bf16.vlgmr.msra.gmra.mxu2 %v556_v50  ;;  %971 = vmatpush.bf16.msrb.mxu1 %v2559_v54  ;;  %v910_v28 = vsel %vm903_vm3, %v906_v43, %v909_v44  ;;  %v912_v50 = vrot.slane %v2934_v55, 3  ;;  %v1029_v55 = vrot.slane %v2924_v52, 3 }
  0x36   : > { %743 = vmatmul.bf16.vlgmr.msra.gmra.mxu3 %v674_v51  ;;  %2582 = vmatpush.bf16.msrb.mxu2 %v2948_v59 }
  0x37   : > { %v913_v51 = vor.u32 %v912_v50, %v911_v49  ;;  %v1030_v60 = vsel %vm1025_vm5, %v1027_v56, %v1029_v55 }
  0x38   : > { %850 = vmatpush.bf16.msrb.mxu0 %v2550_v57  ;;  %v796_v57 = vsel %vm789_vm4, %v793_v27, %v795_v53 }
  0x39   : > { %972 = vmatpush.bf16.msrb.mxu1 %v2558_v58  ;;  %v914_v54 = vsel %vm903_vm3, %v909_v44, %v913_v51  ;;  %v790_v58 = vrot.slane %v2852_v18, 2 }
  0x3a   : > { %2583 = vmatpush.bf16.msrb.mxu2 %v2566_v14 }
  0x3c   : > { %851 = vmatpush.bf16.msrb.mxu0 %v2549_v62  ;;  %v916_v62 = vrot.slane %v2979_v11, 3 }
  0x3d   : > { %973 = vmatpush.bf16.msrb.mxu1 %v2557_v63 }
  0x3e   : > { %2584 = vmatpush.bf16.msrb.mxu2 %v2565_v17  ;;  %v917_v63 = vor.u32 %v916_v62, %v915_v61 }
  0x40   : > { %852 = vmatpush.bf16.msrb.mxu0 %v2548_v4  ;;  %v918_v0 = vsel %vm903_vm3, %v913_v51, %v917_v63  ;;  %v1028_v4 = vsel %vm1025_vm5, %v1026_v1, %v1027_v56 }
  0x41   : > { %974 = vmatpush.bf16.msrb.mxu1 %v2556_v5 }
  0x42   : > { %2585 = vmatpush.bf16.msrb.mxu2 %v2564_v25 }
  0x43   : > { %439 = vmatmul.bf16.gmra.mxu0 %v362_v6 }
  0x44   : > { %520 = vmatmul.bf16.gmra.mxu1 %v2861_v21  ;;  %853 = vmatpush.bf16.msrb.mxu0 %v2547_v10  ;;  %v1031_v21 = vrot.slane %v2970_v7, 3 }
  0x45   : > { %626 = vmatmul.bf16.gmra.mxu2 %v558_v8  ;;  %975 = vmatpush.bf16.msrb.mxu1 %v2555_v13 }
  0x46   : > { %748 = vmatmul.bf16.gmra.mxu3 %v678_v9  ;;  %2586 = vmatpush.bf16.msrb.mxu2 %v2563_v35 }
  0x48   : > { %854 = vmatpush.bf16.msrb.mxu0 %v2546_v15 }
  0x49   : > { %976 = vmatpush.bf16.msrb.mxu1 %v2554_v16 }
  0x4a   : > { %2587 = vmatpush.bf16.msrb.mxu2 %v2562_v45 }
  0x4c   : > { %855 = vmatpush.bf16.msrb.mxu0 %v2545_v22 }
  0x4d   : > { %977 = vmatpush.bf16.msrb.mxu1 %v2553_v23 }
  0x4e   : > { %2588 = vmatpush.bf16.msrb.mxu2 %v2561_v29 }
  0x50   : > { %856 = vmatpush.bf16.msrb.mxu0 %v2544_v33 }
  0x51   : > { %978 = vmatpush.bf16.msrb.mxu1 %v2552_v34 }
  0x52   : > { %2589 = vmatpush.bf16.msrb.mxu2 %v2560_v47 }
  0x53   : > { %444 = vmatmul.bf16.gmra.mxu0 %v370_v36 }
  0x54   : > { %525 = vmatmul.bf16.gmra.mxu1 %v2924_v52  ;;  %1085 = vmatpush.bf16.msra.mxu0 %v2948_v59  ;;  %v792_v59 = vsel %vm789_vm4, %v790_v58, %v791_v24  ;;  %v1032_v52 = vsel %vm1025_vm5, %v1029_v55, %v1031_v21 }
  0x55   : > { %631 = vmatmul.bf16.gmra.mxu2 %v560_v37 }
  0x56   : > { %753 = vmatmul.bf16.gmra.mxu3 %v682_v38 }
  0x58   : > { %1086 = vmatpush.bf16.msra.mxu0 %v2566_v14 }
  0x5c   : > { %1087 = vmatpush.bf16.msra.mxu0 %v2565_v17 }
  0x60   : > { %1088 = vmatpush.bf16.msra.mxu0 %v2564_v25 }
  0x63   : > { %449 = vmatmul.bf16.gmra.mxu0 %v373_v48 }
  0x64   : > { %530 = vmatmul.bf16.gmra.mxu1 %v2970_v7  ;;  %1089 = vmatpush.bf16.msra.mxu0 %v2563_v35 }
  0x65   : > { %636 = vmatmul.bf16.gmra.mxu2 %v559_v31 }
  0x66   : > { %758 = vmatmul.bf16.gmra.mxu3 %v681_v32 }
  0x68   : > { %1090 = vmatpush.bf16.msra.mxu0 %v2562_v45 }
  0x6c   : > { %1091 = vmatpush.bf16.msra.mxu0 %v2561_v29 }
  0x70   : > { %1092 = vmatpush.bf16.msra.mxu0 %v2560_v47 }
  0x73   : > { %857 = vmatmul.bf16.vlgmr.msrb.gmra.mxu0 %v792_v59 }
  0x74   : > { %979 = vmatmul.bf16.vlgmr.msrb.gmra.mxu1 %v910_v28 }
  0x75   : > { %1098 = vmatmul.bf16.vlgmr.msrb.gmra.mxu2 %v1030_v60 }
  0x83   : > { %862 = vmatmul.bf16.gmra.mxu0 %v794_v46 }
  0x84   : > { %984 = vmatmul.bf16.gmra.mxu1 %v914_v54  ;;  %v3092_v54 = vld [vmem:[%s3397_s2] ss:$0 sm:$0xff] }
  0x85   : > { %1103 = vmatmul.bf16.gmra.mxu2 %v1032_v52  ;;  %v2569_v52 = vld [vmem:[%s3398_s3 + $0x8] sm:$0xff] }
  0x86   : > { %1230 = vmatpush.bf16.msrb.mxu3 %v2569_v52 }
  0x93   : > { %867 = vmatmul.bf16.gmra.mxu0 %v796_v57 }
  0x94   : > { %989 = vmatmul.bf16.gmra.mxu1 %v918_v0 }
  0x95   : > { %1108 = vmatmul.bf16.gmra.mxu2 %v1031_v21 }
  0xa3   : > { %872 = vmatmul.bf16.gmra.mxu0 %v795_v53 }
  0xa4   : > { %994 = vmatmul.bf16.gmra.mxu1 %v917_v63 }
  0xb0   : > { %v435_v2 = vpop.f32.mrf.mxu0 }
  0xb1   : > { %v516_v3 = vpop.f32.mrf.mxu1 }
  0xb2   : > { %v517_v5 = vadd.f32 %v516_v3, %v435_v2 }
  0xb3   : > { %1093 = vmatmul.bf16.vlgmr.msra.gmra.mxu0 %v1028_v4 }
  0xb8   : > { %v622_v6 = vpop.f32.mrf.mxu2  ;;  %v3063_v8 = vpop.f32.mrf.mxu0 }
  0xb9   : > { %v642_v7 = vadd.f32 %v622_v6, %v517_v5  ;;  %v3065_v9 = vpop.f32.mrf.mxu1  ;;  %v744_v26 = vpop.f32.mrf.mxu3 }
  0xbb   : > { %v764_v38 = vadd.f32 %v744_v26, %v642_v7 }
  0xc0   : > { %v3067_v10 = vpop.f32.mrf.mxu2  ;;  %v440_v11 = vpop.f32.mrf.mxu0 }
  0xc1   : > { %v521_v12 = vpop.f32.mrf.mxu1  ;;  %v3071_v34 = vpop.f32.mrf.mxu3 }
  0xc2   : > { %v522_v13 = vadd.f32 %v521_v12, %v440_v11 }
  0xc8   : > { %v627_v14 = vpop.f32.mrf.mxu2  ;;  %v442_v15 = vpop.f32.mrf.mxu0 }
  0xc9   : > { %v523_v18 = vpop.f32.mrf.mxu1  ;;  %v749_v42 = vpop.f32.mrf.mxu3  ;;  %v644_v27 = vadd.f32 %v627_v14, %v522_v13 }
  0xca   : > { %v524_v48 = vadd.f32 %v523_v18, %v442_v15 }
  0xcb   : > { %v766_v29 = vadd.f32 %v749_v42, %v644_v27 }
  0xd0   : > { %v629_v16 = vpop.f32.mrf.mxu2  ;;  %v445_v17 = vpop.f32.mrf.mxu0 }
  0xd1   : > { %v526_v19 = vpop.f32.mrf.mxu1  ;;  %v751_v28 = vpop.f32.mrf.mxu3  ;;  %v645_v51 = vadd.f32 %v629_v16, %v524_v48 }
  0xd2   : > { %v527_v20 = vadd.f32 %v526_v19, %v445_v17 }
  0xd3   : > { %v767_v56 = vadd.f32 %v751_v28, %v645_v51 }
  0xd8   : > { %v632_v22 = vpop.f32.mrf.mxu2  ;;  %v447_v23 = vpop.f32.mrf.mxu0 }
  0xd9   : > { %v528_v25 = vpop.f32.mrf.mxu1  ;;  %v754_v57 = vpop.f32.mrf.mxu3  ;;  %v646_v62 = vadd.f32 %v632_v22, %v527_v20 }
  0xda   : > { %v529_v11 = vadd.f32 %v528_v25, %v447_v23 }
  0xdb   : > { %v768_v2 = vadd.f32 %v754_v57, %v646_v62 }
  0xe0   : > { %v634_v30 = vpop.f32.mrf.mxu2  ;;  %v450_v31 = vpop.f32.mrf.mxu0 }
  0xe1   : > { %v531_v32 = vpop.f32.mrf.mxu1  ;;  %v756_v3 = vpop.f32.mrf.mxu3  ;;  %v647_v15 = vadd.f32 %v634_v30, %v529_v11 }
  0xe2   : > { %v3069_v33 = vadd.f32 %v531_v32, %v450_v31  ;;  %v2573_v31 = vld [vmem:[%s3398_s3 + $0x28] sm:$0xff] }
  0xe3   : > { %v769_v23 = vadd.f32 %v756_v3, %v647_v15  ;;  %1454 = vmatpush.bf16.msra.mxu1 %v2573_v31 }
  0xe8   : > { %v3073_v35 = vpop.f32.mrf.mxu2  ;;  %v3075_v36 = vpop.f32.mrf.mxu0 }
  0xe9   : > { %v3077_v37 = vpop.f32.mrf.mxu1  ;;  %v759_v42 = vpop.f32.mrf.mxu3 }
  0xf0   : > { %v3079_v39 = vpop.f32.mrf.mxu2  ;;  %v858_v40 = vpop.f32.mrf.mxu0 }
  0xf1   : > { %v3081_v41 = vpop.f32.mrf.mxu1  ;;  %v3083_v43 = vadd.f32 %v858_v40, %v764_v38 }
  0xf8   : > { %v1099_v44 = vpop.f32.mrf.mxu2  ;;  %v3085_v45 = vpop.f32.mrf.mxu0 }
  0xf9   : > { %v3087_v24 = vpop.f32.mrf.mxu1 }
 0x100   : > { %v863_v46 = vpop.f32.mrf.mxu0  ;;  %v1101_v50 = vpop.f32.mrf.mxu2 }
 0x101   : > { %v985_v47 = vpop.f32.mrf.mxu1  ;;  %v880_v49 = vadd.f32 %v863_v46, %v766_v29  ;;  %v2568_v46 = vld [vmem:[%s3398_s3] sm:$0xff] }
 0x102   : > { %1231 = vmatpush.bf16.msrb.mxu3 %v2568_v46 }
 0x103   : > { %v1002_v53 = vadd.f32 %v985_v47, %v880_v49 }
 0x105   : > { %v1116_v58 = vadd.f32 %v1099_v44, %v1002_v53  ;;  %v648_v44 = vadd.f32 %v3073_v35, %v3069_v33  ;;  %v534_v35 = vadd.f32 %v3077_v37, %v3075_v36  ;;  %v2572_v36 = vld [vmem:[%s3398_s3 + $0x20] sm:$0xff] }
 0x106   : > { %1455 = vmatpush.bf16.msra.mxu1 %v2572_v36 }
 0x107   : > { %v3095_v55 = vadd.f32 %v3092_v54, %v1116_v58  ;;  %v770_v47 = vadd.f32 %v759_v42, %v648_v44 }
 0x108   : > { %v865_v59 = vpop.f32.mrf.mxu0  ;;  %v1104_v21 = vpop.f32.mrf.mxu2 }
 0x109   : > { %v987_v60 = vpop.f32.mrf.mxu1  ;;  %v881_v61 = vadd.f32 %v865_v59, %v767_v56  ;;  %v1144_v63 = vmul.f32 0.1, %v3095_v55  ;;  %vm1136_vm6 = vcmp.ge.f32.partialorder %v3095_v55, 0.0  ;;  %v649_v56 = vadd.f32 %v3079_v39, %v534_v35 }
 0x10b   : > { %v1003_v0 = vadd.f32 %v987_v60, %v881_v61  ;;  %v1152_v4 = vsel %vm1136_vm6, %v3095_v55, %v1144_v63  ;;  %v761_v61 = vpop.f32.mrf.mxu3 }
 0x10c   : > { %v1160_v14 = vpack.c.bf16 %v1152_v4, %v1152_v4 }
 0x10d   : > { %v1117_v1 = vadd.f32 %v1101_v50, %v1003_v0  ;;  %v2571_v0 = vld [vmem:[%s3398_s3 + $0x18] sm:$0xff] }
 0x10e   : > { %v1190_v22 = vunpack.c.l.b16 %v1160_v14  ;;  %1353 = vmatpush.bf16.msrb.mxu0 %v2571_v0 }
 0x10f   : > { %v3104_v5 = vadd.f32 %v3092_v54, %v1117_v1  ;;  %v771_v1 = vadd.f32 %v761_v61, %v649_v56 }
 0x110   : > { %v868_v6 = vpop.f32.mrf.mxu0  ;;  %v1106_v20 = vpop.f32.mrf.mxu2 }
 0x111   : > { %v990_v7 = vpop.f32.mrf.mxu1  ;;  %vm1137_vm7 = vcmp.ge.f32.partialorder %v3104_v5, 0.0  ;;  %v1145_v12 = vmul.f32 0.1, %v3104_v5  ;;  %v882_v13 = vadd.f32 %v868_v6, %v768_v2 }
 0x113   : > { %v1153_v18 = vsel %vm1137_vm7, %v3104_v5, %v1145_v12  ;;  %v1004_v16 = vadd.f32 %v990_v7, %v882_v13  ;;  %v2570_v13 = vld [vmem:[%s3398_s3 + $0x10] sm:$0xff] }
 0x114   : > { %v1161_v17 = vpack.c.bf16 %v1153_v18, %v1153_v18  ;;  %1354 = vmatpush.bf16.msrb.mxu0 %v2570_v13 }
 0x115   : > { %v1118_v19 = vadd.f32 %v1104_v21, %v1004_v16 }
 0x116   : > { %v1191_v26 = vunpack.c.l.b16 %v1161_v17 }
 0x117   : > { %v3113_v25 = vadd.f32 %v3092_v54, %v1118_v19 }
 0x118   : > { %v3115_v32 = vpack.c.b16 %v1191_v26, %v1190_v22  ;;  %v870_v38 = vpop.f32.mrf.mxu0  ;;  %v1109_v50 = vpop.f32.mrf.mxu2 }
 0x119   : > { %v992_v30 = vpop.f32.mrf.mxu1  ;;  %v883_v40 = vadd.f32 %v870_v38, %v769_v23  ;;  %v1146_v27 = vmul.f32 0.1, %v3113_v25  ;;  %vm1138_vm8 = vcmp.ge.f32.partialorder %v3113_v25, 0.0 }
 0x11a   : > { %v1299_v37 = vshrl.u32 %v3115_v32, 16  ;;  %v1302_v39 = vshll.u32 %v3115_v32, 16  ;;  %v1418_v7 = vrot.slane %v3115_v32, 3 }
 0x11b   : > { %v1005_v28 = vadd.f32 %v992_v30, %v883_v40  ;;  %v1154_v48 = vsel %vm1138_vm8, %v3113_v25, %v1146_v27 }
 0x11c   : > { %v1162_v58 = vpack.c.bf16 %v1154_v48, %v1154_v48  ;;  %v1301_v14 = vrot.slane %v1299_v37, 1  ;;  %v1304_v18 = vrot.slane %v1302_v39, 2 }
 0x11d   : > { %v1119_v29 = vadd.f32 %v1106_v20, %v1005_v28  ;;  %v519_v20 = vadd.f32 %v3065_v9, %v3063_v8  ;;  %v1000_v8 = vadd.f32 %v3081_v41, %v3083_v43 }
 0x11e   : > { %v1192_v21 = vunpack.c.l.b16 %v1162_v58  ;;  %v1305_v44 = vor.u32 %v1304_v18, %v1301_v14 }
 0x11f   : > { %v3126_v49 = vadd.f32 %v3092_v54, %v1119_v29  ;;  %v643_v40 = vadd.f32 %v3067_v10, %v519_v20 }
 0x120   : > { %v873_v51 = vpop.f32.mrf.mxu0  ;;  %v1111_v15 = vpop.f32.mrf.mxu2 }
 0x121   : > { %v995_v33 = vpop.f32.mrf.mxu1  ;;  %vm1139_vm9 = vcmp.ge.f32.partialorder %v3126_v49, 0.0  ;;  %v1147_v53 = vmul.f32 0.1, %v3126_v49  ;;  %v884_v57 = vadd.f32 %v873_v51, %v770_v47  ;;  %v765_v48 = vadd.f32 %v3071_v34, %v643_v40  ;;  %v2577_v40 = vld [vmem:[%s3398_s3 + $0x48] sm:$0xff] }
 0x122   : > { %1720 = vmatpush.bf16.msra.mxu3 %v2577_v40 }
 0x123   : > { %v1155_v59 = vsel %vm1139_vm9, %v3126_v49, %v1147_v53  ;;  %v1006_v60 = vadd.f32 %v995_v33, %v884_v57  ;;  %v879_v35 = vadd.f32 %v3085_v45, %v765_v48 }
 0x124   : > { %v1163_v62 = vpack.c.bf16 %v1155_v59, %v1155_v59 }
 0x125   : > { %v1120_v63 = vadd.f32 %v1109_v50, %v1006_v60  ;;  %v1001_v60 = vadd.f32 %v3087_v24, %v879_v35 }
 0x126   : > { %v1193_v52 = vunpack.c.l.b16 %v1163_v62 }
 0x127   : > { %v3143_v2 = vadd.f32 %v3092_v54, %v1120_v63 }
 0x128   : > { %v3145_v3 = vpack.c.b16 %v1193_v52, %v1192_v21  ;;  %v875_v4 = vpop.f32.mrf.mxu0 }
 0x129   : > { %v997_v6 = vpop.f32.mrf.mxu1  ;;  %vm1140_vm10 = vcmp.ge.f32.partialorder %v3143_v2, 0.0  ;;  %v1148_v11 = vmul.f32 0.1, %v3143_v2  ;;  %v885_v12 = vadd.f32 %v875_v4, %v771_v1 }
 0x12a   : > { %v1420_v16 = vrot.slane %v3145_v3, 3  ;;  %v1307_v17 = vshrl.u32 %v3145_v3, 16  ;;  %v1310_v19 = vshll.u32 %v3145_v3, 16 }
 0x12b   : > { %v1007_v22 = vadd.f32 %v997_v6, %v885_v12  ;;  %v1156_v26 = vsel %vm1140_vm10, %v3143_v2, %v1148_v11 }
 0x12c   : > { %v1421_v31 = vsel %vm1025_vm5, %v1418_v7, %v1420_v16  ;;  %v1309_v23 = vrot.slane %v1307_v17, 1  ;;  %v1312_v38 = vrot.slane %v1310_v19, 2  ;;  %v1164_v30 = vpack.c.bf16 %v1156_v26, %v1156_v26 }
 0x12d   : > { %v1121_v42 = vadd.f32 %v1111_v15, %v1007_v22 }
 0x12e   : > { %v1313_v27 = vor.u32 %v1312_v38, %v1309_v23  ;;  %v1194_v28 = vunpack.c.l.b16 %v1164_v30 }
 0x12f   : > { %v1133_v9 = vadd.f32 %v3092_v54, %v1121_v42 }
 0x130   : > { %v1094_v29 = vpop.f32.mrf.mxu0  ;;  %v1314_v46 = vsel %vm667_vm2, %v1305_v44, %v1313_v27  ;;  %v1198_v47 = vpack.c.b16 %v1194_v28, %v1194_v28 }
 0x131   : > { %vm1141_vm11 = vcmp.ge.f32.partialorder %v1133_v9, 0.0  ;;  %v1149_v50 = vmul.f32 0.1, %v1133_v9  ;;  %v1114_v51 = vadd.f32 %v1094_v29, %v1000_v8  ;;  %v2575_v29 = vld [vmem:[%s3398_s3 + $0x38] sm:$0xff] }
 0x132   : > { %v1315_v33 = vshrl.u32 %v1198_v47, 16  ;;  %v1318_v10 = vshll.u32 %v1198_v47, 16  ;;  %1631 = vmatpush.bf16.msra.mxu2 %v2575_v29 }
 0x133   : > { %v1157_v53 = vsel %vm1141_vm11, %v1133_v9, %v1149_v50  ;;  %v1126_v57 = vadd.f32 %v3092_v54, %v1114_v51 }
 0x134   : > { %v1165_v58 = vpack.c.bf16 %v1157_v53, %v1157_v53  ;;  %v1317_v41 = vrot.slane %v1315_v33, 1  ;;  %v1320_v43 = vrot.slane %v1318_v10, 2  ;;  %v2574_v53 = vld [vmem:[%s3398_s3 + $0x30] sm:$0xff] }
 0x135   : > { %v1142_v61 = vmul.f32 0.1, %v1126_v57  ;;  %vm1134_vm12 = vcmp.ge.f32.partialorder %v1126_v57, 0.0 }
 0x136   : > { %v1415_v56 = vunpack.c.l.b16 %v1165_v58  ;;  %v1321_v59 = vor.u32 %v1320_v43, %v1317_v41  ;;  %1632 = vmatpush.bf16.msra.mxu2 %v2574_v53 }
 0x137   : > { %v1150_v37 = vsel %vm1134_vm12, %v1126_v57, %v1142_v61  ;;  %vm1914_vm12 = vcmask 375808  }
 0x138   : > { %v1096_v34 = vpop.f32.mrf.mxu0  ;;  %v1416_v62 = vpack.c.b16 %v1415_v56, %v1194_v28  ;;  %v1322_v63 = vsel %vm667_vm2, %v1313_v27, %v1321_v59  ;;  %v1158_v39 = vpack.c.bf16 %v1150_v37, %v1150_v37 }
 0x139   : > { %v1115_v0 = vadd.f32 %v1096_v34, %v1001_v60 }
 0x13a   : > { %v1422_v36 = vrot.slane %v1416_v62, 3  ;;  %v1188_v6 = vunpack.c.l.b16 %v1158_v39 }
 0x13b   : > { %v1127_v45 = vadd.f32 %v3092_v54, %v1115_v0 }
 0x13c   : > { %v1423_v21 = vsel %vm1025_vm5, %v1420_v16, %v1422_v36 }
 0x13d   : > { %vm1135_vm13 = vcmp.ge.f32.partialorder %v1127_v45, 0.0  ;;  %v1143_v52 = vmul.f32 0.1, %v1127_v45 }
 0x13f   : > { %v1151_v1 = vsel %vm1135_vm13, %v1127_v45, %v1143_v52 }
 0x140   : > { %v1159_v4 = vpack.c.bf16 %v1151_v1, %v1151_v1 }
 0x142   : > { %v1189_v24 = vunpack.c.l.b16 %v1159_v4 }
 0x144   : > { %v1195_v11 = vpack.c.b16 %v1189_v24, %v1188_v6 }
 0x146   : > { %2410 = vmatmul.msk.bf16.vlgmr.msrb.gmra.mxu3 %vm1211_vm14, %v1195_v11  ;;  %v1417_v12 = vrot.slane %v1195_v11, 3  ;;  %v1292_v13 = vshrl.u32 %v1195_v11, 16  ;;  %v1295_v14 = vshll.u32 %v1195_v11, 16 }
 0x148   : > { %v1419_v54 = vsel %vm1025_vm5, %v1417_v12, %v1418_v7  ;;  %v1294_v15 = vrot.slane %v1292_v13, 1  ;;  %v1297_v18 = vrot.slane %v1295_v14, 2 }
 0x149   : > { %2442 = vmatmul.msk.bf16.vlgmr.msra.gmra.mxu1 %vm1211_vm14, %v1419_v54 }
 0x14a   : > { %v1298_v16 = vor.u32 %v1297_v18, %v1294_v15 }
 0x14c   : > { %v1306_v17 = vsel %vm667_vm2, %v1298_v16, %v1305_v44 }
 0x14d   : > { %2426 = vmatmul.msk.bf16.vlgmr.msrb.gmra.mxu0 %vm1211_vm14, %v1306_v17 }
 0x156   : > { %2411 = vmatmul.msk.bf16.gmra.mxu3 %vm1211_vm14, %v3115_v32  ;;  %v3195_v32 = vld [vmem:[%s3399_s4] ss:$0 sm:$0xff] }
 0x157   : > { %v1170_v20 = vadd.f32 %v3195_v32, %v1126_v57  ;;  %v1171_v8 = vadd.f32 %v3195_v32, %v1127_v45  ;;  %v1172_v61 = vadd.f32 %v3195_v32, %v3095_v55  ;;  %v1173_v54 = vadd.f32 %v3195_v32, %v3104_v5 }
 0x159   : > { %2443 = vmatmul.msk.bf16.gmra.mxu1 %vm1211_vm14, %v1421_v31 }
 0x15d   : > { %2427 = vmatmul.msk.bf16.gmra.mxu0 %vm1211_vm14, %v1314_v46  ;;  %v2576_v46 = vld [vmem:[%s3398_s3 + $0x40] sm:$0xff] }
 0x15e   : > { %1721 = vmatpush.bf16.msra.mxu3 %v2576_v46 }
 0x166   : > { %2412 = vmatmul.msk.bf16.gmra.mxu3 %vm1211_vm14, %v3145_v3 }
 0x169   : > { %2444 = vmatmul.msk.bf16.gmra.mxu1 %vm1211_vm14, %v1423_v21 }
 0x16d   : > { %2428 = vmatmul.msk.bf16.gmra.mxu0 %vm1211_vm14, %v1322_v63 }
 0x176   : > { %2413 = vmatmul.msk.bf16.gmra.mxu3 %vm1211_vm14, %v1198_v47 }
 0x179   : > { %2445 = vmatmul.msk.bf16.gmra.mxu1 %vm1211_vm14, %v1422_v36 }
 0x17d   : > { %2429 = vmatmul.msk.bf16.gmra.mxu0 %vm1211_vm14, %v1321_v59 }
 0x1c6   : > { %v1457_v7 = vpop.f32.mrf.mxu1 }
 0x1c7   : > { %v1483_v30 = vrot.slane %v1457_v7, 5 }
 0x1c9   : > { %v1233_v19 = vpop.f32.mrf.mxu3 }
 0x1ca   : > { %v1260_v3 = vrot.slane %v1233_v19, 5  ;;  %v1356_v22 = vpop.f32.mrf.mxu0 }
 0x1cb   : > { %v1382_v26 = vrot.slane %v1356_v22, 5 }
 0x1cc   : > { %v1280_v31 = vadd.f32 %v1260_v3, %v1170_v20 }
 0x1ce   : > { %v1402_v23 = vadd.f32 %v1382_v26, %v1280_v31  ;;  %v1459_v38 = vpop.f32.mrf.mxu1 }
 0x1cf   : > { %v1484_v47 = vrot.slane %v1459_v38, 5 }
 0x1d0   : > { %v3201_v42 = vadd.f32 %v1483_v30, %v1402_v23 }
 0x1d1   : > { %v1235_v44 = vpop.f32.mrf.mxu3  ;;  %v1485_v57 = vsel %vm1259_vm15, %v1483_v30, %v1484_v47 }
 0x1d2   : > { %v1261_v27 = vrot.slane %v1235_v44, 5  ;;  %v1358_v28 = vpop.f32.mrf.mxu0  ;;  %v1517_v50 = vmul.f32 0.1, %v3201_v42  ;;  %vm1510_vm1 = vcmp.ge.f32.partialorder %v3201_v42, 0.0 }
 0x1d3   : > { %v1383_v9 = vrot.slane %v1358_v28, 5 }
 0x1d4   : > { %v1262_v48 = vsel %vm1259_vm15, %v1260_v3, %v1261_v27  ;;  %v1524_v58 = vsel %vm1510_vm1, %v3201_v42, %v1517_v50 }
 0x1d5   : > { %v1281_v51 = vadd.f32 %v1262_v48, %v1171_v8  ;;  %v1384_v33 = vsel %vm1259_vm15, %v1382_v26, %v1383_v9  ;;  %v1531_v62 = vpack.c.bf16 %v1524_v58, %v1524_v58 }
 0x1d6   : > { %v1462_v10 = vpop.f32.mrf.mxu1 }
 0x1d7   : > { %v1403_v35 = vadd.f32 %v1384_v33, %v1281_v51  ;;  %v1486_v63 = vrot.slane %v1462_v10, 5  ;;  %v1562_v1 = vunpack.c.l.b16 %v1531_v62 }
 0x1d9   : > { %v3219_v41 = vadd.f32 %v1485_v57, %v1403_v35  ;;  %v1238_v43 = vpop.f32.mrf.mxu3  ;;  %v1487_v4 = vsel %vm1259_vm15, %v1484_v47, %v1486_v63 }
 0x1da   : > { %v1263_v56 = vrot.slane %v1238_v43, 5  ;;  %v1361_v59 = vpop.f32.mrf.mxu0 }
 0x1db   : > { %vm1511_vm3 = vcmp.ge.f32.partialorder %v3219_v41, 0.0  ;;  %v1518_v60 = vmul.f32 0.1, %v3219_v41  ;;  %v1385_v34 = vrot.slane %v1361_v59, 5 }
 0x1dc   : > { %v1264_v0 = vsel %vm1259_vm15, %v1261_v27, %v1263_v56  ;;  %v1174_v27 = vadd.f32 %v3195_v32, %v3113_v25  ;;  %v1175_v25 = vadd.f32 %v3195_v32, %v3126_v49 }
 0x1dd   : > { %v1525_v36 = vsel %vm1511_vm3, %v3219_v41, %v1518_v60  ;;  %v1282_v45 = vadd.f32 %v1264_v0, %v1172_v61  ;;  %v1386_v37 = vsel %vm1259_vm15, %v1383_v9, %v1385_v34 }
 0x1de   : > { %v1532_v21 = vpack.c.bf16 %v1525_v36, %v1525_v36  ;;  %v1464_v52 = vpop.f32.mrf.mxu1 }
 0x1df   : > { %v1404_v39 = vadd.f32 %v1386_v37, %v1282_v45  ;;  %v1488_v18 = vrot.slane %v1464_v52, 5 }
 0x1e0   : > { %v1563_v6 = vunpack.c.l.b16 %v1532_v21 }
 0x1e1   : > { %v3229_v24 = vadd.f32 %v1487_v4, %v1404_v39  ;;  %v1240_v55 = vpop.f32.mrf.mxu3  ;;  %v1489_v26 = vsel %vm1259_vm15, %v1486_v63, %v1488_v18 }
 0x1e2   : > { %v1265_v11 = vrot.slane %v1240_v55, 5  ;;  %v1363_v12 = vpop.f32.mrf.mxu0  ;;  %v1569_v13 = vpack.c.b16 %v1563_v6, %v1562_v1 }
 0x1e3   : > { %vm1512_vm6 = vcmp.ge.f32.partialorder %v3229_v24, 0.0  ;;  %v1519_v14 = vmul.f32 0.1, %v3229_v24  ;;  %v1387_v15 = vrot.slane %v1363_v12, 5 }
 0x1e4   : > { %v1266_v16 = vsel %vm1259_vm15, %v1263_v56, %v1265_v11  ;;  %v1574_v51 = vshrl.u32 %v1569_v13, 16  ;;  %v1577_v33 = vshll.u32 %v1569_v13, 16  ;;  %v1686_v43 = vrot.slane %v1569_v13, 3 }
 0x1e5   : > { %v1526_v17 = vsel %vm1512_vm6, %v3229_v24, %v1519_v14  ;;  %v1283_v7 = vadd.f32 %v1266_v16, %v1173_v54  ;;  %v1388_v19 = vsel %vm1259_vm15, %v1385_v34, %v1387_v15 }
 0x1e6   : > { %v1533_v20 = vpack.c.bf16 %v1526_v17, %v1526_v17  ;;  %v1467_v3 = vpop.f32.mrf.mxu1  ;;  %v1576_v61 = vrot.slane %v1574_v51, 1  ;;  %v1579_v34 = vrot.slane %v1577_v33, 2 }
 0x1e7   : > { %v1405_v22 = vadd.f32 %v1388_v19, %v1283_v7  ;;  %v1490_v8 = vrot.slane %v1467_v3, 5 }
 0x1e8   : > { %v1564_v31 = vunpack.c.l.b16 %v1533_v20  ;;  %v1580_v54 = vor.u32 %v1579_v34, %v1576_v61 }
 0x1e9   : > { %v3239_v23 = vadd.f32 %v1489_v26, %v1405_v22  ;;  %v1243_v38 = vpop.f32.mrf.mxu3  ;;  %v1491_v35 = vsel %vm1259_vm15, %v1488_v18, %v1490_v8 }
 0x1ea   : > { %v1267_v30 = vrot.slane %v1243_v38, 5  ;;  %v1366_v5 = vpop.f32.mrf.mxu0  ;;  %v3241_v40 = vpack.c.b16 %v1564_v31, %v1563_v6 }
 0x1eb   : > { %vm1513_vm7 = vcmp.ge.f32.partialorder %v3239_v23, 0.0  ;;  %v1520_v44 = vmul.f32 0.1, %v3239_v23  ;;  %v1389_v28 = vrot.slane %v1366_v5, 5 }
 0x1ec   : > { %v1268_v9 = vsel %vm1259_vm15, %v1265_v11, %v1267_v30  ;;  %v1780_v1 = vshll.u32 %v3241_v40, 16 }
 0x1ed   : > { %v1527_v29 = vsel %vm1513_vm7, %v3239_v23, %v1520_v44  ;;  %v1284_v46 = vadd.f32 %v1268_v9, %v1174_v27  ;;  %v1390_v47 = vsel %vm1259_vm15, %v1387_v15, %v1389_v28  ;;  %v1778_v27 = vshrl.u32 %v3241_v40, 16 }
 0x1ee   : > { %v1534_v48 = vpack.c.bf16 %v1527_v29, %v1527_v29  ;;  %v3250_v50 = vpop.f32.mrf.mxu1  ;;  %v1782_v22 = vrot.slane %v1780_v1, 1 }
 0x1ef   : > { %v1406_v10 = vadd.f32 %v1390_v47, %v1284_v46  ;;  %v1492_v63 = vrot.slane %v3250_v50, 5 }
 0x1f0   : > { %v1565_v53 = vunpack.c.l.b16 %v1534_v48  ;;  %v1783_v47 = vor.u32 %v1782_v22, %v1778_v27 }
 0x1f1   : > { %v3253_v57 = vadd.f32 %v1491_v35, %v1406_v10  ;;  %v1245_v58 = vpop.f32.mrf.mxu3  ;;  %v1493_v14 = vsel %vm1259_vm15, %v1490_v8, %v1492_v63 }
 0x1f2   : > { %v1269_v56 = vrot.slane %v1245_v58, 5  ;;  %v1368_v59 = vpop.f32.mrf.mxu0  ;;  %v3257_v60 = vpack.c.b16 %v1565_v53, %v1564_v31  ;;  %v1176_v31 = vadd.f32 %v3195_v32, %v3143_v2  ;;  %v2578_v32 = vld [vmem:[%s3398_s3 + $0x50] sm:$0xff] }
 0x1f3   : > { %v1521_v62 = vmul.f32 0.1, %v3253_v57  ;;  %v1391_v0 = vrot.slane %v1368_v59, 5  ;;  %vm1514_vm8 = vcmp.ge.f32.partialorder %v3253_v57, 0.0 }
 0x1f4   : > { %v1270_v36 = vsel %vm1259_vm15, %v1267_v30, %v1269_v56  ;;  %v1687_v45 = vrot.slane %v3257_v60, 3  ;;  %v1582_v49 = vshrl.u32 %v3257_v60, 16  ;;  %v1585_v37 = vshll.u32 %v3257_v60, 16  ;;  %v2579_v30 = vld [vmem:[%s3398_s3 + $0x58] sm:$0xff] }
 0x1f5   : > { %v1285_v21 = vadd.f32 %v1270_v36, %v1175_v25  ;;  %v1392_v52 = vsel %vm1259_vm15, %v1389_v28, %v1391_v0  ;;  %v1528_v39 = vsel %vm1514_vm8, %v3253_v57, %v1521_v62  ;;  %1827 = vmatpush.bf16.msrb.mxu2 %v2579_v30 }
 0x1f6   : > { %v1472_v4 = vpop.f32.mrf.mxu1  ;;  %v1688_v6 = vsel %vm1025_vm5, %v1686_v43, %v1687_v45  ;;  %v1584_v55 = vrot.slane %v1582_v49, 1  ;;  %v1587_v11 = vrot.slane %v1585_v37, 2  ;;  %v1535_v12 = vpack.c.bf16 %v1528_v39, %v1528_v39 }
 0x1f7   : > { %v1407_v13 = vadd.f32 %v1392_v52, %v1285_v21  ;;  %2474 = vmatmul.msk.bf16.vlgmr.msra.gmra.mxu3 %vm1211_vm14, %v1688_v6  ;;  %v1494_v5 = vrot.slane %v1472_v4, 5 }
 0x1f8   : > { %v1588_v15 = vor.u32 %v1587_v11, %v1584_v55  ;;  %v1566_v18 = vunpack.c.l.b16 %v1535_v12 }
 0x1f9   : > { %v3272_v16 = vadd.f32 %v1493_v14, %v1407_v13  ;;  %v1248_v17 = vpop.f32.mrf.mxu3  ;;  %v1495_v51 = vsel %vm1259_vm15, %v1492_v63, %v1494_v5  ;;  %1828 = vmatpush.bf16.msrb.mxu2 %v2578_v32 }
 0x1fa   : > { %v1271_v7 = vrot.slane %v1248_v17, 5  ;;  %v1371_v19 = vpop.f32.mrf.mxu0  ;;  %v1589_v20 = vsel %vm667_vm2, %v1580_v54, %v1588_v15  ;;  %v1775_v3 = vpack.c.b16 %v1566_v18, %v1565_v53 }
 0x1fb   : > { %v1522_v26 = vmul.f32 0.1, %v3272_v16  ;;  %v1393_v38 = vrot.slane %v1371_v19, 5  ;;  %2459 = vmatmul.msk.bf16.vlgmr.msra.gmra.mxu2 %vm1211_vm14, %v1589_v20  ;;  %vm1515_vm9 = vcmp.ge.f32.partialorder %v3272_v16, 0.0 }
 0x1fc   : > { %v1272_v44 = vsel %vm1259_vm15, %v1269_v56, %v1271_v7  ;;  %v1785_v28 = vshll.u32 %v1775_v3, 16  ;;  %v1789_v1 = vshrl.u32 %v1775_v3, 16 }
 0x1fd   : > { %v1286_v8 = vadd.f32 %v1272_v44, %v1176_v31  ;;  %v1394_v9 = vsel %vm1259_vm15, %v1391_v0, %v1393_v38  ;;  %v1529_v2 = vsel %vm1515_vm9, %v3272_v16, %v1522_v26 }
 0x1fe   : > { %v1474_v29 = vpop.f32.mrf.mxu1  ;;  %v1536_v46 = vpack.c.bf16 %v1529_v2, %v1529_v2  ;;  %v1787_v48 = vrot.slane %v1785_v28, 1 }
 0x1ff   : > { %v1408_v50 = vadd.f32 %v1394_v9, %v1286_v8 }
 0x200   : > { %v1567_v33 = vunpack.c.l.b16 %v1536_v46  ;;  %v1788_v40 = vsel %vm342_vm0, %v1783_v47, %v1787_v48  ;;  %v1791_v55 = vor.u32 %v1789_v1, %v1787_v48 }
 0x201   : > { %v3292_v10 = vadd.f32 %v1495_v51, %v1408_v50  ;;  %v1250_v35 = vpop.f32.mrf.mxu3 }
 0x202   : > { %v1373_v53 = vpop.f32.mrf.mxu0  ;;  %v1571_v25 = vpack.c.b16 %v1567_v33, %v1566_v18 }
 0x203   : > { %vm1516_vm10 = vcmp.ge.f32.partialorder %v3292_v10, 0.0  ;;  %v1523_v58 = vmul.f32 0.1, %v3292_v10 }
 0x204   : > { %v1689_v43 = vrot.slane %v1571_v25, 3  ;;  %v1591_v56 = vshrl.u32 %v1571_v25, 16  ;;  %v1594_v59 = vshll.u32 %v1571_v25, 16 }
 0x205   : > { %v1530_v60 = vsel %vm1516_vm10, %v3292_v10, %v1523_v58 }
 0x206   : > { %v1690_v61 = vsel %vm1025_vm5, %v1687_v45, %v1689_v43  ;;  %v1593_v34 = vrot.slane %v1591_v56, 1  ;;  %v1596_v62 = vrot.slane %v1594_v59, 2  ;;  %v1537_v63 = vpack.c.bf16 %v1530_v60, %v1530_v60 }
 0x207   : > { %2475 = vmatmul.msk.bf16.gmra.mxu3 %vm1211_vm14, %v1690_v61 }
 0x208   : > { %v1597_v0 = vor.u32 %v1596_v62, %v1593_v34  ;;  %v1568_v36 = vunpack.c.l.b16 %v1537_v63 }
 0x20a   : > { %v1598_v49 = vsel %vm667_vm2, %v1588_v15, %v1597_v0  ;;  %v1572_v37 = vpack.c.b16 %v1568_v36, %v1568_v36  ;;  %v1776_v21 = vpack.c.b16 %v1568_v36, %v1567_v33  ;;  %v3312_v15 = vld [vmem:[%s3399_s4 + $0x1] ss:$0 sm:$0xff] }
 0x20b   : > { %2460 = vmatmul.msk.bf16.gmra.mxu2 %vm1211_vm14, %v1598_v49  ;;  %v1543_v17 = vadd.f32 %v3312_v15, %v3201_v42  ;;  %v1544_v22 = vadd.f32 %v3312_v15, %v3219_v41  ;;  %v1545_v5 = vadd.f32 %v3312_v15, %v3229_v24  ;;  %v1546_v8 = vadd.f32 %v3312_v15, %v3239_v23 }
 0x20c   : > { %v1691_v52 = vrot.slane %v1572_v37, 3  ;;  %v1600_v39 = vshll.u32 %v1572_v37, 16  ;;  %v1793_v4 = vshll.u32 %v1776_v21, 16  ;;  %v1797_v14 = vshrl.u32 %v1776_v21, 16 }
 0x20e   : > { %v1692_v6 = vsel %vm1025_vm5, %v1689_v43, %v1691_v52  ;;  %v1602_v45 = vrot.slane %v1600_v39, 2  ;;  %v1795_v11 = vrot.slane %v1793_v4, 1 }
 0x210   : > { %v1603_v12 = vsel %vm667_vm2, %v1597_v0, %v1602_v45  ;;  %v1796_v13 = vsel %vm342_vm0, %v1791_v55, %v1795_v11  ;;  %v1799_v54 = vor.u32 %v1797_v14, %v1795_v11  ;;  %vm1895_vm0 = vcmask 1041408  }
 0x211   : > { %v1547_v14 = vadd.f32 %v3312_v15, %v3253_v57 }
 0x217   : > { %2476 = vmatmul.msk.bf16.gmra.mxu3 %vm1211_vm14, %v1692_v6 }
 0x21b   : > { %2461 = vmatmul.msk.bf16.gmra.mxu2 %vm1211_vm14, %v1603_v12 }
 0x22b   : > { %2489 = vmatmul.msk.bf16.vlgmr.msrb.gmra.mxu2 %vm1211_vm14, %v1788_v40 }
 0x23b   : > { %2490 = vmatmul.msk.bf16.gmra.mxu2 %vm1211_vm14, %v1796_v13 }
 0x24b   : > { %2491 = vmatmul.msk.bf16.gmra.mxu2 %vm1211_vm14, %v1799_v54 }
 0x27a   : > { %v1723_v41 = vpop.f32.mrf.mxu3 }
 0x27b   : > { %v1744_v51 = vrot.slane %v1723_v41, 2 }
 0x27e   : > { %v1634_v18 = vpop.f32.mrf.mxu2 }
 0x27f   : > { %v1656_v7 = vrot.slane %v1634_v18, 2 }
 0x281   : > { %v1674_v19 = vadd.f32 %v1656_v7, %v1543_v17 }
 0x282   : > { %v1725_v46 = vpop.f32.mrf.mxu3 }
 0x283   : > { %v1745_v50 = vrot.slane %v1725_v46, 2  ;;  %v1762_v33 = vadd.f32 %v1744_v51, %v1674_v19 }
 0x285   : > { %v1746_v35 = vsel %vm789_vm4, %v1744_v51, %v1745_v50 }
 0x286   : > { %v1636_v20 = vpop.f32.mrf.mxu2 }
 0x287   : > { %v1657_v3 = vrot.slane %v1636_v20, 2  ;;  %v1876_v20 = vlaneseq }
 0x289   : > { %v1658_v26 = vsel %vm789_vm4, %v1656_v7, %v1657_v3 }
 0x28a   : > { %v1675_v31 = vadd.f32 %v1658_v26, %v1544_v22  ;;  %v1728_v48 = vpop.f32.mrf.mxu3 }
 0x28b   : > { %v1747_v56 = vrot.slane %v1728_v48, 2 }
 0x28c   : > { %v1763_v58 = vadd.f32 %v1746_v35, %v1675_v31 }
 0x28d   : > { %v1748_v63 = vsel %vm789_vm4, %v1745_v50, %v1747_v56 }
 0x28e   : > { %v1639_v38 = vpop.f32.mrf.mxu2 }
 0x28f   : > { %v1659_v30 = vrot.slane %v1639_v38, 2 }
 0x291   : > { %v1660_v44 = vsel %vm789_vm4, %v1657_v3, %v1659_v30 }
 0x292   : > { %v1676_v27 = vadd.f32 %v1660_v44, %v1545_v5  ;;  %v1730_v59 = vpop.f32.mrf.mxu3  ;;  %v1549_v5 = vadd.f32 %v3312_v15, %v3292_v10 }
 0x293   : > { %v1749_v21 = vrot.slane %v1730_v59, 2  ;;  %v2580_v59 = vld [vmem:[%s3400_s5] sm:$0xff] }
 0x294   : > { %v1764_v36 = vadd.f32 %v1748_v63, %v1676_v27  ;;  %v1879_v27 = vshrl.u32 %v1876_v20, 7 }
 0x295   : > { %v1750_v45 = vsel %vm789_vm4, %v1747_v56, %v1749_v21  ;;  %v2581_v56 = vld [vmem:[%s3400_s5 + $0x8] sm:$0xff] }
 0x296   : > { %v1641_v28 = vpop.f32.mrf.mxu2 }
 0x297   : > { %v1661_v42 = vrot.slane %v1641_v28, 2  ;;  %v1548_v28 = vadd.f32 %v3312_v15, %v3272_v16 }
 0x299   : > { %v1662_v9 = vsel %vm789_vm4, %v1659_v30, %v1661_v42 }
 0x29a   : > { %v1677_v2 = vadd.f32 %v1662_v9, %v1546_v8  ;;  %v1733_v1 = vpop.f32.mrf.mxu3 }
 0x29b   : > { %v1751_v18 = vrot.slane %v1733_v1, 2 }
 0x29c   : > { %v1765_v11 = vadd.f32 %v1750_v45, %v1677_v2 }
 0x29d   : > { %v1752_v26 = vsel %vm789_vm4, %v1749_v21, %v1751_v18 }
 0x29e   : > { %v1644_v32 = vpop.f32.mrf.mxu2 }
 0x29f   : > { %v1663_v39 = vrot.slane %v1644_v32, 2  ;;  %v1880_v32 = vmul.u32 32, %v1879_v27 }
 0x2a1   : > { %v1664_v12 = vsel %vm789_vm4, %v1661_v42, %v1663_v39 }
 0x2a2   : > { %v1678_v17 = vadd.f32 %v1664_v12, %v1547_v14  ;;  %v1735_v38 = vpop.f32.mrf.mxu3 }
 0x2a3   : > { %v1753_v8 = vrot.slane %v1735_v38, 2 }
 0x2a4   : > { %v1766_v30 = vadd.f32 %v1752_v26, %v1678_v17 }
 0x2a6   : > { %v1646_v29 = vpop.f32.mrf.mxu2 }
 0x2a7   : > { %v1665_v19 = vrot.slane %v1646_v29, 2 }
 0x2a9   : > { %v1666_v44 = vsel %vm789_vm4, %v1663_v39, %v1665_v19  ;;  %v1680_v9 = vadd.f32 %v1665_v19, %v1549_v5 }
 0x2aa   : > { %v1679_v2 = vadd.f32 %v1666_v44, %v1548_v28 }
 0x2ab   : > { %v1768_v10 = vadd.f32 %v1753_v8, %v1680_v9 }
 0x2ae   : > { %v1830_v47 = vpop.f32.mrf.mxu2 }
 0x2af   : > { %v1851_v24 = vrot.slane %v1830_v47, 2  ;;  %v1754_v47 = vsel %vm789_vm4, %v1751_v18, %v1753_v8 }
 0x2b0   : > { %v1767_v50 = vadd.f32 %v1754_v47, %v1679_v2 }
 0x2b1   : > { %v1869_v25 = vadd.f32 %v1851_v24, %v1762_v33  ;;  %v1877_v33 = vand.u32 127, %v1876_v20 }
 0x2b3   : > { %v1896_v60 = vrot.slane %v1869_v25, 6  ;;  %vm1881_vm2 = vcmp.ge.s32.totalorder %v1877_v33, %v1880_v32 }
 0x2b6   : > { %v1832_v40 = vpop.f32.mrf.mxu2 }
 0x2b7   : > { %v1852_v53 = vrot.slane %v1832_v40, 2  ;;  %v1882_v40 = vadd.s32 9, %v1880_v32 }
 0x2b9   : > { %v1853_v23 = vsel %vm789_vm4, %v1851_v24, %v1852_v53  ;;  %vm1883_vm5 = vcmp.lt.s32.totalorder %v1877_v33, %v1882_v40 }
 0x2ba   : > { %v1870_v43 = vadd.f32 %v1853_v23, %v1763_v58  ;;  %vm1884_vm11 = vmand %vm1881_vm2, %vm1883_vm5  ;;  %v2700_v58 = vmov 0.0  }
 0x2bb   : > { %v2492_v23 = vsel %vm1884_vm11, 1.0, %v2700_v58 }
 0x2bc   : > { %v1897_v61 = vrot.slane %v1870_v43, 6  ;;  %v1887_v43 = vmul.f32 0.11111111, %v2492_v23 }
 0x2be   : > { %v1835_v34 = vpop.f32.mrf.mxu2  ;;  %v3328_v62 = vsel %vm1895_vm0, %v1896_v60, %v1897_v61 }
 0x2bf   : > { %v1854_v0 = vrot.slane %v1835_v34, 2  ;;  %v2635_v34 = vld [vmem:[%s3401_s6] ss:$0 sm:$0xff] }
 0x2c1   : > { %v1855_v49 = vsel %vm789_vm4, %v1852_v53, %v1854_v0 }
 0x2c2   : > { %v1871_v37 = vadd.f32 %v1855_v49, %v1764_v36 }
 0x2c4   : > { %v1899_v52 = vrot.slane %v1871_v37, 6 }
 0x2c6   : > { %v1837_v4 = vpop.f32.mrf.mxu2  ;;  %v1900_v6 = vsel %vm1895_vm0, %v1897_v61, %v1899_v52 }
 0x2c7   : > { %v1856_v55 = vrot.slane %v1837_v4, 2 }
 0x2c9   : > { %v1857_v13 = vsel %vm789_vm4, %v1854_v0, %v1856_v55 }
 0x2ca   : > { %v1872_v54 = vadd.f32 %v1857_v13, %v1765_v11 }
 0x2cc   : > { %v1901_v7 = vrot.slane %v1872_v54, 6 }
 0x2ce   : > { %v1840_v3 = vpop.f32.mrf.mxu2  ;;  %v1902_v22 = vsel %vm1895_vm0, %v1899_v52, %v1901_v7 }
 0x2cf   : > { %v1858_v31 = vrot.slane %v1840_v3, 2 }
 0x2d1   : > { %v1859_v57 = vsel %vm789_vm4, %v1856_v55, %v1858_v31 }
 0x2d2   : > { %v1873_v42 = vadd.f32 %v1859_v57, %v1766_v30 }
 0x2d4   : > { %v1903_v41 = vrot.slane %v1873_v42, 6 }
 0x2d6   : > { %v1842_v29 = vpop.f32.mrf.mxu2  ;;  %v1904_v46 = vsel %vm1895_vm0, %v1901_v7, %v1903_v41 }
 0x2d7   : > { %v1860_v48 = vrot.slane %v1842_v29, 2 }
 0x2d9   : > { %v1861_v51 = vsel %vm789_vm4, %v1858_v31, %v1860_v48  ;;  %v1875_v24 = vadd.f32 %v1860_v48, %v1768_v10 }
 0x2da   : > { %v1874_v16 = vadd.f32 %v1861_v51, %v1767_v50 }
 0x2db   : > { %v1907_v15 = vrot.slane %v1875_v24, 6 }
 0x2dc   : > { %v1905_v35 = vrot.slane %v1874_v16, 6 }
 0x2de   : > { %v1908_v53 = vsel %vm1895_vm0, %v1905_v35, %v1907_v15  ;;  %v1906_v25 = vsel %vm1895_vm0, %v1903_v41, %v1905_v35 }
 0x2df   : > { %2493 = vmatpush.msk.msrb.mxu3 %vm789_vm4, %v1908_v53 }
 0x2e1   : > { %1931 = vmatpush.msrb.mxu3 %v1906_v25 }
 0x2e3   : > { %1932 = vmatpush.msrb.mxu3 %v1904_v46 }
 0x2e5   : > { %1933 = vmatpush.msrb.mxu3 %v1902_v22 }
 0x2e7   : > { %1934 = vmatpush.msrb.mxu3 %v1900_v6 }
 0x2e9   : > { %1935 = vmatpush.msrb.mxu3 %v3328_v62 }
 0x2ea   : > { %2494 = vmatmul.msk.f32.vlgmr.msrb.gmra.mxu3 %vm1914_vm12, %v1887_v43 }
 0x2eb   : > { %1970 = vmatpush.bf16.msra.mxu3 %v2581_v56 }
 0x2ef   : > { %1971 = vmatpush.bf16.msra.mxu3 %v2580_v59 }
 0x36d   : > { %v1937_v60 = vpop.f32.mrf.mxu3 }
 0x36e   : > { %v1940_v61 = vpack.c.bf16 %v1937_v60, %v1937_v60 }
 0x370   : > { %2503 = vmatmul.msk.bf16.vlgmr.msra.gmra.mxu3 %vm1211_vm14, %v1940_v61 }
 0x3f3   : > { %v1973_v62 = vpop.f32.mrf.mxu3 }
 0x3f4   : > { %v1974_v63 = vadd.f32 %v2635_v34, %v1973_v62 }
 0x3f6   : > { %v1978_v0 = vrot.slane %v1974_v63, 1  ;;  %1980 = vst [vmem:[%s272_s22] sm:$0x1] %v1974_v63 }
 0x3f8   : > { %1981 = vst [vmem:[%s272_s22 + $0x1] sm:$0x1] %v1978_v0 }
 0x3f9   : > { %2663 = shalt.err (!%p2660_p3)
}
 0x3fa   : > { %s2701_s15 = smov 16   ;;  %s2702_s20 = smov 1  }
 0x3fb   : > { %2590 = dma.vmem_to_hbm [thread:$0]  (%p2781_p5), %s1995_s23, 32, %s1997_s29, %s1983_s28, %s2701_s15, %s2701_s15, %s2702_s20   ;;  %v1975_v36 = vpop.f32.mrf.mxu3 }
 0x3fc PF: > { %p2596_p4 = scmp.ge.s32.totalorder %s2698_s27, 2  ;;  %s2011_s19 = sand.u32 1, %s2686_s24  }
 0x3fd   : > { %s2012_s21 = scalar_lea.sflag [#allocation3], %s2011_s19 }
 0x3fe   : > { %p2593_p7 = pnand %p2596_p4, %p2785_p6 }
 0x400   : > { %p2594_p8 = pneg %p2593_p7 }
 0x402   : > { %2681 = dma.done.wait (%p2594_p8), %s2012_s21, 32  }
 0x403   : > { %2683 = vsyncadd (%p2594_p8), %s2012_s21, 4294967264  ;;  %p17_p9 = scmp.ge.s32.totalorder %s2768_s30, 4   ;;  %s3405_s24 = smov %s2690_s25 }
 0x404   : > { %s3406_s25 = smov %s2694_s26  ;;  %s3407_s26 = smov %s2779_s10 }
 0x405   : > { %s3408_s27 = smov %s2768_s30  ;;  %19 = sbr.rel (!%p17_p9) target bundleno = 3 (0x3), region = 95 }
 0x40a   :  { %2018 = vsyncpa [#allocation3], 1 }
 0x40b   :  { %2020 = vsyncpa [#allocation3 + $0x1], 1 }

// kernel: tpu_custom_call.1
= control target key start
LH: loop header
LB: loop body
LE: loop exit
PB: predicated region body
PF: predicated region fallthrough
CT: control target
= control target key end

     0   :  { %12 = vsyncpa [#allocation3], 0  ;;  %s3395_s0 = inlined_call_operand.vmem [shape: bf16[128,128], index: 0, kind: input, shape index: {}]   ;;  %s3396_s1 = inlined_call_operand.vmem [shape: bf16[7,128,32], index: 1, kind: input, shape index: {}]   ;;  %s3397_s2 = inlined_call_operand.vmem [shape: f32[1,32], index: 2, kind: input, shape index: {}]   ;;  %s3398_s3 = inlined_call_operand.vmem [shape: bf16[2,3,32,32], index: 3, kind: input, shape index: {}]   ;;  %s3399_s4 = inlined_call_operand.vmem [shape: f32[2,1,32], index: 4, kind: input, shape index: {}]   ;;  %s3400_s5 = inlined_call_operand.vmem [shape: bf16[32,128], index: 5, kind: input, shape index: {}]   ;;  %s3401_s6 = inlined_call_operand.vmem [shape: f32[1,128], index: 6, kind: input, shape index: {}]   ;;  %s3402_s7 = inlined_call_operand.hbm [shape: f32[4,1,128], index: 7, kind: output, shape index: {}]  }
   0x1   :  { %14 = vsyncpa [#allocation3 + $0x1], 0  ;;  %s2743_s24 = smov 0   ;;  %s2745_s25 = smov 0  }
   0x2   :  { %s2747_s26 = smov 0   ;;  %s2749_s27 = smov 0  }
   0x3 LB: > { %s2764_s28 = sadd.s32 4294967295, %s2698_s27   ;;  %s2059_s29 = sadd.s32 4294967294, %s2698_s27   ;;  %s2698_s27 = sphi %s2749_s27, %s3408_s27   ;;  %s2694_s26 = sphi %s2747_s26, %s3407_s26   ;;  %s2690_s25 = sphi %s2745_s25, %s3406_s25   ;;  %s2686_s24 = sphi %s2743_s24, %s3405_s24  }
   0x4   : > { %s2768_s30 = sadd.s32 1, %s2698_s27   ;;  %s179_s8 = sadd.s32 1, %s2694_s26 }
   0x5   : > { %s176_s9 = ssub.s32 %s2698_s27, %s2768_s30  ;;  %p189_p0 = scmp.ne.s32.totalorder %s2694_s26, %s2690_s25 }
   0x6   : > { %p177_p1 = scmp.eq.s32.totalorder %s176_s9, 0  ;;  %p190_p2 = scmp.eq.s32.totalorder %s2764_s28, 1 }
   0x7   : > { %p195_p3 = scmp.ne.s32.totalorder %s2690_s25, %s2686_s24  ;;  %p196_p4 = scmp.eq.s32.totalorder %s2059_s29, 1 }
   0x8   : > { %s2779_s10 = scalar_select %p177_p1, %s2694_s26, %s179_s8  }
   0x9   : > { %p2781_p5 = por %p190_p2, %p189_p0  ;;  %p2785_p6 = por %p196_p4, %p195_p3 }
   0xa   : > { %p2062_p7 = scmp.ge.s32.totalorder %s2698_s27, 1  ;;  %p241_p8 = scmp.lt.s32.totalorder %s2698_s27, 3 }
   0xc   : > { %p242_p9 = pnand %p2062_p7, %p241_p8 }
   0xd   : > { %s2064_s19 = sshll.u32 (!%p242_p9), %s2764_s28, 3  ;;  %s270_s15 = sand.u32 (!%p242_p9), 1, %s2690_s25  }
   0xe   : > { %245 = sbr.rel (%p242_p9) target bundleno = 1020 (0x3fc), region = 48  ;;  %p274_p10 = scmp.lt.s32.totalorder (!%p242_p9), %s2064_s19, 15 }
   0xf   : > { %s2063_s16 = sshll.u32 (!%p242_p9), %s270_s15, 1 }
  0x13   : > { %v2527_v0 = vld [vmem:[%s3396_s1 + $0x78] sm:$0xff]  ;;  %v2526_v4 = vld [vmem:[%s3396_s1 + $0x70] sm:$0xff]  ;;  %s3410_s19 = smov (!%p274_p10, %s2064_s19), 15  ;;  %v2525_v8 = vld [vmem:[%s3396_s1 + $0x68] sm:$0xff]  ;;  %vm342_vm0 = vsmask.f32 7424 }
  0x14   : > { %v2519_v1 = vld [vmem:[%s3396_s1 + $0x38] sm:$0xff]  ;;  %426 = vmatpush.bf16.msra.mxu0 %v2527_v0  ;;  %v2518_v5 = vld [vmem:[%s3396_s1 + $0x30] sm:$0xff]  ;;  %v2517_v9 = vld [vmem:[%s3396_s1 + $0x28] sm:$0xff]  ;;  %s2065_s8 = sshll.u32 %s3410_s19, 2  ;;  %vm553_vm1 = vcmask 1046528   ;;  %vm789_vm4 = vcmask 1045504  }
  0x15   : > { %v2535_v2 = vld [vmem:[%s3396_s1 + $0xb8] sm:$0xff]  ;;  %507 = vmatpush.bf16.msra.mxu1 %v2519_v1  ;;  %v2534_v6 = vld [vmem:[%s3396_s1 + $0xb0] sm:$0xff]  ;;  %v2533_v10 = vld [vmem:[%s3396_s1 + $0xa8] sm:$0xff]  ;;  %s2843_s22 = scalar_lea.vmem %s3395_s0, %s2065_s8  ;;  %vm667_vm2 = vsmask.f32 6400  ;;  %vm1025_vm5 = vcmask 1044480  }
  0x16   : > { %v2543_v3 = vld [vmem:[%s3396_s1 + $0xf8] sm:$0xff]  ;;  %613 = vmatpush.bf16.msra.mxu2 %v2535_v2  ;;  %v2542_v7 = vld [vmem:[%s3396_s1 + $0xf0] sm:$0xff]  ;;  %v2541_v11 = vld [vmem:[%s3396_s1 + $0xe8] sm:$0xff]  ;;  %vm903_vm3 = vsmask.f32 5376  ;;  %vm1211_vm14 = vcmask 261120  }
  0x17   : > { %735 = vmatpush.bf16.msra.mxu3 %v2543_v3  ;;  %v2524_v12 = vld [vmem:[%s3396_s1 + $0x60] sm:$0xff]  ;;  %v2523_v16 = vld [vmem:[%s3396_s1 + $0x58] sm:$0xff]  ;;  %v2861_v21 = vld [vmem:[%s2843_s22 + $0x8] sm:$0xff]  ;;  %vm1259_vm15 = vcmask 1042432   ;;  %s2505_s8 = sshll.u32 %s2764_s28, 1  ;;  %s1983_s28 = scalar_lea.sflag [#allocation3], %s270_s15 }
  0x18   : > { %427 = vmatpush.bf16.msra.mxu0 %v2526_v4  ;;  %v2516_v13 = vld [vmem:[%s3396_s1 + $0x20] sm:$0xff]  ;;  %v2515_v17 = vld [vmem:[%s3396_s1 + $0x18] sm:$0xff]  ;;  %v2522_v22 = vld [vmem:[%s3396_s1 + $0x50] sm:$0xff]  ;;  %v2882_v28 = vshll.u32 %v2861_v21, 16  ;;  %v2885_v29 = vshrl.u32 %v2861_v21, 16  ;;  %v555_v46 = vrot.slane %v2861_v21, 1  ;;  %s1993_s21 = scalar_lea.hbm %s3402_s7, %s2505_s8 }
  0x19   : > { %508 = vmatpush.bf16.msra.mxu1 %v2518_v5  ;;  %v2532_v14 = vld [vmem:[%s3396_s1 + $0xa0] sm:$0xff]  ;;  %v2531_v19 = vld [vmem:[%s3396_s1 + $0x98] sm:$0xff]  ;;  %v2514_v23 = vld [vmem:[%s3396_s1 + $0x10] sm:$0xff]  ;;  %s1996_s29 = sshll.u32 %s1993_s21, 4  ;;  %s1997_s29 = int_to_ptr.hbm [resolvable:$true] %s1996_s29 }
  0x1a   : > { %614 = vmatpush.bf16.msra.mxu2 %v2534_v6  ;;  %v2540_v15 = vld [vmem:[%s3396_s1 + $0xe0] sm:$0xff]  ;;  %v2539_v20 = vld [vmem:[%s3396_s1 + $0xd8] sm:$0xff]  ;;  %v2530_v25 = vld [vmem:[%s3396_s1 + $0x90] sm:$0xff]  ;;  %v671_v37 = vrot.slane %v2885_v29, 1  ;;  %v672_v38 = vrot.slane %v2882_v28, 2  ;;  %v353_v42 = vrot.slane %v2882_v28, 1 }
  0x1b   : > { %736 = vmatpush.bf16.msra.mxu3 %v2542_v7  ;;  %v2852_v18 = vld [vmem:[%s2843_s22] sm:$0xff]  ;;  %v2538_v26 = vld [vmem:[%s3396_s1 + $0xd0] sm:$0xff]  ;;  %v2521_v30 = vld [vmem:[%s3396_s1 + $0x48] sm:$0xff]  ;;  %s2650_s9 = sshra.s32 %s1997_s29, 4  ;;  %s2651_s9 = int_to_ptr.hbm [resolvable:$true] %s2650_s9 }
  0x1c   : > { %428 = vmatpush.bf16.msra.mxu0 %v2525_v8  ;;  %v2870_v24 = vshll.u32 %v2852_v18, 16  ;;  %v2879_v27 = vshrl.u32 %v2852_v18, 16  ;;  %v2513_v31 = vld [vmem:[%s3396_s1 + $0x8] sm:$0xff]  ;;  %v2520_v39 = vld [vmem:[%s3396_s1 + $0x40] sm:$0xff]  ;;  %v554_v45 = vrot.slane %v2852_v18, 1  ;;  %v673_v48 = vor.u32 %v672_v38, %v671_v37  ;;  %v2924_v52 = vld [vmem:[%s2843_s22 + $0x10] sm:$0xff]  ;;  %p2657_p0 = scmp.lt.s32.totalorder %s2651_s9, %s3402_s7 }
  0x1d   : > { %509 = vmatpush.bf16.msra.mxu1 %v2517_v9  ;;  %v2529_v33 = vld [vmem:[%s3396_s1 + $0x88] sm:$0xff]  ;;  %v2512_v40 = vld [vmem:[%s3396_s1] sm:$0xff]  ;;  %v2551_v53 = vld [vmem:[%s3396_s1 + $0x138] sm:$0xff]  ;;  %v2934_v55 = vshll.u32 %v2924_v52, 16  ;;  %v2937_v56 = vshrl.u32 %v2924_v52, 16  ;;  %v357_v0 = vor.u32 %v2885_v29, %v353_v42  ;;  %v557_v2 = vrot.slane %v2924_v52, 1 }
  0x1e   : > { %615 = vmatpush.bf16.msra.mxu2 %v2533_v10  ;;  %v348_v32 = vrot.slane %v2870_v24, 1  ;;  %v2537_v34 = vld [vmem:[%s3396_s1 + $0xc8] sm:$0xff]  ;;  %v668_v35 = vrot.slane %v2879_v27, 1  ;;  %v669_v36 = vrot.slane %v2870_v24, 2  ;;  %v2528_v43 = vld [vmem:[%s3396_s1 + $0x80] sm:$0xff]  ;;  %v556_v50 = vsel %vm553_vm1, %v554_v45, %v555_v46  ;;  %v2559_v54 = vld [vmem:[%s3396_s1 + $0x178] sm:$0xff] }
  0x1f   : > { %737 = vmatpush.bf16.msra.mxu3 %v2541_v11  ;;  %v2536_v44 = vld [vmem:[%s3396_s1 + $0xc0] sm:$0xff]  ;;  %v2550_v57 = vld [vmem:[%s3396_s1 + $0x130] sm:$0xff]  ;;  %v2948_v59 = vld [vmem:[%s3396_s1 + $0x1b8] sm:$0xff]  ;;  %v675_v60 = vrot.slane %v2937_v56, 1  ;;  %v676_v61 = vrot.slane %v2934_v55, 2  ;;  %v361_v1 = vrot.slane %v2934_v55, 1  ;;  %v558_v8 = vsel %vm553_vm1, %v555_v46, %v557_v2 }
  0x20   : > { %429 = vmatpush.bf16.msra.mxu0 %v2524_v12  ;;  %v349_v41 = vor.u32 %v348_v32, %v2879_v27  ;;  %v670_v47 = vor.u32 %v669_v36, %v668_v35  ;;  %v2558_v58 = vld [vmem:[%s3396_s1 + $0x170] sm:$0xff]  ;;  %v2549_v62 = vld [vmem:[%s3396_s1 + $0x128] sm:$0xff]  ;;  %v2548_v4 = vld [vmem:[%s3396_s1 + $0x120] sm:$0xff]  ;;  %s2652_s13 = scalar_lea.hbm %s2651_s9, 2 }
  0x21   : > { %510 = vmatpush.bf16.msra.mxu1 %v2516_v13  ;;  %v2557_v63 = vld [vmem:[%s3396_s1 + $0x168] sm:$0xff]  ;;  %v677_v3 = vor.u32 %v676_v61, %v675_v60  ;;  %v2556_v5 = vld [vmem:[%s3396_s1 + $0x160] sm:$0xff]  ;;  %v362_v6 = vsel %vm342_vm0, %v357_v0, %v361_v1  ;;  %v2970_v7 = vld [vmem:[%s2843_s22 + $0x18] sm:$0xff]  ;;  %s272_s22 = scalar_lea.vmem [#allocation2], %s2063_s16  ;;  %p2653_p11 = scmp.ne.s32.totalorder %s2651_s9, %s2652_s13 }
  0x22   : > { %616 = vmatpush.bf16.msra.mxu2 %v2532_v14  ;;  %v354_v49 = vsel %vm342_vm0, %v349_v41, %v353_v42  ;;  %v674_v51 = vsel %vm667_vm2, %v670_v47, %v673_v48  ;;  %v2547_v10 = vld [vmem:[%s3396_s1 + $0x118] sm:$0xff]  ;;  %v2979_v11 = vshll.u32 %v2970_v7, 16  ;;  %v2982_v12 = vshrl.u32 %v2970_v7, 16  ;;  %v2566_v14 = vld [vmem:[%s3396_s1 + $0x1b0] sm:$0xff]  ;;  %v2560_v47 = vld [vmem:[%s3396_s1 + $0x180] sm:$0xff]  ;;  %s1994_s23 = sshll.u32 %s272_s22, 4  ;;  %s1995_s23 = int_to_ptr.vmem [resolvable:$true] %s1994_s23 }
  0x23   : > { %738 = vmatpush.bf16.msra.mxu3 %v2540_v15  ;;  %v678_v9 = vsel %vm667_vm2, %v673_v48, %v677_v3  ;;  %v2555_v13 = vld [vmem:[%s3396_s1 + $0x158] sm:$0xff]  ;;  %v2546_v15 = vld [vmem:[%s3396_s1 + $0x110] sm:$0xff]  ;;  %v907_v41 = vrot.slane %v2885_v29, 2  ;;  %v908_v42 = vrot.slane %v2882_v28, 3  ;;  %v2561_v29 = vld [vmem:[%s3396_s1 + $0x188] sm:$0xff]  ;;  %p2654_p12 = pnand %p2653_p11, %p2781_p5  ;;  %s2656_s16 = scalar_lea.hbm %s3402_s7, 4 }
  0x24   : > { %430 = vmatpush.bf16.msra.mxu0 %v2523_v16  ;;  %v2554_v16 = vld [vmem:[%s3396_s1 + $0x150] sm:$0xff]  ;;  %v2563_v35 = vld [vmem:[%s3396_s1 + $0x198] sm:$0xff]  ;;  %v915_v61 = vrot.slane %v2982_v12, 2  ;;  %p2658_p1 = scmp.lt.s32.totalorder %s2656_s16, %s2652_s13 }
  0x25   : > { %511 = vmatpush.bf16.msra.mxu1 %v2515_v17  ;;  %v2565_v17 = vld [vmem:[%s3396_s1 + $0x1a8] sm:$0xff]  ;;  %v2562_v45 = vld [vmem:[%s3396_s1 + $0x190] sm:$0xff]  ;;  %p2655_p13 = pneg %p2654_p12 }
  0x26   : > { %617 = vmatpush.bf16.msra.mxu2 %v2531_v19  ;;  %v679_v19 = vrot.slane %v2982_v12, 1  ;;  %p2659_p2 = por %p2658_p1, %p2657_p0 }
  0x27   : > { %739 = vmatpush.bf16.msra.mxu3 %v2539_v20  ;;  %v680_v20 = vrot.slane %v2979_v11, 2 }
  0x28   : > { %431 = vmatpush.bf16.msra.mxu0 %v2522_v22  ;;  %v2545_v22 = vld [vmem:[%s3396_s1 + $0x108] sm:$0xff]  ;;  %p2660_p3 = pnand %p2659_p2, %p2655_p13 }
  0x29   : > { %512 = vmatpush.bf16.msra.mxu1 %v2514_v23  ;;  %v2553_v23 = vld [vmem:[%s3396_s1 + $0x148] sm:$0xff]  ;;  %v681_v32 = vor.u32 %v680_v20, %v679_v19 }
  0x2a   : > { %618 = vmatpush.bf16.msra.mxu2 %v2530_v25  ;;  %v2564_v25 = vld [vmem:[%s3396_s1 + $0x1a0] sm:$0xff] }
  0x2b   : > { %740 = vmatpush.bf16.msra.mxu3 %v2538_v26  ;;  %v365_v26 = vor.u32 %v2937_v56, %v361_v1  ;;  %v682_v38 = vsel %vm667_vm2, %v677_v3, %v681_v32  ;;  %v1026_v1 = vrot.slane %v2852_v18, 3 }
  0x2c   : > { %432 = vmatpush.bf16.msra.mxu0 %v2521_v30  ;;  %v369_v30 = vrot.slane %v2979_v11, 1 }
  0x2d   : > { %513 = vmatpush.bf16.msra.mxu1 %v2513_v31  ;;  %v559_v31 = vrot.slane %v2970_v7, 1 }
  0x2e   : > { %619 = vmatpush.bf16.msra.mxu2 %v2529_v33  ;;  %v2544_v33 = vld [vmem:[%s3396_s1 + $0x100] sm:$0xff]  ;;  %v370_v36 = vsel %vm342_vm0, %v365_v26, %v369_v30  ;;  %v373_v48 = vor.u32 %v2982_v12, %v369_v30 }
  0x2f   : > { %741 = vmatpush.bf16.msra.mxu3 %v2537_v34  ;;  %v2552_v34 = vld [vmem:[%s3396_s1 + $0x140] sm:$0xff]  ;;  %v560_v37 = vsel %vm553_vm1, %v557_v2, %v559_v31 }
  0x30   : > { %433 = vmatpush.bf16.msra.mxu0 %v2520_v39  ;;  %v904_v39 = vrot.slane %v2879_v27, 2  ;;  %v793_v27 = vrot.slane %v2924_v52, 2 }
  0x31   : > { %514 = vmatpush.bf16.msra.mxu1 %v2512_v40  ;;  %v905_v40 = vrot.slane %v2870_v24, 3  ;;  %v791_v24 = vrot.slane %v2861_v21, 2 }
  0x32   : > { %620 = vmatpush.bf16.msra.mxu2 %v2528_v43 }
  0x33   : > { %742 = vmatpush.bf16.msra.mxu3 %v2536_v44  ;;  %434 = vmatmul.bf16.vlgmr.msra.gmra.mxu0 %v354_v49  ;;  %v906_v43 = vor.u32 %v905_v40, %v904_v39  ;;  %v909_v44 = vor.u32 %v908_v42, %v907_v41  ;;  %v794_v46 = vsel %vm789_vm4, %v791_v24, %v793_v27  ;;  %v911_v49 = vrot.slane %v2937_v56, 2 }
  0x34   : > { %515 = vmatmul.bf16.vlgmr.msra.gmra.mxu1 %v2852_v18  ;;  %849 = vmatpush.bf16.msrb.mxu0 %v2551_v53  ;;  %v795_v53 = vrot.slane %v2970_v7, 2  ;;  %v1027_v56 = vrot.slane %v2861_v21, 3 }
  0x35   : > { %621 = vmatmul.bf16.vlgmr.msra.gmra.mxu2 %v556_v50  ;;  %971 = vmatpush.bf16.msrb.mxu1 %v2559_v54  ;;  %v910_v28 = vsel %vm903_vm3, %v906_v43, %v909_v44  ;;  %v912_v50 = vrot.slane %v2934_v55, 3  ;;  %v1029_v55 = vrot.slane %v2924_v52, 3 }
  0x36   : > { %743 = vmatmul.bf16.vlgmr.msra.gmra.mxu3 %v674_v51  ;;  %2582 = vmatpush.bf16.msrb.mxu2 %v2948_v59 }
  0x37   : > { %v913_v51 = vor.u32 %v912_v50, %v911_v49  ;;  %v1030_v60 = vsel %vm1025_vm5, %v1027_v56, %v1029_v55 }
  0x38   : > { %850 = vmatpush.bf16.msrb.mxu0 %v2550_v57  ;;  %v796_v57 = vsel %vm789_vm4, %v793_v27, %v795_v53 }
  0x39   : > { %972 = vmatpush.bf16.msrb.mxu1 %v2558_v58  ;;  %v914_v54 = vsel %vm903_vm3, %v909_v44, %v913_v51  ;;  %v790_v58 = vrot.slane %v2852_v18, 2 }
  0x3a   : > { %2583 = vmatpush.bf16.msrb.mxu2 %v2566_v14 }
  0x3c   : > { %851 = vmatpush.bf16.msrb.mxu0 %v2549_v62  ;;  %v916_v62 = vrot.slane %v2979_v11, 3 }
  0x3d   : > { %973 = vmatpush.bf16.msrb.mxu1 %v2557_v63 }
  0x3e   : > { %2584 = vmatpush.bf16.msrb.mxu2 %v2565_v17  ;;  %v917_v63 = vor.u32 %v916_v62, %v915_v61 }
  0x40   : > { %852 = vmatpush.bf16.msrb.mxu0 %v2548_v4  ;;  %v918_v0 = vsel %vm903_vm3, %v913_v51, %v917_v63  ;;  %v1028_v4 = vsel %vm1025_vm5, %v1026_v1, %v1027_v56 }
  0x41   : > { %974 = vmatpush.bf16.msrb.mxu1 %v2556_v5 }
  0x42   : > { %2585 = vmatpush.bf16.msrb.mxu2 %v2564_v25 }
  0x43   : > { %439 = vmatmul.bf16.gmra.mxu0 %v362_v6 }
  0x44   : > { %520 = vmatmul.bf16.gmra.mxu1 %v2861_v21  ;;  %853 = vmatpush.bf16.msrb.mxu0 %v2547_v10  ;;  %v1031_v21 = vrot.slane %v2970_v7, 3 }
  0x45   : > { %626 = vmatmul.bf16.gmra.mxu2 %v558_v8  ;;  %975 = vmatpush.bf16.msrb.mxu1 %v2555_v13 }
  0x46   : > { %748 = vmatmul.bf16.gmra.mxu3 %v678_v9  ;;  %2586 = vmatpush.bf16.msrb.mxu2 %v2563_v35 }
  0x48   : > { %854 = vmatpush.bf16.msrb.mxu0 %v2546_v15 }
  0x49   : > { %976 = vmatpush.bf16.msrb.mxu1 %v2554_v16 }
  0x4a   : > { %2587 = vmatpush.bf16.msrb.mxu2 %v2562_v45 }
  0x4c   : > { %855 = vmatpush.bf16.msrb.mxu0 %v2545_v22 }
  0x4d   : > { %977 = vmatpush.bf16.msrb.mxu1 %v2553_v23 }
  0x4e   : > { %2588 = vmatpush.bf16.msrb.mxu2 %v2561_v29 }
  0x50   : > { %856 = vmatpush.bf16.msrb.mxu0 %v2544_v33 }
  0x51   : > { %978 = vmatpush.bf16.msrb.mxu1 %v2552_v34 }
  0x52   : > { %2589 = vmatpush.bf16.msrb.mxu2 %v2560_v47 }
  0x53   : > { %444 = vmatmul.bf16.gmra.mxu0 %v370_v36 }
  0x54   : > { %525 = vmatmul.bf16.gmra.mxu1 %v2924_v52  ;;  %1085 = vmatpush.bf16.msra.mxu0 %v2948_v59  ;;  %v792_v59 = vsel %vm789_vm4, %v790_v58, %v791_v24  ;;  %v1032_v52 = vsel %vm1025_vm5, %v1029_v55, %v1031_v21 }
  0x55   : > { %631 = vmatmul.bf16.gmra.mxu2 %v560_v37 }
  0x56   : > { %753 = vmatmul.bf16.gmra.mxu3 %v682_v38 }
  0x58   : > { %1086 = vmatpush.bf16.msra.mxu0 %v2566_v14 }
  0x5c   : > { %1087 = vmatpush.bf16.msra.mxu0 %v2565_v17 }
  0x60   : > { %1088 = vmatpush.bf16.msra.mxu0 %v2564_v25 }
  0x63   : > { %449 = vmatmul.bf16.gmra.mxu0 %v373_v48 }
  0x64   : > { %530 = vmatmul.bf16.gmra.mxu1 %v2970_v7  ;;  %1089 = vmatpush.bf16.msra.mxu0 %v2563_v35 }
  0x65   : > { %636 = vmatmul.bf16.gmra.mxu2 %v559_v31 }
  0x66   : > { %758 = vmatmul.bf16.gmra.mxu3 %v681_v32 }
  0x68   : > { %1090 = vmatpush.bf16.msra.mxu0 %v2562_v45 }
  0x6c   : > { %1091 = vmatpush.bf16.msra.mxu0 %v2561_v29 }
  0x70   : > { %1092 = vmatpush.bf16.msra.mxu0 %v2560_v47 }
  0x73   : > { %857 = vmatmul.bf16.vlgmr.msrb.gmra.mxu0 %v792_v59 }
  0x74   : > { %979 = vmatmul.bf16.vlgmr.msrb.gmra.mxu1 %v910_v28 }
  0x75   : > { %1098 = vmatmul.bf16.vlgmr.msrb.gmra.mxu2 %v1030_v60 }
  0x83   : > { %862 = vmatmul.bf16.gmra.mxu0 %v794_v46 }
  0x84   : > { %984 = vmatmul.bf16.gmra.mxu1 %v914_v54  ;;  %v3092_v54 = vld [vmem:[%s3397_s2] ss:$0 sm:$0xff] }
  0x85   : > { %1103 = vmatmul.bf16.gmra.mxu2 %v1032_v52  ;;  %v2569_v52 = vld [vmem:[%s3398_s3 + $0x8] sm:$0xff] }
  0x86   : > { %1230 = vmatpush.bf16.msrb.mxu3 %v2569_v52 }
  0x93   : > { %867 = vmatmul.bf16.gmra.mxu0 %v796_v57 }
  0x94   : > { %989 = vmatmul.bf16.gmra.mxu1 %v918_v0 }
  0x95   : > { %1108 = vmatmul.bf16.gmra.mxu2 %v1031_v21 }
  0xa3   : > { %872 = vmatmul.bf16.gmra.mxu0 %v795_v53 }
  0xa4   : > { %994 = vmatmul.bf16.gmra.mxu1 %v917_v63 }
  0xb0   : > { %v435_v2 = vpop.f32.mrf.mxu0 }
  0xb1   : > { %v516_v3 = vpop.f32.mrf.mxu1 }
  0xb2   : > { %v517_v5 = vadd.f32 %v516_v3, %v435_v2 }
  0xb3   : > { %1093 = vmatmul.bf16.vlgmr.msra.gmra.mxu0 %v1028_v4 }
  0xb8   : > { %v622_v6 = vpop.f32.mrf.mxu2  ;;  %v3063_v8 = vpop.f32.mrf.mxu0 }
  0xb9   : > { %v642_v7 = vadd.f32 %v622_v6, %v517_v5  ;;  %v3065_v9 = vpop.f32.mrf.mxu1  ;;  %v744_v26 = vpop.f32.mrf.mxu3 }
  0xbb   : > { %v764_v38 = vadd.f32 %v744_v26, %v642_v7 }
  0xc0   : > { %v3067_v10 = vpop.f32.mrf.mxu2  ;;  %v440_v11 = vpop.f32.mrf.mxu0 }
  0xc1   : > { %v521_v12 = vpop.f32.mrf.mxu1  ;;  %v3071_v34 = vpop.f32.mrf.mxu3 }
  0xc2   : > { %v522_v13 = vadd.f32 %v521_v12, %v440_v11 }
  0xc8   : > { %v627_v14 = vpop.f32.mrf.mxu2  ;;  %v442_v15 = vpop.f32.mrf.mxu0 }
  0xc9   : > { %v523_v18 = vpop.f32.mrf.mxu1  ;;  %v749_v42 = vpop.f32.mrf.mxu3  ;;  %v644_v27 = vadd.f32 %v627_v14, %v522_v13 }
  0xca   : > { %v524_v48 = vadd.f32 %v523_v18, %v442_v15 }
  0xcb   : > { %v766_v29 = vadd.f32 %v749_v42, %v644_v27 }
  0xd0   : > { %v629_v16 = vpop.f32.mrf.mxu2  ;;  %v445_v17 = vpop.f32.mrf.mxu0 }
  0xd1   : > { %v526_v19 = vpop.f32.mrf.mxu1  ;;  %v751_v28 = vpop.f32.mrf.mxu3  ;;  %v645_v51 = vadd.f32 %v629_v16, %v524_v48 }
  0xd2   : > { %v527_v20 = vadd.f32 %v526_v19, %v445_v17 }
  0xd3   : > { %v767_v56 = vadd.f32 %v751_v28, %v645_v51 }
  0xd8   : > { %v632_v22 = vpop.f32.mrf.mxu2  ;;  %v447_v23 = vpop.f32.mrf.mxu0 }
  0xd9   : > { %v528_v25 = vpop.f32.mrf.mxu1  ;;  %v754_v57 = vpop.f32.mrf.mxu3  ;;  %v646_v62 = vadd.f32 %v632_v22, %v527_v20 }
  0xda   : > { %v529_v11 = vadd.f32 %v528_v25, %v447_v23 }
  0xdb   : > { %v768_v2 = vadd.f32 %v754_v57, %v646_v62 }
  0xe0   : > { %v634_v30 = vpop.f32.mrf.mxu2  ;;  %v450_v31 = vpop.f32.mrf.mxu0 }
  0xe1   : > { %v531_v32 = vpop.f32.mrf.mxu1  ;;  %v756_v3 = vpop.f32.mrf.mxu3  ;;  %v647_v15 = vadd.f32 %v634_v30, %v529_v11 }
  0xe2   : > { %v3069_v33 = vadd.f32 %v531_v32, %v450_v31  ;;  %v2573_v31 = vld [vmem:[%s3398_s3 + $0x28] sm:$0xff] }
  0xe3   : > { %v769_v23 = vadd.f32 %v756_v3, %v647_v15  ;;  %1454 = vmatpush.bf16.msra.mxu1 %v2573_v31 }
  0xe8   : > { %v3073_v35 = vpop.f32.mrf.mxu2  ;;  %v3075_v36 = vpop.f32.mrf.mxu0 }
  0xe9   : > { %v3077_v37 = vpop.f32.mrf.mxu1  ;;  %v759_v42 = vpop.f32.mrf.mxu3 }
  0xf0   : > { %v3079_v39 = vpop.f32.mrf.mxu2  ;;  %v858_v40 = vpop.f32.mrf.mxu0 }
  0xf1   : > { %v3081_v41 = vpop.f32.mrf.mxu1  ;;  %v3083_v43 = vadd.f32 %v858_v40, %v764_v38 }
  0xf8   : > { %v1099_v44 = vpop.f32.mrf.mxu2  ;;  %v3085_v45 = vpop.f32.mrf.mxu0 }
  0xf9   : > { %v3087_v24 = vpop.f32.mrf.mxu1 }
 0x100   : > { %v863_v46 = vpop.f32.mrf.mxu0  ;;  %v1101_v50 = vpop.f32.mrf.mxu2 }
 0x101   : > { %v985_v47 = vpop.f32.mrf.mxu1  ;;  %v880_v49 = vadd.f32 %v863_v46, %v766_v29  ;;  %v2568_v46 = vld [vmem:[%s3398_s3] sm:$0xff] }
 0x102   : > { %1231 = vmatpush.bf16.msrb.mxu3 %v2568_v46 }
 0x103   : > { %v1002_v53 = vadd.f32 %v985_v47, %v880_v49 }
 0x105   : > { %v1116_v58 = vadd.f32 %v1099_v44, %v1002_v53  ;;  %v648_v44 = vadd.f32 %v3073_v35, %v3069_v33  ;;  %v534_v35 = vadd.f32 %v3077_v37, %v3075_v36  ;;  %v2572_v36 = vld [vmem:[%s3398_s3 + $0x20] sm:$0xff] }
 0x106   : > { %1455 = vmatpush.bf16.msra.mxu1 %v2572_v36 }
 0x107   : > { %v3095_v55 = vadd.f32 %v3092_v54, %v1116_v58  ;;  %v770_v47 = vadd.f32 %v759_v42, %v648_v44 }
 0x108   : > { %v865_v59 = vpop.f32.mrf.mxu0  ;;  %v1104_v21 = vpop.f32.mrf.mxu2 }
 0x109   : > { %v987_v60 = vpop.f32.mrf.mxu1  ;;  %v881_v61 = vadd.f32 %v865_v59, %v767_v56  ;;  %v1144_v63 = vmul.f32 0.1, %v3095_v55  ;;  %vm1136_vm6 = vcmp.ge.f32.partialorder %v3095_v55, 0.0  ;;  %v649_v56 = vadd.f32 %v3079_v39, %v534_v35 }
 0x10b   : > { %v1003_v0 = vadd.f32 %v987_v60, %v881_v61  ;;  %v1152_v4 = vsel %vm1136_vm6, %v3095_v55, %v1144_v63  ;;  %v761_v61 = vpop.f32.mrf.mxu3 }
 0x10c   : > { %v1160_v14 = vpack.c.bf16 %v1152_v4, %v1152_v4 }
 0x10d   : > { %v1117_v1 = vadd.f32 %v1101_v50, %v1003_v0  ;;  %v2571_v0 = vld [vmem:[%s3398_s3 + $0x18] sm:$0xff] }
 0x10e   : > { %v1190_v22 = vunpack.c.l.b16 %v1160_v14  ;;  %1353 = vmatpush.bf16.msrb.mxu0 %v2571_v0 }
 0x10f   : > { %v3104_v5 = vadd.f32 %v3092_v54, %v1117_v1  ;;  %v771_v1 = vadd.f32 %v761_v61, %v649_v56 }
 0x110   : > { %v868_v6 = vpop.f32.mrf.mxu0  ;;  %v1106_v20 = vpop.f32.mrf.mxu2 }
 0x111   : > { %v990_v7 = vpop.f32.mrf.mxu1  ;;  %vm1137_vm7 = vcmp.ge.f32.partialorder %v3104_v5, 0.0  ;;  %v1145_v12 = vmul.f32 0.1, %v3104_v5  ;;  %v882_v13 = vadd.f32 %v868_v6, %v768_v2 }
 0x113   : > { %v1153_v18 = vsel %vm1137_vm7, %v3104_v5, %v1145_v12  ;;  %v1004_v16 = vadd.f32 %v990_v7, %v882_v13  ;;  %v2570_v13 = vld [vmem:[%s3398_s3 + $0x10] sm:$0xff] }
 0x114   : > { %v1161_v17 = vpack.c.bf16 %v1153_v18, %v1153_v18  ;;  %1354 = vmatpush.bf16.msrb.mxu0 %v2570_v13 }
 0x115   : > { %v1118_v19 = vadd.f32 %v1104_v21, %v1004_v16 }
 0x116   : > { %v1191_v26 = vunpack.c.l.b16 %v1161_v17 }
 0x117   : > { %v3113_v25 = vadd.f32 %v3092_v54, %v1118_v19 }
 0x118   : > { %v3115_v32 = vpack.c.b16 %v1191_v26, %v1190_v22  ;;  %v870_v38 = vpop.f32.mrf.mxu0  ;;  %v1109_v50 = vpop.f32.mrf.mxu2 }
 0x119   : > { %v992_v30 = vpop.f32.mrf.mxu1  ;;  %v883_v40 = vadd.f32 %v870_v38, %v769_v23  ;;  %v1146_v27 = vmul.f32 0.1, %v3113_v25  ;;  %vm1138_vm8 = vcmp.ge.f32.partialorder %v3113_v25, 0.0 }
 0x11a   : > { %v1299_v37 = vshrl.u32 %v3115_v32, 16  ;;  %v1302_v39 = vshll.u32 %v3115_v32, 16  ;;  %v1418_v7 = vrot.slane %v3115_v32, 3 }
 0x11b   : > { %v1005_v28 = vadd.f32 %v992_v30, %v883_v40  ;;  %v1154_v48 = vsel %vm1138_vm8, %v3113_v25, %v1146_v27 }
 0x11c   : > { %v1162_v58 = vpack.c.bf16 %v1154_v48, %v1154_v48  ;;  %v1301_v14 = vrot.slane %v1299_v37, 1  ;;  %v1304_v18 = vrot.slane %v1302_v39, 2 }
 0x11d   : > { %v1119_v29 = vadd.f32 %v1106_v20, %v1005_v28  ;;  %v519_v20 = vadd.f32 %v3065_v9, %v3063_v8  ;;  %v1000_v8 = vadd.f32 %v3081_v41, %v3083_v43 }
 0x11e   : > { %v1192_v21 = vunpack.c.l.b16 %v1162_v58  ;;  %v1305_v44 = vor.u32 %v1304_v18, %v1301_v14 }
 0x11f   : > { %v3126_v49 = vadd.f32 %v3092_v54, %v1119_v29  ;;  %v643_v40 = vadd.f32 %v3067_v10, %v519_v20 }
 0x120   : > { %v873_v51 = vpop.f32.mrf.mxu0  ;;  %v1111_v15 = vpop.f32.mrf.mxu2 }
 0x121   : > { %v995_v33 = vpop.f32.mrf.mxu1  ;;  %vm1139_vm9 = vcmp.ge.f32.partialorder %v3126_v49, 0.0  ;;  %v1147_v53 = vmul.f32 0.1, %v3126_v49  ;;  %v884_v57 = vadd.f32 %v873_v51, %v770_v47  ;;  %v765_v48 = vadd.f32 %v3071_v34, %v643_v40  ;;  %v2577_v40 = vld [vmem:[%s3398_s3 + $0x48] sm:$0xff] }
 0x122   : > { %1720 = vmatpush.bf16.msra.mxu3 %v2577_v40 }
 0x123   : > { %v1155_v59 = vsel %vm1139_vm9, %v3126_v49, %v1147_v53  ;;  %v1006_v60 = vadd.f32 %v995_v33, %v884_v57  ;;  %v879_v35 = vadd.f32 %v3085_v45, %v765_v48 }
 0x124   : > { %v1163_v62 = vpack.c.bf16 %v1155_v59, %v1155_v59 }
 0x125   : > { %v1120_v63 = vadd.f32 %v1109_v50, %v1006_v60  ;;  %v1001_v60 = vadd.f32 %v3087_v24, %v879_v35 }
 0x126   : > { %v1193_v52 = vunpack.c.l.b16 %v1163_v62 }
 0x127   : > { %v3143_v2 = vadd.f32 %v3092_v54, %v1120_v63 }
 0x128   : > { %v3145_v3 = vpack.c.b16 %v1193_v52, %v1192_v21  ;;  %v875_v4 = vpop.f32.mrf.mxu0 }
 0x129   : > { %v997_v6 = vpop.f32.mrf.mxu1  ;;  %vm1140_vm10 = vcmp.ge.f32.partialorder %v3143_v2, 0.0  ;;  %v1148_v11 = vmul.f32 0.1, %v3143_v2  ;;  %v885_v12 = vadd.f32 %v875_v4, %v771_v1 }
 0x12a   : > { %v1420_v16 = vrot.slane %v3145_v3, 3  ;;  %v1307_v17 = vshrl.u32 %v3145_v3, 16  ;;  %v1310_v19 = vshll.u32 %v3145_v3, 16 }
 0x12b   : > { %v1007_v22 = vadd.f32 %v997_v6, %v885_v12  ;;  %v1156_v26 = vsel %vm1140_vm10, %v3143_v2, %v1148_v11 }
 0x12c   : > { %v1421_v31 = vsel %vm1025_vm5, %v1418_v7, %v1420_v16  ;;  %v1309_v23 = vrot.slane %v1307_v17, 1  ;;  %v1312_v38 = vrot.slane %v1310_v19, 2  ;;  %v1164_v30 = vpack.c.bf16 %v1156_v26, %v1156_v26 }
 0x12d   : > { %v1121_v42 = vadd.f32 %v1111_v15, %v1007_v22 }
 0x12e   : > { %v1313_v27 = vor.u32 %v1312_v38, %v1309_v23  ;;  %v1194_v28 = vunpack.c.l.b16 %v1164_v30 }
 0x12f   : > { %v1133_v9 = vadd.f32 %v3092_v54, %v1121_v42 }
 0x130   : > { %v1094_v29 = vpop.f32.mrf.mxu0  ;;  %v1314_v46 = vsel %vm667_vm2, %v1305_v44, %v1313_v27  ;;  %v1198_v47 = vpack.c.b16 %v1194_v28, %v1194_v28 }
 0x131   : > { %vm1141_vm11 = vcmp.ge.f32.partialorder %v1133_v9, 0.0  ;;  %v1149_v50 = vmul.f32 0.1, %v1133_v9  ;;  %v1114_v51 = vadd.f32 %v1094_v29, %v1000_v8  ;;  %v2575_v29 = vld [vmem:[%s3398_s3 + $0x38] sm:$0xff] }
 0x132   : > { %v1315_v33 = vshrl.u32 %v1198_v47, 16  ;;  %v1318_v10 = vshll.u32 %v1198_v47, 16  ;;  %1631 = vmatpush.bf16.msra.mxu2 %v2575_v29 }
 0x133   : > { %v1157_v53 = vsel %vm1141_vm11, %v1133_v9, %v1149_v50  ;;  %v1126_v57 = vadd.f32 %v3092_v54, %v1114_v51 }
 0x134   : > { %v1165_v58 = vpack.c.bf16 %v1157_v53, %v1157_v53  ;;  %v1317_v41 = vrot.slane %v1315_v33, 1  ;;  %v1320_v43 = vrot.slane %v1318_v10, 2  ;;  %v2574_v53 = vld [vmem:[%s3398_s3 + $0x30] sm:$0xff] }
 0x135   : > { %v1142_v61 = vmul.f32 0.1, %v1126_v57  ;;  %vm1134_vm12 = vcmp.ge.f32.partialorder %v1126_v57, 0.0 }
 0x136   : > { %v1415_v56 = vunpack.c.l.b16 %v1165_v58  ;;  %v1321_v59 = vor.u32 %v1320_v43, %v1317_v41  ;;  %1632 = vmatpush.bf16.msra.mxu2 %v2574_v53 }
 0x137   : > { %v1150_v37 = vsel %vm1134_vm12, %v1126_v57, %v1142_v61  ;;  %vm1914_vm12 = vcmask 375808  }
 0x138   : > { %v1096_v34 = vpop.f32.mrf.mxu0  ;;  %v1416_v62 = vpack.c.b16 %v1415_v56, %v1194_v28  ;;  %v1322_v63 = vsel %vm667_vm2, %v1313_v27, %v1321_v59  ;;  %v1158_v39 = vpack.c.bf16 %v1150_v37, %v1150_v37 }
 0x139   : > { %v1115_v0 = vadd.f32 %v1096_v34, %v1001_v60 }
 0x13a   : > { %v1422_v36 = vrot.slane %v1416_v62, 3  ;;  %v1188_v6 = vunpack.c.l.b16 %v1158_v39 }
 0x13b   : > { %v1127_v45 = vadd.f32 %v3092_v54, %v1115_v0 }
 0x13c   : > { %v1423_v21 = vsel %vm1025_vm5, %v1420_v16, %v1422_v36 }
 0x13d   : > { %vm1135_vm13 = vcmp.ge.f32.partialorder %v1127_v45, 0.0  ;;  %v1143_v52 = vmul.f32 0.1, %v1127_v45 }
 0x13f   : > { %v1151_v1 = vsel %vm1135_vm13, %v1127_v45, %v1143_v52 }
 0x140   : > { %v1159_v4 = vpack.c.bf16 %v1151_v1, %v1151_v1 }
 0x142   : > { %v1189_v24 = vunpack.c.l.b16 %v1159_v4 }
 0x144   : > { %v1195_v11 = vpack.c.b16 %v1189_v24, %v1188_v6 }
 0x146   : > { %2410 = vmatmul.msk.bf16.vlgmr.msrb.gmra.mxu3 %vm1211_vm14, %v1195_v11  ;;  %v1417_v12 = vrot.slane %v1195_v11, 3  ;;  %v1292_v13 = vshrl.u32 %v1195_v11, 16  ;;  %v1295_v14 = vshll.u32 %v1195_v11, 16 }
 0x148   : > { %v1419_v54 = vsel %vm1025_vm5, %v1417_v12, %v1418_v7  ;;  %v1294_v15 = vrot.slane %v1292_v13, 1  ;;  %v1297_v18 = vrot.slane %v1295_v14, 2 }
 0x149   : > { %2442 = vmatmul.msk.bf16.vlgmr.msra.gmra.mxu1 %vm1211_vm14, %v1419_v54 }
 0x14a   : > { %v1298_v16 = vor.u32 %v1297_v18, %v1294_v15 }
 0x14c   : > { %v1306_v17 = vsel %vm667_vm2, %v1298_v16, %v1305_v44 }
 0x14d   : > { %2426 = vmatmul.msk.bf16.vlgmr.msrb.gmra.mxu0 %vm1211_vm14, %v1306_v17 }
 0x156   : > { %2411 = vmatmul.msk.bf16.gmra.mxu3 %vm1211_vm14, %v3115_v32  ;;  %v3195_v32 = vld [vmem:[%s3399_s4] ss:$0 sm:$0xff] }
 0x157   : > { %v1170_v20 = vadd.f32 %v3195_v32, %v1126_v57  ;;  %v1171_v8 = vadd.f32 %v3195_v32, %v1127_v45  ;;  %v1172_v61 = vadd.f32 %v3195_v32, %v3095_v55  ;;  %v1173_v54 = vadd.f32 %v3195_v32, %v3104_v5 }
 0x159   : > { %2443 = vmatmul.msk.bf16.gmra.mxu1 %vm1211_vm14, %v1421_v31 }
 0x15d   : > { %2427 = vmatmul.msk.bf16.gmra.mxu0 %vm1211_vm14, %v1314_v46  ;;  %v2576_v46 = vld [vmem:[%s3398_s3 + $0x40] sm:$0xff] }
 0x15e   : > { %1721 = vmatpush.bf16.msra.mxu3 %v2576_v46 }
 0x166   : > { %2412 = vmatmul.msk.bf16.gmra.mxu3 %vm1211_vm14, %v3145_v3 }
 0x169   : > { %2444 = vmatmul.msk.bf16.gmra.mxu1 %vm1211_vm14, %v1423_v21 }
 0x16d   : > { %2428 = vmatmul.msk.bf16.gmra.mxu0 %vm1211_vm14, %v1322_v63 }
 0x176   : > { %2413 = vmatmul.msk.bf16.gmra.mxu3 %vm1211_vm14, %v1198_v47 }
 0x179   : > { %2445 = vmatmul.msk.bf16.gmra.mxu1 %vm1211_vm14, %v1422_v36 }
 0x17d   : > { %2429 = vmatmul.msk.bf16.gmra.mxu0 %vm1211_vm14, %v1321_v59 }
 0x1c6   : > { %v1457_v7 = vpop.f32.mrf.mxu1 }
 0x1c7   : > { %v1483_v30 = vrot.slane %v1457_v7, 5 }
 0x1c9   : > { %v1233_v19 = vpop.f32.mrf.mxu3 }
 0x1ca   : > { %v1260_v3 = vrot.slane %v1233_v19, 5  ;;  %v1356_v22 = vpop.f32.mrf.mxu0 }
 0x1cb   : > { %v1382_v26 = vrot.slane %v1356_v22, 5 }
 0x1cc   : > { %v1280_v31 = vadd.f32 %v1260_v3, %v1170_v20 }
 0x1ce   : > { %v1402_v23 = vadd.f32 %v1382_v26, %v1280_v31  ;;  %v1459_v38 = vpop.f32.mrf.mxu1 }
 0x1cf   : > { %v1484_v47 = vrot.slane %v1459_v38, 5 }
 0x1d0   : > { %v3201_v42 = vadd.f32 %v1483_v30, %v1402_v23 }
 0x1d1   : > { %v1235_v44 = vpop.f32.mrf.mxu3  ;;  %v1485_v57 = vsel %vm1259_vm15, %v1483_v30, %v1484_v47 }
 0x1d2   : > { %v1261_v27 = vrot.slane %v1235_v44, 5  ;;  %v1358_v28 = vpop.f32.mrf.mxu0  ;;  %v1517_v50 = vmul.f32 0.1, %v3201_v42  ;;  %vm1510_vm1 = vcmp.ge.f32.partialorder %v3201_v42, 0.0 }
 0x1d3   : > { %v1383_v9 = vrot.slane %v1358_v28, 5 }
 0x1d4   : > { %v1262_v48 = vsel %vm1259_vm15, %v1260_v3, %v1261_v27  ;;  %v1524_v58 = vsel %vm1510_vm1, %v3201_v42, %v1517_v50 }
 0x1d5   : > { %v1281_v51 = vadd.f32 %v1262_v48, %v1171_v8  ;;  %v1384_v33 = vsel %vm1259_vm15, %v1382_v26, %v1383_v9  ;;  %v1531_v62 = vpack.c.bf16 %v1524_v58, %v1524_v58 }
 0x1d6   : > { %v1462_v10 = vpop.f32.mrf.mxu1 }
 0x1d7   : > { %v1403_v35 = vadd.f32 %v1384_v33, %v1281_v51  ;;  %v1486_v63 = vrot.slane %v1462_v10, 5  ;;  %v1562_v1 = vunpack.c.l.b16 %v1531_v62 }
 0x1d9   : > { %v3219_v41 = vadd.f32 %v1485_v57, %v1403_v35  ;;  %v1238_v43 = vpop.f32.mrf.mxu3  ;;  %v1487_v4 = vsel %vm1259_vm15, %v1484_v47, %v1486_v63 }
 0x1da   : > { %v1263_v56 = vrot.slane %v1238_v43, 5  ;;  %v1361_v59 = vpop.f32.mrf.mxu0 }
 0x1db   : > { %vm1511_vm3 = vcmp.ge.f32.partialorder %v3219_v41, 0.0  ;;  %v1518_v60 = vmul.f32 0.1, %v3219_v41  ;;  %v1385_v34 = vrot.slane %v1361_v59, 5 }
 0x1dc   : > { %v1264_v0 = vsel %vm1259_vm15, %v1261_v27, %v1263_v56  ;;  %v1174_v27 = vadd.f32 %v3195_v32, %v3113_v25  ;;  %v1175_v25 = vadd.f32 %v3195_v32, %v3126_v49 }
 0x1dd   : > { %v1525_v36 = vsel %vm1511_vm3, %v3219_v41, %v1518_v60  ;;  %v1282_v45 = vadd.f32 %v1264_v0, %v1172_v61  ;;  %v1386_v37 = vsel %vm1259_vm15, %v1383_v9, %v1385_v34 }
 0x1de   : > { %v1532_v21 = vpack.c.bf16 %v1525_v36, %v1525_v36  ;;  %v1464_v52 = vpop.f32.mrf.mxu1 }
 0x1df   : > { %v1404_v39 = vadd.f32 %v1386_v37, %v1282_v45  ;;  %v1488_v18 = vrot.slane %v1464_v52, 5 }
 0x1e0   : > { %v1563_v6 = vunpack.c.l.b16 %v1532_v21 }
 0x1e1   : > { %v3229_v24 = vadd.f32 %v1487_v4, %v1404_v39  ;;  %v1240_v55 = vpop.f32.mrf.mxu3  ;;  %v1489_v26 = vsel %vm1259_vm15, %v1486_v63, %v1488_v18 }
 0x1e2   : > { %v1265_v11 = vrot.slane %v1240_v55, 5  ;;  %v1363_v12 = vpop.f32.mrf.mxu0  ;;  %v1569_v13 = vpack.c.b16 %v1563_v6, %v1562_v1 }
 0x1e3   : > { %vm1512_vm6 = vcmp.ge.f32.partialorder %v3229_v24, 0.0  ;;  %v1519_v14 = vmul.f32 0.1, %v3229_v24  ;;  %v1387_v15 = vrot.slane %v1363_v12, 5 }
 0x1e4   : > { %v1266_v16 = vsel %vm1259_vm15, %v1263_v56, %v1265_v11  ;;  %v1574_v51 = vshrl.u32 %v1569_v13, 16  ;;  %v1577_v33 = vshll.u32 %v1569_v13, 16  ;;  %v1686_v43 = vrot.slane %v1569_v13, 3 }
 0x1e5   : > { %v1526_v17 = vsel %vm1512_vm6, %v3229_v24, %v1519_v14  ;;  %v1283_v7 = vadd.f32 %v1266_v16, %v1173_v54  ;;  %v1388_v19 = vsel %vm1259_vm15, %v1385_v34, %v1387_v15 }
 0x1e6   : > { %v1533_v20 = vpack.c.bf16 %v1526_v17, %v1526_v17  ;;  %v1467_v3 = vpop.f32.mrf.mxu1  ;;  %v1576_v61 = vrot.slane %v1574_v51, 1  ;;  %v1579_v34 = vrot.slane %v1577_v33, 2 }
 0x1e7   : > { %v1405_v22 = vadd.f32 %v1388_v19, %v1283_v7  ;;  %v1490_v8 = vrot.slane %v1467_v3, 5 }
 0x1e8   : > { %v1564_v31 = vunpack.c.l.b16 %v1533_v20  ;;  %v1580_v54 = vor.u32 %v1579_v34, %v1576_v61 }
 0x1e9   : > { %v3239_v23 = vadd.f32 %v1489_v26, %v1405_v22  ;;  %v1243_v38 = vpop.f32.mrf.mxu3  ;;  %v1491_v35 = vsel %vm1259_vm15, %v1488_v18, %v1490_v8 }
 0x1ea   : > { %v1267_v30 = vrot.slane %v1243_v38, 5  ;;  %v1366_v5 = vpop.f32.mrf.mxu0  ;;  %v3241_v40 = vpack.c.b16 %v1564_v31, %v1563_v6 }
 0x1eb   : > { %vm1513_vm7 = vcmp.ge.f32.partialorder %v3239_v23, 0.0  ;;  %v1520_v44 = vmul.f32 0.1, %v3239_v23  ;;  %v1389_v28 = vrot.slane %v1366_v5, 5 }
 0x1ec   : > { %v1268_v9 = vsel %vm1259_vm15, %v1265_v11, %v1267_v30  ;;  %v1780_v1 = vshll.u32 %v3241_v40, 16 }
 0x1ed   : > { %v1527_v29 = vsel %vm1513_vm7, %v3239_v23, %v1520_v44  ;;  %v1284_v46 = vadd.f32 %v1268_v9, %v1174_v27  ;;  %v1390_v47 = vsel %vm1259_vm15, %v1387_v15, %v1389_v28  ;;  %v1778_v27 = vshrl.u32 %v3241_v40, 16 }
 0x1ee   : > { %v1534_v48 = vpack.c.bf16 %v1527_v29, %v1527_v29  ;;  %v3250_v50 = vpop.f32.mrf.mxu1  ;;  %v1782_v22 = vrot.slane %v1780_v1, 1 }
 0x1ef   : > { %v1406_v10 = vadd.f32 %v1390_v47, %v1284_v46  ;;  %v1492_v63 = vrot.slane %v3250_v50, 5 }
 0x1f0   : > { %v1565_v53 = vunpack.c.l.b16 %v1534_v48  ;;  %v1783_v47 = vor.u32 %v1782_v22, %v1778_v27 }
 0x1f1   : > { %v3253_v57 = vadd.f32 %v1491_v35, %v1406_v10  ;;  %v1245_v58 = vpop.f32.mrf.mxu3  ;;  %v1493_v14 = vsel %vm1259_vm15, %v1490_v8, %v1492_v63 }
 0x1f2   : > { %v1269_v56 = vrot.slane %v1245_v58, 5  ;;  %v1368_v59 = vpop.f32.mrf.mxu0  ;;  %v3257_v60 = vpack.c.b16 %v1565_v53, %v1564_v31  ;;  %v1176_v31 = vadd.f32 %v3195_v32, %v3143_v2  ;;  %v2578_v32 = vld [vmem:[%s3398_s3 + $0x50] sm:$0xff] }
 0x1f3   : > { %v1521_v62 = vmul.f32 0.1, %v3253_v57  ;;  %v1391_v0 = vrot.slane %v1368_v59, 5  ;;  %vm1514_vm8 = vcmp.ge.f32.partialorder %v3253_v57, 0.0 }
 0x1f4   : > { %v1270_v36 = vsel %vm1259_vm15, %v1267_v30, %v1269_v56  ;;  %v1687_v45 = vrot.slane %v3257_v60, 3  ;;  %v1582_v49 = vshrl.u32 %v3257_v60, 16  ;;  %v1585_v37 = vshll.u32 %v3257_v60, 16  ;;  %v2579_v30 = vld [vmem:[%s3398_s3 + $0x58] sm:$0xff] }
 0x1f5   : > { %v1285_v21 = vadd.f32 %v1270_v36, %v1175_v25  ;;  %v1392_v52 = vsel %vm1259_vm15, %v1389_v28, %v1391_v0  ;;  %v1528_v39 = vsel %vm1514_vm8, %v3253_v57, %v1521_v62  ;;  %1827 = vmatpush.bf16.msrb.mxu2 %v2579_v30 }
 0x1f6   : > { %v1472_v4 = vpop.f32.mrf.mxu1  ;;  %v1688_v6 = vsel %vm1025_vm5, %v1686_v43, %v1687_v45  ;;  %v1584_v55 = vrot.slane %v1582_v49, 1  ;;  %v1587_v11 = vrot.slane %v1585_v37, 2  ;;  %v1535_v12 = vpack.c.bf16 %v1528_v39, %v1528_v39 }
 0x1f7   : > { %v1407_v13 = vadd.f32 %v1392_v52, %v1285_v21  ;;  %2474 = vmatmul.msk.bf16.vlgmr.msra.gmra.mxu3 %vm1211_vm14, %v1688_v6  ;;  %v1494_v5 = vrot.slane %v1472_v4, 5 }
 0x1f8   : > { %v1588_v15 = vor.u32 %v1587_v11, %v1584_v55  ;;  %v1566_v18 = vunpack.c.l.b16 %v1535_v12 }
 0x1f9   : > { %v3272_v16 = vadd.f32 %v1493_v14, %v1407_v13  ;;  %v1248_v17 = vpop.f32.mrf.mxu3  ;;  %v1495_v51 = vsel %vm1259_vm15, %v1492_v63, %v1494_v5  ;;  %1828 = vmatpush.bf16.msrb.mxu2 %v2578_v32 }
 0x1fa   : > { %v1271_v7 = vrot.slane %v1248_v17, 5  ;;  %v1371_v19 = vpop.f32.mrf.mxu0  ;;  %v1589_v20 = vsel %vm667_vm2, %v1580_v54, %v1588_v15  ;;  %v1775_v3 = vpack.c.b16 %v1566_v18, %v1565_v53 }
 0x1fb   : > { %v1522_v26 = vmul.f32 0.1, %v3272_v16  ;;  %v1393_v38 = vrot.slane %v1371_v19, 5  ;;  %2459 = vmatmul.msk.bf16.vlgmr.msra.gmra.mxu2 %vm1211_vm14, %v1589_v20  ;;  %vm1515_vm9 = vcmp.ge.f32.partialorder %v3272_v16, 0.0 }
 0x1fc   : > { %v1272_v44 = vsel %vm1259_vm15, %v1269_v56, %v1271_v7  ;;  %v1785_v28 = vshll.u32 %v1775_v3, 16  ;;  %v1789_v1 = vshrl.u32 %v1775_v3, 16 }
 0x1fd   : > { %v1286_v8 = vadd.f32 %v1272_v44, %v1176_v31  ;;  %v1394_v9 = vsel %vm1259_vm15, %v1391_v0, %v1393_v38  ;;  %v1529_v2 = vsel %vm1515_vm9, %v3272_v16, %v1522_v26 }
 0x1fe   : > { %v1474_v29 = vpop.f32.mrf.mxu1  ;;  %v1536_v46 = vpack.c.bf16 %v1529_v2, %v1529_v2  ;;  %v1787_v48 = vrot.slane %v1785_v28, 1 }
 0x1ff   : > { %v1408_v50 = vadd.f32 %v1394_v9, %v1286_v8 }
 0x200   : > { %v1567_v33 = vunpack.c.l.b16 %v1536_v46  ;;  %v1788_v40 = vsel %vm342_vm0, %v1783_v47, %v1787_v48  ;;  %v1791_v55 = vor.u32 %v1789_v1, %v1787_v48 }
 0x201   : > { %v3292_v10 = vadd.f32 %v1495_v51, %v1408_v50  ;;  %v1250_v35 = vpop.f32.mrf.mxu3 }
 0x202   : > { %v1373_v53 = vpop.f32.mrf.mxu0  ;;  %v1571_v25 = vpack.c.b16 %v1567_v33, %v1566_v18 }
 0x203   : > { %vm1516_vm10 = vcmp.ge.f32.partialorder %v3292_v10, 0.0  ;;  %v1523_v58 = vmul.f32 0.1, %v3292_v10 }
 0x204   : > { %v1689_v43 = vrot.slane %v1571_v25, 3  ;;  %v1591_v56 = vshrl.u32 %v1571_v25, 16  ;;  %v1594_v59 = vshll.u32 %v1571_v25, 16 }
 0x205   : > { %v1530_v60 = vsel %vm1516_vm10, %v3292_v10, %v1523_v58 }
 0x206   : > { %v1690_v61 = vsel %vm1025_vm5, %v1687_v45, %v1689_v43  ;;  %v1593_v34 = vrot.slane %v1591_v56, 1  ;;  %v1596_v62 = vrot.slane %v1594_v59, 2  ;;  %v1537_v63 = vpack.c.bf16 %v1530_v60, %v1530_v60 }
 0x207   : > { %2475 = vmatmul.msk.bf16.gmra.mxu3 %vm1211_vm14, %v1690_v61 }
 0x208   : > { %v1597_v0 = vor.u32 %v1596_v62, %v1593_v34  ;;  %v1568_v36 = vunpack.c.l.b16 %v1537_v63 }
 0x20a   : > { %v1598_v49 = vsel %vm667_vm2, %v1588_v15, %v1597_v0  ;;  %v1572_v37 = vpack.c.b16 %v1568_v36, %v1568_v36  ;;  %v1776_v21 = vpack.c.b16 %v1568_v36, %v1567_v33  ;;  %v3312_v15 = vld [vmem:[%s3399_s4 + $0x1] ss:$0 sm:$0xff] }
 0x20b   : > { %2460 = vmatmul.msk.bf16.gmra.mxu2 %vm1211_vm14, %v1598_v49  ;;  %v1543_v17 = vadd.f32 %v3312_v15, %v3201_v42  ;;  %v1544_v22 = vadd.f32 %v3312_v15, %v3219_v41  ;;  %v1545_v5 = vadd.f32 %v3312_v15, %v3229_v24  ;;  %v1546_v8 = vadd.f32 %v3312_v15, %v3239_v23 }
 0x20c   : > { %v1691_v52 = vrot.slane %v1572_v37, 3  ;;  %v1600_v39 = vshll.u32 %v1572_v37, 16  ;;  %v1793_v4 = vshll.u32 %v1776_v21, 16  ;;  %v1797_v14 = vshrl.u32 %v1776_v21, 16 }
 0x20e   : > { %v1692_v6 = vsel %vm1025_vm5, %v1689_v43, %v1691_v52  ;;  %v1602_v45 = vrot.slane %v1600_v39, 2  ;;  %v1795_v11 = vrot.slane %v1793_v4, 1 }
 0x210   : > { %v1603_v12 = vsel %vm667_vm2, %v1597_v0, %v1602_v45  ;;  %v1796_v13 = vsel %vm342_vm0, %v1791_v55, %v1795_v11  ;;  %v1799_v54 = vor.u32 %v1797_v14, %v1795_v11  ;;  %vm1895_vm0 = vcmask 1041408  }
 0x211   : > { %v1547_v14 = vadd.f32 %v3312_v15, %v3253_v57 }
 0x217   : > { %2476 = vmatmul.msk.bf16.gmra.mxu3 %vm1211_vm14, %v1692_v6 }
 0x21b   : > { %2461 = vmatmul.msk.bf16.gmra.mxu2 %vm1211_vm14, %v1603_v12 }
 0x22b   : > { %2489 = vmatmul.msk.bf16.vlgmr.msrb.gmra.mxu2 %vm1211_vm14, %v1788_v40 }
 0x23b   : > { %2490 = vmatmul.msk.bf16.gmra.mxu2 %vm1211_vm14, %v1796_v13 }
 0x24b   : > { %2491 = vmatmul.msk.bf16.gmra.mxu2 %vm1211_vm14, %v1799_v54 }
 0x27a   : > { %v1723_v41 = vpop.f32.mrf.mxu3 }
 0x27b   : > { %v1744_v51 = vrot.slane %v1723_v41, 2 }
 0x27e   : > { %v1634_v18 = vpop.f32.mrf.mxu2 }
 0x27f   : > { %v1656_v7 = vrot.slane %v1634_v18, 2 }
 0x281   : > { %v1674_v19 = vadd.f32 %v1656_v7, %v1543_v17 }
 0x282   : > { %v1725_v46 = vpop.f32.mrf.mxu3 }
 0x283   : > { %v1745_v50 = vrot.slane %v1725_v46, 2  ;;  %v1762_v33 = vadd.f32 %v1744_v51, %v1674_v19 }
 0x285   : > { %v1746_v35 = vsel %vm789_vm4, %v1744_v51, %v1745_v50 }
 0x286   : > { %v1636_v20 = vpop.f32.mrf.mxu2 }
 0x287   : > { %v1657_v3 = vrot.slane %v1636_v20, 2  ;;  %v1876_v20 = vlaneseq }
 0x289   : > { %v1658_v26 = vsel %vm789_vm4, %v1656_v7, %v1657_v3 }
 0x28a   : > { %v1675_v31 = vadd.f32 %v1658_v26, %v1544_v22  ;;  %v1728_v48 = vpop.f32.mrf.mxu3 }
 0x28b   : > { %v1747_v56 = vrot.slane %v1728_v48, 2 }
 0x28c   : > { %v1763_v58 = vadd.f32 %v1746_v35, %v1675_v31 }
 0x28d   : > { %v1748_v63 = vsel %vm789_vm4, %v1745_v50, %v1747_v56 }
 0x28e   : > { %v1639_v38 = vpop.f32.mrf.mxu2 }
 0x28f   : > { %v1659_v30 = vrot.slane %v1639_v38, 2 }
 0x291   : > { %v1660_v44 = vsel %vm789_vm4, %v1657_v3, %v1659_v30 }
 0x292   : > { %v1676_v27 = vadd.f32 %v1660_v44, %v1545_v5  ;;  %v1730_v59 = vpop.f32.mrf.mxu3  ;;  %v1549_v5 = vadd.f32 %v3312_v15, %v3292_v10 }
 0x293   : > { %v1749_v21 = vrot.slane %v1730_v59, 2  ;;  %v2580_v59 = vld [vmem:[%s3400_s5] sm:$0xff] }
 0x294   : > { %v1764_v36 = vadd.f32 %v1748_v63, %v1676_v27  ;;  %v1879_v27 = vshrl.u32 %v1876_v20, 7 }
 0x295   : > { %v1750_v45 = vsel %vm789_vm4, %v1747_v56, %v1749_v21  ;;  %v2581_v56 = vld [vmem:[%s3400_s5 + $0x8] sm:$0xff] }
 0x296   : > { %v1641_v28 = vpop.f32.mrf.mxu2 }
 0x297   : > { %v1661_v42 = vrot.slane %v1641_v28, 2  ;;  %v1548_v28 = vadd.f32 %v3312_v15, %v3272_v16 }
 0x299   : > { %v1662_v9 = vsel %vm789_vm4, %v1659_v30, %v1661_v42 }
 0x29a   : > { %v1677_v2 = vadd.f32 %v1662_v9, %v1546_v8  ;;  %v1733_v1 = vpop.f32.mrf.mxu3 }
 0x29b   : > { %v1751_v18 = vrot.slane %v1733_v1, 2 }
 0x29c   : > { %v1765_v11 = vadd.f32 %v1750_v45, %v1677_v2 }
 0x29d   : > { %v1752_v26 = vsel %vm789_vm4, %v1749_v21, %v1751_v18 }
 0x29e   : > { %v1644_v32 = vpop.f32.mrf.mxu2 }
 0x29f   : > { %v1663_v39 = vrot.slane %v1644_v32, 2  ;;  %v1880_v32 = vmul.u32 32, %v1879_v27 }
 0x2a1   : > { %v1664_v12 = vsel %vm789_vm4, %v1661_v42, %v1663_v39 }
 0x2a2   : > { %v1678_v17 = vadd.f32 %v1664_v12, %v1547_v14  ;;  %v1735_v38 = vpop.f32.mrf.mxu3 }
 0x2a3   : > { %v1753_v8 = vrot.slane %v1735_v38, 2 }
 0x2a4   : > { %v1766_v30 = vadd.f32 %v1752_v26, %v1678_v17 }
 0x2a6   : > { %v1646_v29 = vpop.f32.mrf.mxu2 }
 0x2a7   : > { %v1665_v19 = vrot.slane %v1646_v29, 2 }
 0x2a9   : > { %v1666_v44 = vsel %vm789_vm4, %v1663_v39, %v1665_v19  ;;  %v1680_v9 = vadd.f32 %v1665_v19, %v1549_v5 }
 0x2aa   : > { %v1679_v2 = vadd.f32 %v1666_v44, %v1548_v28 }
 0x2ab   : > { %v1768_v10 = vadd.f32 %v1753_v8, %v1680_v9 }
 0x2ae   : > { %v1830_v47 = vpop.f32.mrf.mxu2 }
 0x2af   : > { %v1851_v24 = vrot.slane %v1830_v47, 2  ;;  %v1754_v47 = vsel %vm789_vm4, %v1751_v18, %v1753_v8 }
 0x2b0   : > { %v1767_v50 = vadd.f32 %v1754_v47, %v1679_v2 }
 0x2b1   : > { %v1869_v25 = vadd.f32 %v1851_v24, %v1762_v33  ;;  %v1877_v33 = vand.u32 127, %v1876_v20 }
 0x2b3   : > { %v1896_v60 = vrot.slane %v1869_v25, 6  ;;  %vm1881_vm2 = vcmp.ge.s32.totalorder %v1877_v33, %v1880_v32 }
 0x2b6   : > { %v1832_v40 = vpop.f32.mrf.mxu2 }
 0x2b7   : > { %v1852_v53 = vrot.slane %v1832_v40, 2  ;;  %v1882_v40 = vadd.s32 9, %v1880_v32 }
 0x2b9   : > { %v1853_v23 = vsel %vm789_vm4, %v1851_v24, %v1852_v53  ;;  %vm1883_vm5 = vcmp.lt.s32.totalorder %v1877_v33, %v1882_v40 }
 0x2ba   : > { %v1870_v43 = vadd.f32 %v1853_v23, %v1763_v58  ;;  %vm1884_vm11 = vmand %vm1881_vm2, %vm1883_vm5  ;;  %v2700_v58 = vmov 0.0  }
 0x2bb   : > { %v2492_v23 = vsel %vm1884_vm11, 1.0, %v2700_v58 }
 0x2bc   : > { %v1897_v61 = vrot.slane %v1870_v43, 6  ;;  %v1887_v43 = vmul.f32 0.11111111, %v2492_v23 }
 0x2be   : > { %v1835_v34 = vpop.f32.mrf.mxu2  ;;  %v3328_v62 = vsel %vm1895_vm0, %v1896_v60, %v1897_v61 }
 0x2bf   : > { %v1854_v0 = vrot.slane %v1835_v34, 2  ;;  %v2635_v34 = vld [vmem:[%s3401_s6] ss:$0 sm:$0xff] }
 0x2c1   : > { %v1855_v49 = vsel %vm789_vm4, %v1852_v53, %v1854_v0 }
 0x2c2   : > { %v1871_v37 = vadd.f32 %v1855_v49, %v1764_v36 }
 0x2c4   : > { %v1899_v52 = vrot.slane %v1871_v37, 6 }
 0x2c6   : > { %v1837_v4 = vpop.f32.mrf.mxu2  ;;  %v1900_v6 = vsel %vm1895_vm0, %v1897_v61, %v1899_v52 }
 0x2c7   : > { %v1856_v55 = vrot.slane %v1837_v4, 2 }
 0x2c9   : > { %v1857_v13 = vsel %vm789_vm4, %v1854_v0, %v1856_v55 }
 0x2ca   : > { %v1872_v54 = vadd.f32 %v1857_v13, %v1765_v11 }
 0x2cc   : > { %v1901_v7 = vrot.slane %v1872_v54, 6 }
 0x2ce   : > { %v1840_v3 = vpop.f32.mrf.mxu2  ;;  %v1902_v22 = vsel %vm1895_vm0, %v1899_v52, %v1901_v7 }
 0x2cf   : > { %v1858_v31 = vrot.slane %v1840_v3, 2 }
 0x2d1   : > { %v1859_v57 = vsel %vm789_vm4, %v1856_v55, %v1858_v31 }
 0x2d2   : > { %v1873_v42 = vadd.f32 %v1859_v57, %v1766_v30 }
 0x2d4   : > { %v1903_v41 = vrot.slane %v1873_v42, 6 }
 0x2d6   : > { %v1842_v29 = vpop.f32.mrf.mxu2  ;;  %v1904_v46 = vsel %vm1895_vm0, %v1901_v7, %v1903_v41 }
 0x2d7   : > { %v1860_v48 = vrot.slane %v1842_v29, 2 }
 0x2d9   : > { %v1861_v51 = vsel %vm789_vm4, %v1858_v31, %v1860_v48  ;;  %v1875_v24 = vadd.f32 %v1860_v48, %v1768_v10 }
 0x2da   : > { %v1874_v16 = vadd.f32 %v1861_v51, %v1767_v50 }
 0x2db   : > { %v1907_v15 = vrot.slane %v1875_v24, 6 }
 0x2dc   : > { %v1905_v35 = vrot.slane %v1874_v16, 6 }
 0x2de   : > { %v1908_v53 = vsel %vm1895_vm0, %v1905_v35, %v1907_v15  ;;  %v1906_v25 = vsel %vm1895_vm0, %v1903_v41, %v1905_v35 }
 0x2df   : > { %2493 = vmatpush.msk.msrb.mxu3 %vm789_vm4, %v1908_v53 }
 0x2e1   : > { %1931 = vmatpush.msrb.mxu3 %v1906_v25 }
 0x2e3   : > { %1932 = vmatpush.msrb.mxu3 %v1904_v46 }
 0x2e5   : > { %1933 = vmatpush.msrb.mxu3 %v1902_v22 }
 0x2e7   : > { %1934 = vmatpush.msrb.mxu3 %v1900_v6 }
 0x2e9   : > { %1935 = vmatpush.msrb.mxu3 %v3328_v62 }
 0x2ea   : > { %2494 = vmatmul.msk.f32.vlgmr.msrb.gmra.mxu3 %vm1914_vm12, %v1887_v43 }
 0x2eb   : > { %1970 = vmatpush.bf16.msra.mxu3 %v2581_v56 }
 0x2ef   : > { %1971 = vmatpush.bf16.msra.mxu3 %v2580_v59 }
 0x36d   : > { %v1937_v60 = vpop.f32.mrf.mxu3 }
 0x36e   : > { %v1940_v61 = vpack.c.bf16 %v1937_v60, %v1937_v60 }
 0x370   : > { %2503 = vmatmul.msk.bf16.vlgmr.msra.gmra.mxu3 %vm1211_vm14, %v1940_v61 }
 0x3f3   : > { %v1973_v62 = vpop.f32.mrf.mxu3 }
 0x3f4   : > { %v1974_v63 = vadd.f32 %v2635_v34, %v1973_v62 }
 0x3f6   : > { %v1978_v0 = vrot.slane %v1974_v63, 1  ;;  %1980 = vst [vmem:[%s272_s22] sm:$0x1] %v1974_v63 }
 0x3f8   : > { %1981 = vst [vmem:[%s272_s22 + $0x1] sm:$0x1] %v1978_v0 }
 0x3f9   : > { %2663 = shalt.err (!%p2660_p3)
}
 0x3fa   : > { %s2701_s15 = smov 16   ;;  %s2702_s20 = smov 1  }
 0x3fb   : > { %2590 = dma.vmem_to_hbm [thread:$0]  (%p2781_p5), %s1995_s23, 32, %s1997_s29, %s1983_s28, %s2701_s15, %s2701_s15, %s2702_s20   ;;  %v1975_v36 = vpop.f32.mrf.mxu3 }
 0x3fc PF: > { %p2596_p4 = scmp.ge.s32.totalorder %s2698_s27, 2  ;;  %s2011_s19 = sand.u32 1, %s2686_s24  }
 0x3fd   : > { %s2012_s21 = scalar_lea.sflag [#allocation3], %s2011_s19 }
 0x3fe   : > { %p2593_p7 = pnand %p2596_p4, %p2785_p6 }
 0x400   : > { %p2594_p8 = pneg %p2593_p7 }
 0x402   : > { %2681 = dma.done.wait (%p2594_p8), %s2012_s21, 32  }
 0x403   : > { %2683 = vsyncadd (%p2594_p8), %s2012_s21, 4294967264  ;;  %p17_p9 = scmp.ge.s32.totalorder %s2768_s30, 4   ;;  %s3405_s24 = smov %s2690_s25 }
 0x404   : > { %s3406_s25 = smov %s2694_s26  ;;  %s3407_s26 = smov %s2779_s10 }
 0x405   : > { %s3408_s27 = smov %s2768_s30  ;;  %19 = sbr.rel (!%p17_p9) target bundleno = 3 (0x3), region = 95 }
 0x40a   :  { %2018 = vsyncpa [#allocation3], 1 }
 0x40b   :  { %2020 = vsyncpa [#allocation3 + $0x1], 1 }

</bundles_post_ra>
